<compile_context>
chip_gen: v7x
topology: tpu7x:2x2x1
jax: 0.10.0
libtpu: 0.0.40
codegen_flags: <defaults>
</compile_context>

<pallas_src>
import math
import functools

import jax
import jax.numpy as jnp
from jax.experimental import pallas as pl
from jax.experimental.pallas import tpu as pltpu


_LN_EPS = 1e-5


def _round_up(n, m):
    return ((n + m - 1) // m) * m


def _layer_norm(v, g, b):
    # LayerNorm subclass semantics: computed in float32.
    mu = jnp.mean(v, axis=-1, keepdims=True)
    var = jnp.mean(jnp.square(v - mu), axis=-1, keepdims=True)
    return (v - mu) * jax.lax.rsqrt(var + _LN_EPS) * g + b


# ----------------------------------------------------------------------------
# Hardware-aware knobs.
# ----------------------------------------------------------------------------
def _vmem_limit_bytes():
    phys = None
    try:
        phys = int(pltpu.get_tpu_info().vmem_capacity_bytes)
    except Exception:
        phys = None
    if not phys:
        try:
            kind = jax.devices()[0].device_kind.lower()
            phys = 64 * 1024 * 1024 if "v7" in kind else 128 * 1024 * 1024
        except Exception:
            phys = 128 * 1024 * 1024
    # Leave headroom for double-buffered activation slabs / internal scratch.
    return min(int(phys * 3 // 4), 100 * 1024 * 1024)


def _num_tensorcores():
    # Chips with >1 TensorCore visible to one pallas_call (megacore / v7x).
    try:
        kind = jax.devices()[0].device_kind.lower()
        if ("v7" in kind) or ("v5p" in kind) or ("v4" in kind):
            return 2
    except Exception:
        pass
    return 1


def _supports_buffered():
    try:
        pl.BlockSpec((8, 128), lambda i: (0, 0), pipeline_mode=pl.Buffered(1))
        return True
    except Exception:
        return False


_HAS_BUFFERED = _supports_buffered()


def _pick_block_batch(N, S_pad, W, H, n_cores, vmem_limit):
    """Batch elements packed per grid step."""
    if N <= 1:
        return 1
    bt = max(1, -(-512 // S_pad))            # target ~512 rows per step (MXU M fill)
    if n_cores > 1:
        bt = min(bt, max(1, N // n_cores))   # keep >= n_cores grid steps
    bt = min(bt, N)
    # Crude VMEM budget: resident bf16 weights + f32 per-batch-elem activations.
    weight_bytes = 12 * W * W * 2 + 16 * W * 4
    act_per_b = S_pad * (20 * W + 3 * H * S_pad) * 4
    budget = int(0.8 * vmem_limit) - weight_bytes
    if budget > 0 and act_per_b > 0:
        bt = max(1, min(bt, budget // (2 * act_per_b)))
    return max(1, bt)


# ----------------------------------------------------------------------------
# Pallas kernel: one full ResidualAttentionBlock for one packed batch block.
# ----------------------------------------------------------------------------
def _resblock_kernel(n_head, emit_attnw,
                     x_ref, ln1_g, ln1_b, w_qkv, b_qkv, wo, bo,
                     ln2_g, ln2_b, wfc, bfc, wproj, bproj, mask_ref,
                     *out_refs):
    y_ref = out_refs[0]
    attnw_ref = out_refs[1] if emit_attnw else None

    Bt, S, W = x_ref.shape
    H = n_head
    dh = W // H
    M = Bt * S

    x = x_ref[...].astype(jnp.float32).reshape(M, W)             # (M, W) f32

    # ---- attention branch: LN -> fused QKV GEMM -> batched SDPA -> out_proj
    xn = _layer_norm(x, ln1_g[...], ln1_b[...])                  # f32
    qkv = jnp.dot(xn.astype(jnp.bfloat16), w_qkv[...],
                  preferred_element_type=jnp.float32) + b_qkv[...]   # (M, 3W)
    qkv_b = qkv.astype(jnp.bfloat16)

    def gather_heads(col0):
        # (M, 3W) fused activations -> (Bt*H, S, dh) bf16 for one of q/k/v.
        # Lane slices + batch-axis stack only (no sublane-structure transpose).
        parts = [qkv_b[:, col0 + h * dh: col0 + (h + 1) * dh].reshape(Bt, S, dh)
                 for h in range(H)]
        return jnp.stack(parts, axis=1).reshape(Bt * H, S, dh)

    q = gather_heads(0 * W)      # 1/sqrt(dh) already folded into w_qkv / b_qkv
    k = gather_heads(1 * W)
    v = gather_heads(2 * W)

    s = jnp.einsum("bqd,bkd->bqk", q, k,
                   preferred_element_type=jnp.float32) + mask_ref[...]
    m = jnp.max(s, axis=-1, keepdims=True)
    e = jnp.exp(s - m)                                           # f32 softmax
    denom = jnp.sum(e, axis=-1, keepdims=True)
    p = e * pl.reciprocal(denom, approx=True)

    ctx = jnp.einsum("bqk,bkd->bqd", p.astype(jnp.bfloat16), v,
                     preferred_element_type=jnp.float32)         # (Bt*H, S, dh)

    # merge heads back to (M, W): lane concat of per-head slices (cheap).
    ctx4 = ctx.astype(jnp.bfloat16).reshape(Bt, H, S, dh)
    ctx_m = jnp.concatenate([ctx4[:, h] for h in range(H)], axis=-1)  # (Bt,S,W)
    ctx_m = ctx_m.reshape(M, W)

    attn_out = jnp.dot(ctx_m, wo[...],
                       preferred_element_type=jnp.float32) + bo[...]
    x1 = x + attn_out                                            # first residual

    if emit_attnw:
        # need_weights=True, average_attn_weights=True -> exact softmax,
        # mean over heads (exact division: parity with PyTorch).
        p_exact = e / denom
        aw = jnp.mean(p_exact.reshape(Bt, H, S, S), axis=1)      # (Bt, S, S)
        sw = attnw_ref.shape[-1]
        if sw != S:                                              # lane-dense store
            aw = jnp.pad(aw, ((0, 0), (0, 0), (0, sw - S)))
        attnw_ref[...] = aw.astype(attnw_ref.dtype)

    # ---- MLP branch ---------------------------------------------------------
    x1n = _layer_norm(x1, ln2_g[...], ln2_b[...])
    h = jnp.dot(x1n.astype(jnp.bfloat16), wfc[...],
                preferred_element_type=jnp.float32) + bfc[...]
    h = h * jax.nn.sigmoid(1.702 * h)                            # QuickGELU (f32)
    mlp = jnp.dot(h.astype(jnp.bfloat16), wproj[...],
                  preferred_element_type=jnp.float32) + bproj[...]

    y_ref[...] = (x1 + mlp).reshape(Bt, S, W).astype(y_ref.dtype)


def residual_attention_block(x_bsw, params, mask, n_head, *,
                             need_weights=False, block_batch=1,
                             vmem_limit=None):
    """x_bsw: (B, S, W) float32 (B multiple of block_batch, S sublane-padded).
    Returns (y, attn_weights_or_None); attn_weights last dim is lane-padded."""
    B, S, W = x_bsw.shape
    Bt = block_batch
    assert B % Bt == 0 and W % n_head == 0
    grid = (B // Bt,)
    Sw = _round_up(S, 128) if need_weights else S
    vmem_limit = vmem_limit or _vmem_limit_bytes()

    def build_in_specs(use_buffered):
        def const_spec(shape):
            zeros = (0,) * len(shape)
            idx = lambda b, _z=zeros: _z
            if use_buffered:
                # grid-invariant blocks: single buffer (halves resident VMEM)
                return pl.BlockSpec(shape, idx, pipeline_mode=pl.Buffered(1))
            return pl.BlockSpec(shape, idx)

        return [
            pl.BlockSpec((Bt, S, W), lambda b: (b, 0, 0)),        # x
            const_spec((1, W)), const_spec((1, W)),               # ln1 g / b
            const_spec((W, 3 * W)), const_spec((1, 3 * W)),       # fused qkv w / b
            const_spec((W, W)), const_spec((1, W)),               # out_proj w / b
            const_spec((1, W)), const_spec((1, W)),               # ln2 g / b
            const_spec((W, 4 * W)), const_spec((1, 4 * W)),       # c_fc w / b
            const_spec((4 * W, W)), const_spec((1, W)),           # c_proj w / b
            const_spec((S, S)),                                   # additive mask
        ]

    out_specs = [pl.BlockSpec((Bt, S, W), lambda b: (b, 0, 0))]
    out_shape = [jax.ShapeDtypeStruct((B, S, W), x_bsw.dtype)]
    if need_weights:
        out_specs.append(pl.BlockSpec((Bt, S, Sw), lambda b: (b, 0, 0)))
        out_shape.append(jax.ShapeDtypeStruct((B, S, Sw), jnp.float32))

    kernel = functools.partial(_resblock_kernel, n_head, need_weights)
    args = (x_bsw,
            params["ln1_g"], params["ln1_b"],
            params["w_qkv"], params["b_qkv"],
            params["wo"], params["bo"],
            params["ln2_g"], params["ln2_b"],
            params["wfc"], params["bfc"],
            params["wproj"], params["bproj"],
            mask)

    def run(use_buffered):
        return pl.pallas_call(
            kernel,
            grid=grid,
            in_specs=build_in_specs(use_buffered),
            out_specs=tuple(out_specs),
            out_shape=tuple(out_shape),
            compiler_params=pltpu.CompilerParams(
                dimension_semantics=("parallel",),
                vmem_limit_bytes=vmem_limit,
            ),
        )(*args)

    try:
        outs = run(_HAS_BUFFERED)
    except Exception:
        if not _HAS_BUFFERED:
            raise
        outs = run(False)      # fallback: default double-buffered specs

    if need_weights:
        return outs[0], outs[1]
    return outs[0], None


# ----------------------------------------------------------------------------
# Host-side parameter preparation (PyTorch layout -> kernel layout).
# ----------------------------------------------------------------------------
def _prepare_block_params(raw, width, n_head, weight_dtype=jnp.bfloat16):
    W = width
    dh = W // n_head
    scale = 1.0 / math.sqrt(dh)

    in_w = jnp.asarray(raw["in_proj_weight"], jnp.float32)       # (3W, W)
    in_b = jnp.asarray(raw["in_proj_bias"], jnp.float32)         # (3W,)
    in_w = in_w.at[:W].multiply(scale)     # fold 1/sqrt(dh) into q projection
    in_b = in_b.at[:W].multiply(scale)

    return {
        "ln1_g": raw["ln1_g"].reshape(1, W).astype(jnp.float32),
        "ln1_b": raw["ln1_b"].reshape(1, W).astype(jnp.float32),
        # fused QKV weight: (W, 3W) so the kernel does one lane-aligned GEMM
        "w_qkv": in_w.T.astype(weight_dtype),
        "b_qkv": in_b.reshape(1, 3 * W).astype(jnp.float32),
        # out_proj as plain (W, W): merged-head ctx @ wo
        "wo": raw["out_proj_weight"].T.astype(weight_dtype),
        "bo": raw["out_proj_bias"].reshape(1, W).astype(jnp.float32),
        "ln2_g": raw["ln2_g"].reshape(1, W).astype(jnp.float32),
        "ln2_b": raw["ln2_b"].reshape(1, W).astype(jnp.float32),
        "wfc": raw["c_fc_weight"].T.astype(weight_dtype),        # (W, 4W)
        "bfc": raw["c_fc_bias"].reshape(1, 4 * W).astype(jnp.float32),
        "wproj": raw["c_proj_weight"].T.astype(weight_dtype),    # (4W, W)
        "bproj": raw["c_proj_bias"].reshape(1, W).astype(jnp.float32),
    }


# ----------------------------------------------------------------------------
# Transformer wrapper (parameter setup + per-layer kernel calls are glue).
# ----------------------------------------------------------------------------
class Transformer:
    def __init__(self, width, layers, heads, attn_mask=None,
                 prompt_num=25, attr_num=26, key=None):
        self.width = width
        self.layers = layers
        self.heads = heads
        self.attn_mask = attn_mask
        if key is None:
            key = jax.random.PRNGKey(0)

        # prompt_text_deep parameter (text branch of __init__); unused on the
        # default (non-args.use_textprompt) forward path.
        val = math.sqrt(6.0 / float(3 * (14 * 14) + width))
        key, pk = jax.random.split(key)
        self.prompt_text_deep = jax.random.uniform(
            pk, (layers, prompt_num, attr_num, width),
            minval=-val, maxval=val, dtype=jnp.float32)

        self.block_params = []
        W = width
        for _ in range(layers):
            key, k1, k2, k3, k4 = jax.random.split(key, 5)
            raw = {
                "ln1_g": jnp.ones((W,), jnp.float32),
                "ln1_b": jnp.zeros((W,), jnp.float32),
                "in_proj_weight": 0.02 * jax.random.normal(k1, (3 * W, W), jnp.float32),
                "in_proj_bias": jnp.zeros((3 * W,), jnp.float32),
                "out_proj_weight": 0.02 * jax.random.normal(k2, (W, W), jnp.float32),
                "out_proj_bias": jnp.zeros((W,), jnp.float32),
                "ln2_g": jnp.ones((W,), jnp.float32),
                "ln2_b": jnp.zeros((W,), jnp.float32),
                "c_fc_weight": 0.02 * jax.random.normal(k3, (4 * W, W), jnp.float32),
                "c_fc_bias": jnp.zeros((4 * W,), jnp.float32),
                "c_proj_weight": 0.02 * jax.random.normal(k4, (W, 4 * W), jnp.float32),
                "c_proj_bias": jnp.zeros((W,), jnp.float32),
            }
            self.block_params.append(_prepare_block_params(raw, width, heads))

    def forward(self, x_lnw):
        # x_lnw: (L, N, E)  -- PyTorch MultiheadAttention layout.
        L, N, E = x_lnw.shape
        base_mask = (self.attn_mask if self.attn_mask is not None
                     else jnp.zeros((L, L), jnp.float32)).astype(jnp.float32)

        # ---- pad seq to a sublane multiple; padded keys get -inf mask ------
        S_pad = _round_up(L, 8)
        x = jnp.transpose(x_lnw, (1, 0, 2))          # -> (N, L, E)
        if S_pad != L:
            x = jnp.pad(x, ((0, 0), (0, S_pad - L), (0, 0)))
            mask = jnp.zeros((S_pad, S_pad), jnp.float32)
            mask = mask.at[:L, :L].set(base_mask)
            mask = mask.at[:, L:].set(-jnp.inf)
        else:
            mask = base_mask

        # ---- generation-aware batch packing ---------------------------------
        vmem_limit = _vmem_limit_bytes()
        n_cores = _num_tensorcores()
        Bt = _pick_block_batch(N, S_pad, E, self.heads, n_cores, vmem_limit)
        B_pad = _round_up(N, Bt)
        if B_pad != N:
            x = jnp.pad(x, ((0, B_pad - N), (0, 0), (0, 0)))

        attnw = None
        n_layers = len(self.block_params)
        # TODO(synk): cross-call weight prefetch / 2-layer fusion to hide the
        #             per-layer cold weight load (v5e is DMA-bound here).
        for i, p in enumerate(self.block_params):
            last = (i == n_layers - 1)   # attn weights only needed for last layer
            x, aw = residual_attention_block(
                x, p, mask, self.heads, need_weights=last,
                block_batch=Bt, vmem_limit=vmem_limit)
            if last:
                attnw = aw

        y = jnp.transpose(x[:N, :L, :], (1, 0, 2))   # back to (L, N, E)
        if attnw is not None:
            attnw = attnw[:N, :L, :L]
        return y, attnw


if __name__ == "__main__":
    key = jax.random.PRNGKey(0)
    k_x, k_p = jax.random.split(key)

    seq, batch, width, heads, layers = 8, 2, 32, 4, 2
    x = jax.random.normal(k_x, (seq, batch, width), dtype=jnp.float32)

    model = Transformer(width=width, layers=layers, heads=heads,
                        attn_mask=None, key=k_p)
    y, attnw = model.forward(x)
    y = jax.block_until_ready(y)
    attnw = jax.block_until_ready(attnw)

    assert y.shape == (seq, batch, width)
    assert attnw.shape == (batch, seq, seq)
    assert bool(jnp.all(jnp.isfinite(y)))
    assert bool(jnp.all(jnp.isfinite(attnw)))
    print("KERNEL_OK")
</pallas_src>

<mosaic_0001>
module attributes {stable_mosaic.version = 11 : i64} {
  func.func @_resblock_kernel(%arg0: i32, %arg1: memref<2x8x32xf32, #tpu.memory_space<vmem>>, %arg2: memref<1x32xf32, #tpu.memory_space<vmem>>, %arg3: memref<1x32xf32, #tpu.memory_space<vmem>>, %arg4: memref<32x96xbf16, #tpu.memory_space<vmem>>, %arg5: memref<1x96xf32, #tpu.memory_space<vmem>>, %arg6: memref<32x32xbf16, #tpu.memory_space<vmem>>, %arg7: memref<1x32xf32, #tpu.memory_space<vmem>>, %arg8: memref<1x32xf32, #tpu.memory_space<vmem>>, %arg9: memref<1x32xf32, #tpu.memory_space<vmem>>, %arg10: memref<32x128xbf16, #tpu.memory_space<vmem>>, %arg11: memref<1x128xf32, #tpu.memory_space<vmem>>, %arg12: memref<128x32xbf16, #tpu.memory_space<vmem>>, %arg13: memref<1x32xf32, #tpu.memory_space<vmem>>, %arg14: memref<8x8xf32, #tpu.memory_space<vmem>>, %arg15: memref<2x8x32xf32, #tpu.memory_space<vmem>>) attributes {dimension_semantics = [#tpu.dimension_semantics<parallel>], iteration_bounds = array<i64: 1>, scalar_prefetch = 0 : i64, scratch_operands = 0 : i64, tpu.core_type = #tpu.core_type<tc>, window_params = [{transform_indices = @transform_0, window_bounds = array<i64: 2, 8, 32>}, {pipeline_mode = #tpu.pipeline_mode<synchronous>, transform_indices = @transform_1, window_bounds = array<i64: 1, 32>}, {pipeline_mode = #tpu.pipeline_mode<synchronous>, transform_indices = @transform_2, window_bounds = array<i64: 1, 32>}, {pipeline_mode = #tpu.pipeline_mode<synchronous>, transform_indices = @transform_3, window_bounds = array<i64: 32, 96>}, {pipeline_mode = #tpu.pipeline_mode<synchronous>, transform_indices = @transform_4, window_bounds = array<i64: 1, 96>}, {pipeline_mode = #tpu.pipeline_mode<synchronous>, transform_indices = @transform_5, window_bounds = array<i64: 32, 32>}, {pipeline_mode = #tpu.pipeline_mode<synchronous>, transform_indices = @transform_6, window_bounds = array<i64: 1, 32>}, {pipeline_mode = #tpu.pipeline_mode<synchronous>, transform_indices = @transform_7, window_bounds = array<i64: 1, 32>}, {pipeline_mode = #tpu.pipeline_mode<synchronous>, transform_indices = @transform_8, window_bounds = array<i64: 1, 32>}, {pipeline_mode = #tpu.pipeline_mode<synchronous>, transform_indices = @transform_9, window_bounds = array<i64: 32, 128>}, {pipeline_mode = #tpu.pipeline_mode<synchronous>, transform_indices = @transform_10, window_bounds = array<i64: 1, 128>}, {pipeline_mode = #tpu.pipeline_mode<synchronous>, transform_indices = @transform_11, window_bounds = array<i64: 128, 32>}, {pipeline_mode = #tpu.pipeline_mode<synchronous>, transform_indices = @transform_12, window_bounds = array<i64: 1, 32>}, {pipeline_mode = #tpu.pipeline_mode<synchronous>, transform_indices = @transform_13, window_bounds = array<i64: 8, 8>}, {transform_indices = @transform_14, window_bounds = array<i64: 2, 8, 32>}]} {
    %c0 = arith.constant 0 : index
    %c0_0 = arith.constant 0 : index
    %c0_1 = arith.constant 0 : index
    %0 = vector.load %arg1[%c0, %c0_0, %c0_1] : memref<2x8x32xf32, #tpu.memory_space<vmem>>, vector<2x8x32xf32>
    %1 = vector.shape_cast %0 : vector<2x8x32xf32> to vector<16x32xf32>
    %c0_2 = arith.constant 0 : index
    %c0_3 = arith.constant 0 : index
    %2 = vector.load %arg2[%c0_2, %c0_3] : memref<1x32xf32, #tpu.memory_space<vmem>>, vector<1x32xf32>
    %c0_4 = arith.constant 0 : index
    %c0_5 = arith.constant 0 : index
    %3 = vector.load %arg3[%c0_4, %c0_5] : memref<1x32xf32, #tpu.memory_space<vmem>>, vector<1x32xf32>
    %cst = arith.constant dense<0.000000e+00> : vector<16xf32>
    %4 = vector.multi_reduction <add>, %1, %cst [1] : vector<16x32xf32> to vector<16xf32>
    %5 = vector.shape_cast %4 : vector<16xf32> to vector<16x1xf32>
    %cst_6 = arith.constant 3.200000e+01 : f32
    %6 = vector.broadcast %cst_6 : f32 to vector<16x1xf32>
    %7 = arith.divf %5, %6 : vector<16x1xf32>
    %8 = vector.broadcast %7 : vector<16x1xf32> to vector<16x32xf32>
    %9 = arith.subf %1, %8 : vector<16x32xf32>
    %10 = arith.mulf %9, %9 : vector<16x32xf32>
    %cst_7 = arith.constant dense<0.000000e+00> : vector<16xf32>
    %11 = vector.multi_reduction <add>, %10, %cst_7 [1] : vector<16x32xf32> to vector<16xf32>
    %12 = vector.shape_cast %11 : vector<16xf32> to vector<16x1xf32>
    %cst_8 = arith.constant 3.200000e+01 : f32
    %13 = vector.broadcast %cst_8 : f32 to vector<16x1xf32>
    %14 = arith.divf %12, %13 : vector<16x1xf32>
    %15 = vector.broadcast %7 : vector<16x1xf32> to vector<16x32xf32>
    %16 = arith.subf %1, %15 : vector<16x32xf32>
    %cst_9 = arith.constant 9.99999974E-6 : f32
    %17 = vector.broadcast %cst_9 : f32 to vector<16x1xf32>
    %18 = arith.addf %14, %17 : vector<16x1xf32>
    %19 = math.rsqrt %18 : vector<16x1xf32>
    %20 = vector.broadcast %19 : vector<16x1xf32> to vector<16x32xf32>
    %21 = arith.mulf %16, %20 : vector<16x32xf32>
    %22 = vector.broadcast %2 : vector<1x32xf32> to vector<16x32xf32>
    %23 = arith.mulf %21, %22 : vector<16x32xf32>
    %24 = vector.broadcast %3 : vector<1x32xf32> to vector<16x32xf32>
    %25 = arith.addf %23, %24 : vector<16x32xf32>
    %26 = arith.truncf %25 : vector<16x32xf32> to vector<16x32xbf16>
    %c0_10 = arith.constant 0 : index
    %c0_11 = arith.constant 0 : index
    %27 = vector.load %arg4[%c0_10, %c0_11] : memref<32x96xbf16, #tpu.memory_space<vmem>>, vector<32x96xbf16>
    %cst_12 = arith.constant dense<0.000000e+00> : vector<16x96xf32>
    %28 = tpu.matmul %26, %27, %cst_12 {dimension_numbers = #tpu.dot_dimension_numbers<[1], [0], [0], [1], [0, 0, 1, 1], [], []>} : vector<16x32xbf16>, vector<32x96xbf16>, vector<16x96xf32> -> vector<16x96xf32>
    %c0_13 = arith.constant 0 : index
    %c0_14 = arith.constant 0 : index
    %29 = vector.load %arg5[%c0_13, %c0_14] : memref<1x96xf32, #tpu.memory_space<vmem>>, vector<1x96xf32>
    %30 = vector.broadcast %29 : vector<1x96xf32> to vector<16x96xf32>
    %31 = arith.addf %28, %30 : vector<16x96xf32>
    %32 = arith.truncf %31 : vector<16x96xf32> to vector<16x96xbf16>
    %33 = vector.extract_strided_slice %32 {offsets = [0, 0], sizes = [16, 8], strides = [1, 1]} : vector<16x96xbf16> to vector<16x8xbf16>
    %34 = vector.shape_cast %33 : vector<16x8xbf16> to vector<2x8x8xbf16>
    %35 = vector.extract_strided_slice %32 {offsets = [0, 8], sizes = [16, 8], strides = [1, 1]} : vector<16x96xbf16> to vector<16x8xbf16>
    %36 = vector.shape_cast %35 : vector<16x8xbf16> to vector<2x8x8xbf16>
    %37 = vector.extract_strided_slice %32 {offsets = [0, 16], sizes = [16, 8], strides = [1, 1]} : vector<16x96xbf16> to vector<16x8xbf16>
    %38 = vector.shape_cast %37 : vector<16x8xbf16> to vector<2x8x8xbf16>
    %39 = vector.extract_strided_slice %32 {offsets = [0, 24], sizes = [16, 8], strides = [1, 1]} : vector<16x96xbf16> to vector<16x8xbf16>
    %40 = vector.shape_cast %39 : vector<16x8xbf16> to vector<2x8x8xbf16>
    %41 = vector.shape_cast %34 : vector<2x8x8xbf16> to vector<2x1x8x8xbf16>
    %42 = vector.shape_cast %36 : vector<2x8x8xbf16> to vector<2x1x8x8xbf16>
    %43 = vector.shape_cast %38 : vector<2x8x8xbf16> to vector<2x1x8x8xbf16>
    %44 = vector.shape_cast %40 : vector<2x8x8xbf16> to vector<2x1x8x8xbf16>
    %45 = tpu.concatenate %41, %42, %43, %44 in 1 : vector<2x1x8x8xbf16>, vector<2x1x8x8xbf16>, vector<2x1x8x8xbf16>, vector<2x1x8x8xbf16> -> vector<2x4x8x8xbf16>
    %46 = vector.shape_cast %45 : vector<2x4x8x8xbf16> to vector<8x8x8xbf16>
    %47 = vector.extract_strided_slice %32 {offsets = [0, 32], sizes = [16, 8], strides = [1, 1]} : vector<16x96xbf16> to vector<16x8xbf16>
    %48 = vector.shape_cast %47 : vector<16x8xbf16> to vector<2x8x8xbf16>
    %49 = vector.extract_strided_slice %32 {offsets = [0, 40], sizes = [16, 8], strides = [1, 1]} : vector<16x96xbf16> to vector<16x8xbf16>
    %50 = vector.shape_cast %49 : vector<16x8xbf16> to vector<2x8x8xbf16>
    %51 = vector.extract_strided_slice %32 {offsets = [0, 48], sizes = [16, 8], strides = [1, 1]} : vector<16x96xbf16> to vector<16x8xbf16>
    %52 = vector.shape_cast %51 : vector<16x8xbf16> to vector<2x8x8xbf16>
    %53 = vector.extract_strided_slice %32 {offsets = [0, 56], sizes = [16, 8], strides = [1, 1]} : vector<16x96xbf16> to vector<16x8xbf16>
    %54 = vector.shape_cast %53 : vector<16x8xbf16> to vector<2x8x8xbf16>
    %55 = vector.shape_cast %48 : vector<2x8x8xbf16> to vector<2x1x8x8xbf16>
    %56 = vector.shape_cast %50 : vector<2x8x8xbf16> to vector<2x1x8x8xbf16>
    %57 = vector.shape_cast %52 : vector<2x8x8xbf16> to vector<2x1x8x8xbf16>
    %58 = vector.shape_cast %54 : vector<2x8x8xbf16> to vector<2x1x8x8xbf16>
    %59 = tpu.concatenate %55, %56, %57, %58 in 1 : vector<2x1x8x8xbf16>, vector<2x1x8x8xbf16>, vector<2x1x8x8xbf16>, vector<2x1x8x8xbf16> -> vector<2x4x8x8xbf16>
    %60 = vector.shape_cast %59 : vector<2x4x8x8xbf16> to vector<8x8x8xbf16>
    %61 = vector.extract_strided_slice %32 {offsets = [0, 64], sizes = [16, 8], strides = [1, 1]} : vector<16x96xbf16> to vector<16x8xbf16>
    %62 = vector.shape_cast %61 : vector<16x8xbf16> to vector<2x8x8xbf16>
    %63 = vector.extract_strided_slice %32 {offsets = [0, 72], sizes = [16, 8], strides = [1, 1]} : vector<16x96xbf16> to vector<16x8xbf16>
    %64 = vector.shape_cast %63 : vector<16x8xbf16> to vector<2x8x8xbf16>
    %65 = vector.extract_strided_slice %32 {offsets = [0, 80], sizes = [16, 8], strides = [1, 1]} : vector<16x96xbf16> to vector<16x8xbf16>
    %66 = vector.shape_cast %65 : vector<16x8xbf16> to vector<2x8x8xbf16>
    %67 = vector.extract_strided_slice %32 {offsets = [0, 88], sizes = [16, 8], strides = [1, 1]} : vector<16x96xbf16> to vector<16x8xbf16>
    %68 = vector.shape_cast %67 : vector<16x8xbf16> to vector<2x8x8xbf16>
    %69 = vector.shape_cast %62 : vector<2x8x8xbf16> to vector<2x1x8x8xbf16>
    %70 = vector.shape_cast %64 : vector<2x8x8xbf16> to vector<2x1x8x8xbf16>
    %71 = vector.shape_cast %66 : vector<2x8x8xbf16> to vector<2x1x8x8xbf16>
    %72 = vector.shape_cast %68 : vector<2x8x8xbf16> to vector<2x1x8x8xbf16>
    %73 = tpu.concatenate %69, %70, %71, %72 in 1 : vector<2x1x8x8xbf16>, vector<2x1x8x8xbf16>, vector<2x1x8x8xbf16>, vector<2x1x8x8xbf16> -> vector<2x4x8x8xbf16>
    %74 = vector.shape_cast %73 : vector<2x4x8x8xbf16> to vector<8x8x8xbf16>
    "tpu.trace_start"() <{level = 10 : i32, message = "bqd,bkd->bqk"}> : () -> ()
    %cst_15 = arith.constant dense<0.000000e+00> : vector<8x8x8xf32>
    %75 = tpu.matmul %46, %60, %cst_15 {dimension_numbers = #tpu.dot_dimension_numbers<[2], [2], [1], [1], [0, 0, 0, 1, 1, 1], [0], [0]>} : vector<8x8x8xbf16>, vector<8x8x8xbf16>, vector<8x8x8xf32> -> vector<8x8x8xf32>
    "tpu.trace_stop"() : () -> ()
    %c0_16 = arith.constant 0 : index
    %c0_17 = arith.constant 0 : index
    %76 = vector.load %arg14[%c0_16, %c0_17] : memref<8x8xf32, #tpu.memory_space<vmem>>, vector<8x8xf32>
    %77 = vector.shape_cast %76 : vector<8x8xf32> to vector<1x8x8xf32>
    %78 = vector.broadcast %77 : vector<1x8x8xf32> to vector<8x8x8xf32>
    %79 = arith.addf %75, %78 : vector<8x8x8xf32>
    %cst_18 = arith.constant dense<0xFF800000> : vector<8x8xf32>
    %80 = vector.multi_reduction <maximumf>, %79, %cst_18 [2] : vector<8x8x8xf32> to vector<8x8xf32>
    %81 = vector.shape_cast %80 : vector<8x8xf32> to vector<8x8x1xf32>
    %82 = vector.broadcast %81 : vector<8x8x1xf32> to vector<8x8x8xf32>
    %83 = arith.subf %79, %82 : vector<8x8x8xf32>
    %84 = math.exp %83 : vector<8x8x8xf32>
    %cst_19 = arith.constant dense<0.000000e+00> : vector<8x8xf32>
    %85 = vector.multi_reduction <add>, %84, %cst_19 [2] : vector<8x8x8xf32> to vector<8x8xf32>
    %86 = vector.shape_cast %85 : vector<8x8xf32> to vector<8x8x1xf32>
    %87 = tpu.reciprocal %86 {approx = true} : vector<8x8x1xf32> -> vector<8x8x1xf32>
    %88 = vector.broadcast %87 : vector<8x8x1xf32> to vector<8x8x8xf32>
    %89 = arith.mulf %84, %88 : vector<8x8x8xf32>
    %90 = arith.truncf %89 : vector<8x8x8xf32> to vector<8x8x8xbf16>
    "tpu.trace_start"() <{level = 10 : i32, message = "bqk,bkd->bqd"}> : () -> ()
    %cst_20 = arith.constant dense<0.000000e+00> : vector<8x8x8xf32>
    %91 = tpu.matmul %90, %74, %cst_20 {dimension_numbers = #tpu.dot_dimension_numbers<[2], [1], [1], [2], [0, 0, 0, 1, 1, 2], [0], [0]>} : vector<8x8x8xbf16>, vector<8x8x8xbf16>, vector<8x8x8xf32> -> vector<8x8x8xf32>
    "tpu.trace_stop"() : () -> ()
    %92 = arith.truncf %91 : vector<8x8x8xf32> to vector<8x8x8xbf16>
    %93 = vector.shape_cast %92 : vector<8x8x8xbf16> to vector<2x4x8x8xbf16>
    %94 = vector.extract_strided_slice %93 {offsets = [0, 0, 0, 0], sizes = [2, 1, 8, 8], strides = [1, 1, 1, 1]} : vector<2x4x8x8xbf16> to vector<2x1x8x8xbf16>
    %95 = vector.shape_cast %94 : vector<2x1x8x8xbf16> to vector<2x8x8xbf16>
    %96 = vector.extract_strided_slice %93 {offsets = [0, 1, 0, 0], sizes = [2, 1, 8, 8], strides = [1, 1, 1, 1]} : vector<2x4x8x8xbf16> to vector<2x1x8x8xbf16>
    %97 = vector.shape_cast %96 : vector<2x1x8x8xbf16> to vector<2x8x8xbf16>
    %98 = vector.extract_strided_slice %93 {offsets = [0, 2, 0, 0], sizes = [2, 1, 8, 8], strides = [1, 1, 1, 1]} : vector<2x4x8x8xbf16> to vector<2x1x8x8xbf16>
    %99 = vector.shape_cast %98 : vector<2x1x8x8xbf16> to vector<2x8x8xbf16>
    %100 = vector.extract_strided_slice %93 {offsets = [0, 3, 0, 0], sizes = [2, 1, 8, 8], strides = [1, 1, 1, 1]} : vector<2x4x8x8xbf16> to vector<2x1x8x8xbf16>
    %101 = vector.shape_cast %100 : vector<2x1x8x8xbf16> to vector<2x8x8xbf16>
    %102 = tpu.concatenate %95, %97, %99, %101 in 2 : vector<2x8x8xbf16>, vector<2x8x8xbf16>, vector<2x8x8xbf16>, vector<2x8x8xbf16> -> vector<2x8x32xbf16>
    %103 = vector.shape_cast %102 : vector<2x8x32xbf16> to vector<16x32xbf16>
    %c0_21 = arith.constant 0 : index
    %c0_22 = arith.constant 0 : index
    %104 = vector.load %arg6[%c0_21, %c0_22] : memref<32x32xbf16, #tpu.memory_space<vmem>>, vector<32x32xbf16>
    %cst_23 = arith.constant dense<0.000000e+00> : vector<16x32xf32>
    %105 = tpu.matmul %103, %104, %cst_23 {dimension_numbers = #tpu.dot_dimension_numbers<[1], [0], [0], [1], [0, 0, 1, 1], [], []>} : vector<16x32xbf16>, vector<32x32xbf16>, vector<16x32xf32> -> vector<16x32xf32>
    %c0_24 = arith.constant 0 : index
    %c0_25 = arith.constant 0 : index
    %106 = vector.load %arg7[%c0_24, %c0_25] : memref<1x32xf32, #tpu.memory_space<vmem>>, vector<1x32xf32>
    %107 = vector.broadcast %106 : vector<1x32xf32> to vector<16x32xf32>
    %108 = arith.addf %105, %107 : vector<16x32xf32>
    %109 = arith.addf %1, %108 : vector<16x32xf32>
    %c0_26 = arith.constant 0 : index
    %c0_27 = arith.constant 0 : index
    %110 = vector.load %arg8[%c0_26, %c0_27] : memref<1x32xf32, #tpu.memory_space<vmem>>, vector<1x32xf32>
    %c0_28 = arith.constant 0 : index
    %c0_29 = arith.constant 0 : index
    %111 = vector.load %arg9[%c0_28, %c0_29] : memref<1x32xf32, #tpu.memory_space<vmem>>, vector<1x32xf32>
    %cst_30 = arith.constant dense<0.000000e+00> : vector<16xf32>
    %112 = vector.multi_reduction <add>, %109, %cst_30 [1] : vector<16x32xf32> to vector<16xf32>
    %113 = vector.shape_cast %112 : vector<16xf32> to vector<16x1xf32>
    %cst_31 = arith.constant 3.200000e+01 : f32
    %114 = vector.broadcast %cst_31 : f32 to vector<16x1xf32>
    %115 = arith.divf %113, %114 : vector<16x1xf32>
    %116 = vector.broadcast %115 : vector<16x1xf32> to vector<16x32xf32>
    %117 = arith.subf %109, %116 : vector<16x32xf32>
    %118 = arith.mulf %117, %117 : vector<16x32xf32>
    %cst_32 = arith.constant dense<0.000000e+00> : vector<16xf32>
    %119 = vector.multi_reduction <add>, %118, %cst_32 [1] : vector<16x32xf32> to vector<16xf32>
    %120 = vector.shape_cast %119 : vector<16xf32> to vector<16x1xf32>
    %cst_33 = arith.constant 3.200000e+01 : f32
    %121 = vector.broadcast %cst_33 : f32 to vector<16x1xf32>
    %122 = arith.divf %120, %121 : vector<16x1xf32>
    %123 = vector.broadcast %115 : vector<16x1xf32> to vector<16x32xf32>
    %124 = arith.subf %109, %123 : vector<16x32xf32>
    %cst_34 = arith.constant 9.99999974E-6 : f32
    %125 = vector.broadcast %cst_34 : f32 to vector<16x1xf32>
    %126 = arith.addf %122, %125 : vector<16x1xf32>
    %127 = math.rsqrt %126 : vector<16x1xf32>
    %128 = vector.broadcast %127 : vector<16x1xf32> to vector<16x32xf32>
    %129 = arith.mulf %124, %128 : vector<16x32xf32>
    %130 = vector.broadcast %110 : vector<1x32xf32> to vector<16x32xf32>
    %131 = arith.mulf %129, %130 : vector<16x32xf32>
    %132 = vector.broadcast %111 : vector<1x32xf32> to vector<16x32xf32>
    %133 = arith.addf %131, %132 : vector<16x32xf32>
    %134 = arith.truncf %133 : vector<16x32xf32> to vector<16x32xbf16>
    %c0_35 = arith.constant 0 : index
    %c0_36 = arith.constant 0 : index
    %135 = vector.load %arg10[%c0_35, %c0_36] : memref<32x128xbf16, #tpu.memory_space<vmem>>, vector<32x128xbf16>
    %cst_37 = arith.constant dense<0.000000e+00> : vector<16x128xf32>
    %136 = tpu.matmul %134, %135, %cst_37 {dimension_numbers = #tpu.dot_dimension_numbers<[1], [0], [0], [1], [0, 0, 1, 1], [], []>} : vector<16x32xbf16>, vector<32x128xbf16>, vector<16x128xf32> -> vector<16x128xf32>
    %c0_38 = arith.constant 0 : index
    %c0_39 = arith.constant 0 : index
    %137 = vector.load %arg11[%c0_38, %c0_39] : memref<1x128xf32, #tpu.memory_space<vmem>>, vector<1x128xf32>
    %138 = vector.broadcast %137 : vector<1x128xf32> to vector<16x128xf32>
    %139 = arith.addf %136, %138 : vector<16x128xf32>
    %cst_40 = arith.constant 1.702000e+00 : f32
    %140 = vector.broadcast %cst_40 : f32 to vector<16x128xf32>
    %141 = arith.mulf %140, %139 : vector<16x128xf32>
    %142 = arith.negf %141 : vector<16x128xf32>
    %143 = math.exp %142 : vector<16x128xf32>
    %cst_41 = arith.constant 1.000000e+00 : f32
    %144 = vector.broadcast %cst_41 : f32 to vector<16x128xf32>
    %145 = arith.addf %144, %143 : vector<16x128xf32>
    %146 = arith.divf %144, %145 : vector<16x128xf32>
    %147 = arith.mulf %139, %146 : vector<16x128xf32>
    %148 = arith.truncf %147 : vector<16x128xf32> to vector<16x128xbf16>
    %c0_42 = arith.constant 0 : index
    %c0_43 = arith.constant 0 : index
    %149 = vector.load %arg12[%c0_42, %c0_43] : memref<128x32xbf16, #tpu.memory_space<vmem>>, vector<128x32xbf16>
    %cst_44 = arith.constant dense<0.000000e+00> : vector<16x32xf32>
    %150 = tpu.matmul %148, %149, %cst_44 {dimension_numbers = #tpu.dot_dimension_numbers<[1], [0], [0], [1], [0, 0, 1, 1], [], []>} : vector<16x128xbf16>, vector<128x32xbf16>, vector<16x32xf32> -> vector<16x32xf32>
    %c0_45 = arith.constant 0 : index
    %c0_46 = arith.constant 0 : index
    %151 = vector.load %arg13[%c0_45, %c0_46] : memref<1x32xf32, #tpu.memory_space<vmem>>, vector<1x32xf32>
    %152 = vector.broadcast %151 : vector<1x32xf32> to vector<16x32xf32>
    %153 = arith.addf %150, %152 : vector<16x32xf32>
    %154 = arith.addf %109, %153 : vector<16x32xf32>
    %155 = vector.shape_cast %154 : vector<16x32xf32> to vector<2x8x32xf32>
    %c0_47 = arith.constant 0 : index
    %c0_48 = arith.constant 0 : index
    %c0_49 = arith.constant 0 : index
    %156 = vector.load %arg15[%c0_47, %c0_48, %c0_49] : memref<2x8x32xf32, #tpu.memory_space<vmem>>, vector<2x8x32xf32>
    tpu.vector_store %arg15[%c0_47, %c0_48, %c0_49], %155 {strides = array<i32>} : memref<2x8x32xf32, #tpu.memory_space<vmem>>, vector<2x8x32xf32>,
    return
  }
  func.func @transform_0(%arg0: i32) -> (i32, i32, i32) {
    %c0_i32 = arith.constant 0 : i32
    %c0_i32_0 = arith.constant 0 : i32
    %c0_i32_1 = arith.constant 0 : i32
    return %arg0, %c0_i32, %c0_i32_0 : i32, i32, i32
  }
  func.func @transform_1(%arg0: i32) -> (i32, i32) {
    %c0_i32 = arith.constant 0 : i32
    %c0_i32_0 = arith.constant 0 : i32
    %c0_i32_1 = arith.constant 0 : i32
    return %c0_i32, %c0_i32_0 : i32, i32
  }
  func.func @transform_2(%arg0: i32) -> (i32, i32) {
    %c0_i32 = arith.constant 0 : i32
    %c0_i32_0 = arith.constant 0 : i32
    %c0_i32_1 = arith.constant 0 : i32
    return %c0_i32, %c0_i32_0 : i32, i32
  }
  func.func @transform_3(%arg0: i32) -> (i32, i32) {
    %c0_i32 = arith.constant 0 : i32
    %c0_i32_0 = arith.constant 0 : i32
    %c0_i32_1 = arith.constant 0 : i32
    return %c0_i32, %c0_i32_0 : i32, i32
  }
  func.func @transform_4(%arg0: i32) -> (i32, i32) {
    %c0_i32 = arith.constant 0 : i32
    %c0_i32_0 = arith.constant 0 : i32
    %c0_i32_1 = arith.constant 0 : i32
    return %c0_i32, %c0_i32_0 : i32, i32
  }
  func.func @transform_5(%arg0: i32) -> (i32, i32) {
    %c0_i32 = arith.constant 0 : i32
    %c0_i32_0 = arith.constant 0 : i32
    %c0_i32_1 = arith.constant 0 : i32
    return %c0_i32, %c0_i32_0 : i32, i32
  }
  func.func @transform_6(%arg0: i32) -> (i32, i32) {
    %c0_i32 = arith.constant 0 : i32
    %c0_i32_0 = arith.constant 0 : i32
    %c0_i32_1 = arith.constant 0 : i32
    return %c0_i32, %c0_i32_0 : i32, i32
  }
  func.func @transform_7(%arg0: i32) -> (i32, i32) {
    %c0_i32 = arith.constant 0 : i32
    %c0_i32_0 = arith.constant 0 : i32
    %c0_i32_1 = arith.constant 0 : i32
    return %c0_i32, %c0_i32_0 : i32, i32
  }
  func.func @transform_8(%arg0: i32) -> (i32, i32) {
    %c0_i32 = arith.constant 0 : i32
    %c0_i32_0 = arith.constant 0 : i32
    %c0_i32_1 = arith.constant 0 : i32
    return %c0_i32, %c0_i32_0 : i32, i32
  }
  func.func @transform_9(%arg0: i32) -> (i32, i32) {
    %c0_i32 = arith.constant 0 : i32
    %c0_i32_0 = arith.constant 0 : i32
    %c0_i32_1 = arith.constant 0 : i32
    return %c0_i32, %c0_i32_0 : i32, i32
  }
  func.func @transform_10(%arg0: i32) -> (i32, i32) {
    %c0_i32 = arith.constant 0 : i32
    %c0_i32_0 = arith.constant 0 : i32
    %c0_i32_1 = arith.constant 0 : i32
    return %c0_i32, %c0_i32_0 : i32, i32
  }
  func.func @transform_11(%arg0: i32) -> (i32, i32) {
    %c0_i32 = arith.constant 0 : i32
    %c0_i32_0 = arith.constant 0 : i32
    %c0_i32_1 = arith.constant 0 : i32
    return %c0_i32, %c0_i32_0 : i32, i32
  }
  func.func @transform_12(%arg0: i32) -> (i32, i32) {
    %c0_i32 = arith.constant 0 : i32
    %c0_i32_0 = arith.constant 0 : i32
    %c0_i32_1 = arith.constant 0 : i32
    return %c0_i32, %c0_i32_0 : i32, i32
  }
  func.func @transform_13(%arg0: i32) -> (i32, i32) {
    %c0_i32 = arith.constant 0 : i32
    %c0_i32_0 = arith.constant 0 : i32
    %c0_i32_1 = arith.constant 0 : i32
    return %c0_i32, %c0_i32_0 : i32, i32
  }
  func.func @transform_14(%arg0: i32) -> (i32, i32, i32) {
    %c0_i32 = arith.constant 0 : i32
    %c0_i32_0 = arith.constant 0 : i32
    %c0_i32_1 = arith.constant 0 : i32
    return %arg0, %c0_i32, %c0_i32_0 : i32, i32, i32
  }
}

module attributes {stable_mosaic.version = 11 : i64} {
  func.func @_resblock_kernel(%arg0: i32, %arg1: memref<2x8x32xf32, #tpu.memory_space<vmem>>, %arg2: memref<1x32xf32, #tpu.memory_space<vmem>>, %arg3: memref<1x32xf32, #tpu.memory_space<vmem>>, %arg4: memref<32x96xbf16, #tpu.memory_space<vmem>>, %arg5: memref<1x96xf32, #tpu.memory_space<vmem>>, %arg6: memref<32x32xbf16, #tpu.memory_space<vmem>>, %arg7: memref<1x32xf32, #tpu.memory_space<vmem>>, %arg8: memref<1x32xf32, #tpu.memory_space<vmem>>, %arg9: memref<1x32xf32, #tpu.memory_space<vmem>>, %arg10: memref<32x128xbf16, #tpu.memory_space<vmem>>, %arg11: memref<1x128xf32, #tpu.memory_space<vmem>>, %arg12: memref<128x32xbf16, #tpu.memory_space<vmem>>, %arg13: memref<1x32xf32, #tpu.memory_space<vmem>>, %arg14: memref<8x8xf32, #tpu.memory_space<vmem>>, %arg15: memref<2x8x32xf32, #tpu.memory_space<vmem>>) attributes {dimension_semantics = [#tpu.dimension_semantics<parallel>], iteration_bounds = array<i64: 1>, scalar_prefetch = 0 : i64, scratch_operands = 0 : i64, tpu.core_type = #tpu.core_type<tc>, window_params = [{transform_indices = @transform_0, window_bounds = array<i64: 2, 8, 32>}, {pipeline_mode = #tpu.pipeline_mode<synchronous>, transform_indices = @transform_1, window_bounds = array<i64: 1, 32>}, {pipeline_mode = #tpu.pipeline_mode<synchronous>, transform_indices = @transform_2, window_bounds = array<i64: 1, 32>}, {pipeline_mode = #tpu.pipeline_mode<synchronous>, transform_indices = @transform_3, window_bounds = array<i64: 32, 96>}, {pipeline_mode = #tpu.pipeline_mode<synchronous>, transform_indices = @transform_4, window_bounds = array<i64: 1, 96>}, {pipeline_mode = #tpu.pipeline_mode<synchronous>, transform_indices = @transform_5, window_bounds = array<i64: 32, 32>}, {pipeline_mode = #tpu.pipeline_mode<synchronous>, transform_indices = @transform_6, window_bounds = array<i64: 1, 32>}, {pipeline_mode = #tpu.pipeline_mode<synchronous>, transform_indices = @transform_7, window_bounds = array<i64: 1, 32>}, {pipeline_mode = #tpu.pipeline_mode<synchronous>, transform_indices = @transform_8, window_bounds = array<i64: 1, 32>}, {pipeline_mode = #tpu.pipeline_mode<synchronous>, transform_indices = @transform_9, window_bounds = array<i64: 32, 128>}, {pipeline_mode = #tpu.pipeline_mode<synchronous>, transform_indices = @transform_10, window_bounds = array<i64: 1, 128>}, {pipeline_mode = #tpu.pipeline_mode<synchronous>, transform_indices = @transform_11, window_bounds = array<i64: 128, 32>}, {pipeline_mode = #tpu.pipeline_mode<synchronous>, transform_indices = @transform_12, window_bounds = array<i64: 1, 32>}, {pipeline_mode = #tpu.pipeline_mode<synchronous>, transform_indices = @transform_13, window_bounds = array<i64: 8, 8>}, {transform_indices = @transform_14, window_bounds = array<i64: 2, 8, 32>}]} {
    %c0 = arith.constant 0 : index
    %c0_0 = arith.constant 0 : index
    %c0_1 = arith.constant 0 : index
    %0 = vector.load %arg1[%c0, %c0_0, %c0_1] : memref<2x8x32xf32, #tpu.memory_space<vmem>>, vector<2x8x32xf32>
    %1 = vector.shape_cast %0 : vector<2x8x32xf32> to vector<16x32xf32>
    %c0_2 = arith.constant 0 : index
    %c0_3 = arith.constant 0 : index
    %2 = vector.load %arg2[%c0_2, %c0_3] : memref<1x32xf32, #tpu.memory_space<vmem>>, vector<1x32xf32>
    %c0_4 = arith.constant 0 : index
    %c0_5 = arith.constant 0 : index
    %3 = vector.load %arg3[%c0_4, %c0_5] : memref<1x32xf32, #tpu.memory_space<vmem>>, vector<1x32xf32>
    %cst = arith.constant dense<0.000000e+00> : vector<16xf32>
    %4 = vector.multi_reduction <add>, %1, %cst [1] : vector<16x32xf32> to vector<16xf32>
    %5 = vector.shape_cast %4 : vector<16xf32> to vector<16x1xf32>
    %cst_6 = arith.constant 3.200000e+01 : f32
    %6 = vector.broadcast %cst_6 : f32 to vector<16x1xf32>
    %7 = arith.divf %5, %6 : vector<16x1xf32>
    %8 = vector.broadcast %7 : vector<16x1xf32> to vector<16x32xf32>
    %9 = arith.subf %1, %8 : vector<16x32xf32>
    %10 = arith.mulf %9, %9 : vector<16x32xf32>
    %cst_7 = arith.constant dense<0.000000e+00> : vector<16xf32>
    %11 = vector.multi_reduction <add>, %10, %cst_7 [1] : vector<16x32xf32> to vector<16xf32>
    %12 = vector.shape_cast %11 : vector<16xf32> to vector<16x1xf32>
    %cst_8 = arith.constant 3.200000e+01 : f32
    %13 = vector.broadcast %cst_8 : f32 to vector<16x1xf32>
    %14 = arith.divf %12, %13 : vector<16x1xf32>
    %15 = vector.broadcast %7 : vector<16x1xf32> to vector<16x32xf32>
    %16 = arith.subf %1, %15 : vector<16x32xf32>
    %cst_9 = arith.constant 9.99999974E-6 : f32
    %17 = vector.broadcast %cst_9 : f32 to vector<16x1xf32>
    %18 = arith.addf %14, %17 : vector<16x1xf32>
    %19 = math.rsqrt %18 : vector<16x1xf32>
    %20 = vector.broadcast %19 : vector<16x1xf32> to vector<16x32xf32>
    %21 = arith.mulf %16, %20 : vector<16x32xf32>
    %22 = vector.broadcast %2 : vector<1x32xf32> to vector<16x32xf32>
    %23 = arith.mulf %21, %22 : vector<16x32xf32>
    %24 = vector.broadcast %3 : vector<1x32xf32> to vector<16x32xf32>
    %25 = arith.addf %23, %24 : vector<16x32xf32>
    %26 = arith.truncf %25 : vector<16x32xf32> to vector<16x32xbf16>
    %c0_10 = arith.constant 0 : index
    %c0_11 = arith.constant 0 : index
    %27 = vector.load %arg4[%c0_10, %c0_11] : memref<32x96xbf16, #tpu.memory_space<vmem>>, vector<32x96xbf16>
    %cst_12 = arith.constant dense<0.000000e+00> : vector<16x96xf32>
    %28 = tpu.matmul %26, %27, %cst_12 {dimension_numbers = #tpu.dot_dimension_numbers<[1], [0], [0], [1], [0, 0, 1, 1], [], []>} : vector<16x32xbf16>, vector<32x96xbf16>, vector<16x96xf32> -> vector<16x96xf32>
    %c0_13 = arith.constant 0 : index
    %c0_14 = arith.constant 0 : index
    %29 = vector.load %arg5[%c0_13, %c0_14] : memref<1x96xf32, #tpu.memory_space<vmem>>, vector<1x96xf32>
    %30 = vector.broadcast %29 : vector<1x96xf32> to vector<16x96xf32>
    %31 = arith.addf %28, %30 : vector<16x96xf32>
    %32 = arith.truncf %31 : vector<16x96xf32> to vector<16x96xbf16>
    %33 = vector.extract_strided_slice %32 {offsets = [0, 0], sizes = [16, 8], strides = [1, 1]} : vector<16x96xbf16> to vector<16x8xbf16>
    %34 = vector.shape_cast %33 : vector<16x8xbf16> to vector<2x8x8xbf16>
    %35 = vector.extract_strided_slice %32 {offsets = [0, 8], sizes = [16, 8], strides = [1, 1]} : vector<16x96xbf16> to vector<16x8xbf16>
    %36 = vector.shape_cast %35 : vector<16x8xbf16> to vector<2x8x8xbf16>
    %37 = vector.extract_strided_slice %32 {offsets = [0, 16], sizes = [16, 8], strides = [1, 1]} : vector<16x96xbf16> to vector<16x8xbf16>
    %38 = vector.shape_cast %37 : vector<16x8xbf16> to vector<2x8x8xbf16>
    %39 = vector.extract_strided_slice %32 {offsets = [0, 24], sizes = [16, 8], strides = [1, 1]} : vector<16x96xbf16> to vector<16x8xbf16>
    %40 = vector.shape_cast %39 : vector<16x8xbf16> to vector<2x8x8xbf16>
    %41 = vector.shape_cast %34 : vector<2x8x8xbf16> to vector<2x1x8x8xbf16>
    %42 = vector.shape_cast %36 : vector<2x8x8xbf16> to vector<2x1x8x8xbf16>
    %43 = vector.shape_cast %38 : vector<2x8x8xbf16> to vector<2x1x8x8xbf16>
    %44 = vector.shape_cast %40 : vector<2x8x8xbf16> to vector<2x1x8x8xbf16>
    %45 = tpu.concatenate %41, %42, %43, %44 in 1 : vector<2x1x8x8xbf16>, vector<2x1x8x8xbf16>, vector<2x1x8x8xbf16>, vector<2x1x8x8xbf16> -> vector<2x4x8x8xbf16>
    %46 = vector.shape_cast %45 : vector<2x4x8x8xbf16> to vector<8x8x8xbf16>
    %47 = vector.extract_strided_slice %32 {offsets = [0, 32], sizes = [16, 8], strides = [1, 1]} : vector<16x96xbf16> to vector<16x8xbf16>
    %48 = vector.shape_cast %47 : vector<16x8xbf16> to vector<2x8x8xbf16>
    %49 = vector.extract_strided_slice %32 {offsets = [0, 40], sizes = [16, 8], strides = [1, 1]} : vector<16x96xbf16> to vector<16x8xbf16>
    %50 = vector.shape_cast %49 : vector<16x8xbf16> to vector<2x8x8xbf16>
    %51 = vector.extract_strided_slice %32 {offsets = [0, 48], sizes = [16, 8], strides = [1, 1]} : vector<16x96xbf16> to vector<16x8xbf16>
    %52 = vector.shape_cast %51 : vector<16x8xbf16> to vector<2x8x8xbf16>
    %53 = vector.extract_strided_slice %32 {offsets = [0, 56], sizes = [16, 8], strides = [1, 1]} : vector<16x96xbf16> to vector<16x8xbf16>
    %54 = vector.shape_cast %53 : vector<16x8xbf16> to vector<2x8x8xbf16>
    %55 = vector.shape_cast %48 : vector<2x8x8xbf16> to vector<2x1x8x8xbf16>
    %56 = vector.shape_cast %50 : vector<2x8x8xbf16> to vector<2x1x8x8xbf16>
    %57 = vector.shape_cast %52 : vector<2x8x8xbf16> to vector<2x1x8x8xbf16>
    %58 = vector.shape_cast %54 : vector<2x8x8xbf16> to vector<2x1x8x8xbf16>
    %59 = tpu.concatenate %55, %56, %57, %58 in 1 : vector<2x1x8x8xbf16>, vector<2x1x8x8xbf16>, vector<2x1x8x8xbf16>, vector<2x1x8x8xbf16> -> vector<2x4x8x8xbf16>
    %60 = vector.shape_cast %59 : vector<2x4x8x8xbf16> to vector<8x8x8xbf16>
    %61 = vector.extract_strided_slice %32 {offsets = [0, 64], sizes = [16, 8], strides = [1, 1]} : vector<16x96xbf16> to vector<16x8xbf16>
    %62 = vector.shape_cast %61 : vector<16x8xbf16> to vector<2x8x8xbf16>
    %63 = vector.extract_strided_slice %32 {offsets = [0, 72], sizes = [16, 8], strides = [1, 1]} : vector<16x96xbf16> to vector<16x8xbf16>
    %64 = vector.shape_cast %63 : vector<16x8xbf16> to vector<2x8x8xbf16>
    %65 = vector.extract_strided_slice %32 {offsets = [0, 80], sizes = [16, 8], strides = [1, 1]} : vector<16x96xbf16> to vector<16x8xbf16>
    %66 = vector.shape_cast %65 : vector<16x8xbf16> to vector<2x8x8xbf16>
    %67 = vector.extract_strided_slice %32 {offsets = [0, 88], sizes = [16, 8], strides = [1, 1]} : vector<16x96xbf16> to vector<16x8xbf16>
    %68 = vector.shape_cast %67 : vector<16x8xbf16> to vector<2x8x8xbf16>
    %69 = vector.shape_cast %62 : vector<2x8x8xbf16> to vector<2x1x8x8xbf16>
    %70 = vector.shape_cast %64 : vector<2x8x8xbf16> to vector<2x1x8x8xbf16>
    %71 = vector.shape_cast %66 : vector<2x8x8xbf16> to vector<2x1x8x8xbf16>
    %72 = vector.shape_cast %68 : vector<2x8x8xbf16> to vector<2x1x8x8xbf16>
    %73 = tpu.concatenate %69, %70, %71, %72 in 1 : vector<2x1x8x8xbf16>, vector<2x1x8x8xbf16>, vector<2x1x8x8xbf16>, vector<2x1x8x8xbf16> -> vector<2x4x8x8xbf16>
    %74 = vector.shape_cast %73 : vector<2x4x8x8xbf16> to vector<8x8x8xbf16>
    "tpu.trace_start"() <{level = 10 : i32, message = "bqd,bkd->bqk"}> : () -> ()
    %cst_15 = arith.constant dense<0.000000e+00> : vector<8x8x8xf32>
    %75 = tpu.matmul %46, %60, %cst_15 {dimension_numbers = #tpu.dot_dimension_numbers<[2], [2], [1], [1], [0, 0, 0, 1, 1, 1], [0], [0]>} : vector<8x8x8xbf16>, vector<8x8x8xbf16>, vector<8x8x8xf32> -> vector<8x8x8xf32>
    "tpu.trace_stop"() : () -> ()
    %c0_16 = arith.constant 0 : index
    %c0_17 = arith.constant 0 : index
    %76 = vector.load %arg14[%c0_16, %c0_17] : memref<8x8xf32, #tpu.memory_space<vmem>>, vector<8x8xf32>
    %77 = vector.shape_cast %76 : vector<8x8xf32> to vector<1x8x8xf32>
    %78 = vector.broadcast %77 : vector<1x8x8xf32> to vector<8x8x8xf32>
    %79 = arith.addf %75, %78 : vector<8x8x8xf32>
    %cst_18 = arith.constant dense<0xFF800000> : vector<8x8xf32>
    %80 = vector.multi_reduction <maximumf>, %79, %cst_18 [2] : vector<8x8x8xf32> to vector<8x8xf32>
    %81 = vector.shape_cast %80 : vector<8x8xf32> to vector<8x8x1xf32>
    %82 = vector.broadcast %81 : vector<8x8x1xf32> to vector<8x8x8xf32>
    %83 = arith.subf %79, %82 : vector<8x8x8xf32>
    %84 = math.exp %83 : vector<8x8x8xf32>
    %cst_19 = arith.constant dense<0.000000e+00> : vector<8x8xf32>
    %85 = vector.multi_reduction <add>, %84, %cst_19 [2] : vector<8x8x8xf32> to vector<8x8xf32>
    %86 = vector.shape_cast %85 : vector<8x8xf32> to vector<8x8x1xf32>
    %87 = tpu.reciprocal %86 {approx = true} : vector<8x8x1xf32> -> vector<8x8x1xf32>
    %88 = vector.broadcast %87 : vector<8x8x1xf32> to vector<8x8x8xf32>
    %89 = arith.mulf %84, %88 : vector<8x8x8xf32>
    %90 = arith.truncf %89 : vector<8x8x8xf32> to vector<8x8x8xbf16>
    "tpu.trace_start"() <{level = 10 : i32, message = "bqk,bkd->bqd"}> : () -> ()
    %cst_20 = arith.constant dense<0.000000e+00> : vector<8x8x8xf32>
    %91 = tpu.matmul %90, %74, %cst_20 {dimension_numbers = #tpu.dot_dimension_numbers<[2], [1], [1], [2], [0, 0, 0, 1, 1, 2], [0], [0]>} : vector<8x8x8xbf16>, vector<8x8x8xbf16>, vector<8x8x8xf32> -> vector<8x8x8xf32>
    "tpu.trace_stop"() : () -> ()
    %92 = arith.truncf %91 : vector<8x8x8xf32> to vector<8x8x8xbf16>
    %93 = vector.shape_cast %92 : vector<8x8x8xbf16> to vector<2x4x8x8xbf16>
    %94 = vector.extract_strided_slice %93 {offsets = [0, 0, 0, 0], sizes = [2, 1, 8, 8], strides = [1, 1, 1, 1]} : vector<2x4x8x8xbf16> to vector<2x1x8x8xbf16>
    %95 = vector.shape_cast %94 : vector<2x1x8x8xbf16> to vector<2x8x8xbf16>
    %96 = vector.extract_strided_slice %93 {offsets = [0, 1, 0, 0], sizes = [2, 1, 8, 8], strides = [1, 1, 1, 1]} : vector<2x4x8x8xbf16> to vector<2x1x8x8xbf16>
    %97 = vector.shape_cast %96 : vector<2x1x8x8xbf16> to vector<2x8x8xbf16>
    %98 = vector.extract_strided_slice %93 {offsets = [0, 2, 0, 0], sizes = [2, 1, 8, 8], strides = [1, 1, 1, 1]} : vector<2x4x8x8xbf16> to vector<2x1x8x8xbf16>
    %99 = vector.shape_cast %98 : vector<2x1x8x8xbf16> to vector<2x8x8xbf16>
    %100 = vector.extract_strided_slice %93 {offsets = [0, 3, 0, 0], sizes = [2, 1, 8, 8], strides = [1, 1, 1, 1]} : vector<2x4x8x8xbf16> to vector<2x1x8x8xbf16>
    %101 = vector.shape_cast %100 : vector<2x1x8x8xbf16> to vector<2x8x8xbf16>
    %102 = tpu.concatenate %95, %97, %99, %101 in 2 : vector<2x8x8xbf16>, vector<2x8x8xbf16>, vector<2x8x8xbf16>, vector<2x8x8xbf16> -> vector<2x8x32xbf16>
    %103 = vector.shape_cast %102 : vector<2x8x32xbf16> to vector<16x32xbf16>
    %c0_21 = arith.constant 0 : index
    %c0_22 = arith.constant 0 : index
    %104 = vector.load %arg6[%c0_21, %c0_22] : memref<32x32xbf16, #tpu.memory_space<vmem>>, vector<32x32xbf16>
    %cst_23 = arith.constant dense<0.000000e+00> : vector<16x32xf32>
    %105 = tpu.matmul %103, %104, %cst_23 {dimension_numbers = #tpu.dot_dimension_numbers<[1], [0], [0], [1], [0, 0, 1, 1], [], []>} : vector<16x32xbf16>, vector<32x32xbf16>, vector<16x32xf32> -> vector<16x32xf32>
    %c0_24 = arith.constant 0 : index
    %c0_25 = arith.constant 0 : index
    %106 = vector.load %arg7[%c0_24, %c0_25] : memref<1x32xf32, #tpu.memory_space<vmem>>, vector<1x32xf32>
    %107 = vector.broadcast %106 : vector<1x32xf32> to vector<16x32xf32>
    %108 = arith.addf %105, %107 : vector<16x32xf32>
    %109 = arith.addf %1, %108 : vector<16x32xf32>
    %c0_26 = arith.constant 0 : index
    %c0_27 = arith.constant 0 : index
    %110 = vector.load %arg8[%c0_26, %c0_27] : memref<1x32xf32, #tpu.memory_space<vmem>>, vector<1x32xf32>
    %c0_28 = arith.constant 0 : index
    %c0_29 = arith.constant 0 : index
    %111 = vector.load %arg9[%c0_28, %c0_29] : memref<1x32xf32, #tpu.memory_space<vmem>>, vector<1x32xf32>
    %cst_30 = arith.constant dense<0.000000e+00> : vector<16xf32>
    %112 = vector.multi_reduction <add>, %109, %cst_30 [1] : vector<16x32xf32> to vector<16xf32>
    %113 = vector.shape_cast %112 : vector<16xf32> to vector<16x1xf32>
    %cst_31 = arith.constant 3.200000e+01 : f32
    %114 = vector.broadcast %cst_31 : f32 to vector<16x1xf32>
    %115 = arith.divf %113, %114 : vector<16x1xf32>
    %116 = vector.broadcast %115 : vector<16x1xf32> to vector<16x32xf32>
    %117 = arith.subf %109, %116 : vector<16x32xf32>
    %118 = arith.mulf %117, %117 : vector<16x32xf32>
    %cst_32 = arith.constant dense<0.000000e+00> : vector<16xf32>
    %119 = vector.multi_reduction <add>, %118, %cst_32 [1] : vector<16x32xf32> to vector<16xf32>
    %120 = vector.shape_cast %119 : vector<16xf32> to vector<16x1xf32>
    %cst_33 = arith.constant 3.200000e+01 : f32
    %121 = vector.broadcast %cst_33 : f32 to vector<16x1xf32>
    %122 = arith.divf %120, %121 : vector<16x1xf32>
    %123 = vector.broadcast %115 : vector<16x1xf32> to vector<16x32xf32>
    %124 = arith.subf %109, %123 : vector<16x32xf32>
    %cst_34 = arith.constant 9.99999974E-6 : f32
    %125 = vector.broadcast %cst_34 : f32 to vector<16x1xf32>
    %126 = arith.addf %122, %125 : vector<16x1xf32>
    %127 = math.rsqrt %126 : vector<16x1xf32>
    %128 = vector.broadcast %127 : vector<16x1xf32> to vector<16x32xf32>
    %129 = arith.mulf %124, %128 : vector<16x32xf32>
    %130 = vector.broadcast %110 : vector<1x32xf32> to vector<16x32xf32>
    %131 = arith.mulf %129, %130 : vector<16x32xf32>
    %132 = vector.broadcast %111 : vector<1x32xf32> to vector<16x32xf32>
    %133 = arith.addf %131, %132 : vector<16x32xf32>
    %134 = arith.truncf %133 : vector<16x32xf32> to vector<16x32xbf16>
    %c0_35 = arith.constant 0 : index
    %c0_36 = arith.constant 0 : index
    %135 = vector.load %arg10[%c0_35, %c0_36] : memref<32x128xbf16, #tpu.memory_space<vmem>>, vector<32x128xbf16>
    %cst_37 = arith.constant dense<0.000000e+00> : vector<16x128xf32>
    %136 = tpu.matmul %134, %135, %cst_37 {dimension_numbers = #tpu.dot_dimension_numbers<[1], [0], [0], [1], [0, 0, 1, 1], [], []>} : vector<16x32xbf16>, vector<32x128xbf16>, vector<16x128xf32> -> vector<16x128xf32>
    %c0_38 = arith.constant 0 : index
    %c0_39 = arith.constant 0 : index
    %137 = vector.load %arg11[%c0_38, %c0_39] : memref<1x128xf32, #tpu.memory_space<vmem>>, vector<1x128xf32>
    %138 = vector.broadcast %137 : vector<1x128xf32> to vector<16x128xf32>
    %139 = arith.addf %136, %138 : vector<16x128xf32>
    %cst_40 = arith.constant 1.702000e+00 : f32
    %140 = vector.broadcast %cst_40 : f32 to vector<16x128xf32>
    %141 = arith.mulf %140, %139 : vector<16x128xf32>
    %142 = arith.negf %141 : vector<16x128xf32>
    %143 = math.exp %142 : vector<16x128xf32>
    %cst_41 = arith.constant 1.000000e+00 : f32
    %144 = vector.broadcast %cst_41 : f32 to vector<16x128xf32>
    %145 = arith.addf %144, %143 : vector<16x128xf32>
    %146 = arith.divf %144, %145 : vector<16x128xf32>
    %147 = arith.mulf %139, %146 : vector<16x128xf32>
    %148 = arith.truncf %147 : vector<16x128xf32> to vector<16x128xbf16>
    %c0_42 = arith.constant 0 : index
    %c0_43 = arith.constant 0 : index
    %149 = vector.load %arg12[%c0_42, %c0_43] : memref<128x32xbf16, #tpu.memory_space<vmem>>, vector<128x32xbf16>
    %cst_44 = arith.constant dense<0.000000e+00> : vector<16x32xf32>
    %150 = tpu.matmul %148, %149, %cst_44 {dimension_numbers = #tpu.dot_dimension_numbers<[1], [0], [0], [1], [0, 0, 1, 1], [], []>} : vector<16x128xbf16>, vector<128x32xbf16>, vector<16x32xf32> -> vector<16x32xf32>
    %c0_45 = arith.constant 0 : index
    %c0_46 = arith.constant 0 : index
    %151 = vector.load %arg13[%c0_45, %c0_46] : memref<1x32xf32, #tpu.memory_space<vmem>>, vector<1x32xf32>
    %152 = vector.broadcast %151 : vector<1x32xf32> to vector<16x32xf32>
    %153 = arith.addf %150, %152 : vector<16x32xf32>
    %154 = arith.addf %109, %153 : vector<16x32xf32>
    %155 = vector.shape_cast %154 : vector<16x32xf32> to vector<2x8x32xf32>
    %c0_47 = arith.constant 0 : index
    %c0_48 = arith.constant 0 : index
    %c0_49 = arith.constant 0 : index
    %156 = vector.load %arg15[%c0_47, %c0_48, %c0_49] : memref<2x8x32xf32, #tpu.memory_space<vmem>>, vector<2x8x32xf32>
    tpu.vector_store %arg15[%c0_47, %c0_48, %c0_49], %155 {strides = array<i32>} : memref<2x8x32xf32, #tpu.memory_space<vmem>>, vector<2x8x32xf32>,
    return
  }
  func.func @transform_0(%arg0: i32) -> (i32, i32, i32) {
    %c0_i32 = arith.constant 0 : i32
    %c0_i32_0 = arith.constant 0 : i32
    %c0_i32_1 = arith.constant 0 : i32
    return %arg0, %c0_i32, %c0_i32_0 : i32, i32, i32
  }
  func.func @transform_1(%arg0: i32) -> (i32, i32) {
    %c0_i32 = arith.constant 0 : i32
    %c0_i32_0 = arith.constant 0 : i32
    %c0_i32_1 = arith.constant 0 : i32
    return %c0_i32, %c0_i32_0 : i32, i32
  }
  func.func @transform_2(%arg0: i32) -> (i32, i32) {
    %c0_i32 = arith.constant 0 : i32
    %c0_i32_0 = arith.constant 0 : i32
    %c0_i32_1 = arith.constant 0 : i32
    return %c0_i32, %c0_i32_0 : i32, i32
  }
  func.func @transform_3(%arg0: i32) -> (i32, i32) {
    %c0_i32 = arith.constant 0 : i32
    %c0_i32_0 = arith.constant 0 : i32
    %c0_i32_1 = arith.constant 0 : i32
    return %c0_i32, %c0_i32_0 : i32, i32
  }
  func.func @transform_4(%arg0: i32) -> (i32, i32) {
    %c0_i32 = arith.constant 0 : i32
    %c0_i32_0 = arith.constant 0 : i32
    %c0_i32_1 = arith.constant 0 : i32
    return %c0_i32, %c0_i32_0 : i32, i32
  }
  func.func @transform_5(%arg0: i32) -> (i32, i32) {
    %c0_i32 = arith.constant 0 : i32
    %c0_i32_0 = arith.constant 0 : i32
    %c0_i32_1 = arith.constant 0 : i32
    return %c0_i32, %c0_i32_0 : i32, i32
  }
  func.func @transform_6(%arg0: i32) -> (i32, i32) {
    %c0_i32 = arith.constant 0 : i32
    %c0_i32_0 = arith.constant 0 : i32
    %c0_i32_1 = arith.constant 0 : i32
    return %c0_i32, %c0_i32_0 : i32, i32
  }
  func.func @transform_7(%arg0: i32) -> (i32, i32) {
    %c0_i32 = arith.constant 0 : i32
    %c0_i32_0 = arith.constant 0 : i32
    %c0_i32_1 = arith.constant 0 : i32
    return %c0_i32, %c0_i32_0 : i32, i32
  }
  func.func @transform_8(%arg0: i32) -> (i32, i32) {
    %c0_i32 = arith.constant 0 : i32
    %c0_i32_0 = arith.constant 0 : i32
    %c0_i32_1 = arith.constant 0 : i32
    return %c0_i32, %c0_i32_0 : i32, i32
  }
  func.func @transform_9(%arg0: i32) -> (i32, i32) {
    %c0_i32 = arith.constant 0 : i32
    %c0_i32_0 = arith.constant 0 : i32
    %c0_i32_1 = arith.constant 0 : i32
    return %c0_i32, %c0_i32_0 : i32, i32
  }
  func.func @transform_10(%arg0: i32) -> (i32, i32) {
    %c0_i32 = arith.constant 0 : i32
    %c0_i32_0 = arith.constant 0 : i32
    %c0_i32_1 = arith.constant 0 : i32
    return %c0_i32, %c0_i32_0 : i32, i32
  }
  func.func @transform_11(%arg0: i32) -> (i32, i32) {
    %c0_i32 = arith.constant 0 : i32
    %c0_i32_0 = arith.constant 0 : i32
    %c0_i32_1 = arith.constant 0 : i32
    return %c0_i32, %c0_i32_0 : i32, i32
  }
  func.func @transform_12(%arg0: i32) -> (i32, i32) {
    %c0_i32 = arith.constant 0 : i32
    %c0_i32_0 = arith.constant 0 : i32
    %c0_i32_1 = arith.constant 0 : i32
    return %c0_i32, %c0_i32_0 : i32, i32
  }
  func.func @transform_13(%arg0: i32) -> (i32, i32) {
    %c0_i32 = arith.constant 0 : i32
    %c0_i32_0 = arith.constant 0 : i32
    %c0_i32_1 = arith.constant 0 : i32
    return %c0_i32, %c0_i32_0 : i32, i32
  }
  func.func @transform_14(%arg0: i32) -> (i32, i32, i32) {
    %c0_i32 = arith.constant 0 : i32
    %c0_i32_0 = arith.constant 0 : i32
    %c0_i32_1 = arith.constant 0 : i32
    return %arg0, %c0_i32, %c0_i32_0 : i32, i32, i32
  }
}

</mosaic_0001>

<bundles_post_ra>
// kernel: tpu_custom_call.1
= control target key start
LH: loop header
LB: loop body
LE: loop exit
PB: predicated region body
PF: predicated region fallthrough
CT: control target
= control target key end

     0   :  { %19 = vsyncpa [#allocation3], 0  ;;  %s2877_s0 = inlined_call_operand.hbm [shape: f32[2,8,32], index: 0, kind: input, shape index: {}]   ;;  %s2878_s1 = inlined_call_operand.hbm [shape: f32[1,32], index: 1, kind: input, shape index: {}]   ;;  %s2879_s2 = inlined_call_operand.hbm [shape: f32[1,32], index: 2, kind: input, shape index: {}]   ;;  %s2880_s3 = inlined_call_operand.hbm [shape: bf16[32,96], index: 3, kind: input, shape index: {}]   ;;  %s2881_s4 = inlined_call_operand.hbm [shape: f32[1,96], index: 4, kind: input, shape index: {}]   ;;  %s2882_s5 = inlined_call_operand.hbm [shape: bf16[32,32], index: 5, kind: input, shape index: {}]   ;;  %s2883_s6 = inlined_call_operand.hbm [shape: f32[1,32], index: 6, kind: input, shape index: {}]   ;;  %s2884_s7 = inlined_call_operand.hbm [shape: f32[1,32], index: 7, kind: input, shape index: {}]   ;;  %s2885_s8 = inlined_call_operand.hbm [shape: f32[1,32], index: 8, kind: input, shape index: {}]   ;;  %s2886_s9 = inlined_call_operand.hbm [shape: bf16[32,128], index: 9, kind: input, shape index: {}]   ;;  %s2887_s10 = inlined_call_operand.hbm [shape: f32[1,128], index: 10, kind: input, shape index: {}]   ;;  %s2888_s11 = inlined_call_operand.hbm [shape: bf16[128,32], index: 11, kind: input, shape index: {}]   ;;  %s2889_s12 = inlined_call_operand.hbm [shape: f32[1,32], index: 12, kind: input, shape index: {}]   ;;  %s2890_s13 = inlined_call_operand.hbm [shape: f32[8,8], index: 13, kind: input, shape index: {}]   ;;  %s2891_s14 = inlined_call_operand.hbm [shape: f32[2,8,32], index: 14, kind: output, shape index: {}]  }
   0x1   :  { %20 = vsyncpa [#allocation6], 0 }
   0x2   :  { %21 = vsyncpa [#allocation9], 0 }
   0x3   :  { %22 = vsyncpa [#allocation12], 0 }
   0x4   :  { %23 = vsyncpa [#allocation15], 0 }
   0x5   :  { %24 = vsyncpa [#allocation18], 0 }
   0x6   :  { %25 = vsyncpa [#allocation21], 0 }
   0x7   :  { %26 = vsyncpa [#allocation24], 0 }
   0x8   :  { %27 = vsyncpa [#allocation4], 0  ;;  %s2300_s29 = smov [#allocation5]   ;;  %s2301_s15 = smov [#allocation8]  }
   0x9   :  { %s46_s30 = sshll.u32 %s2300_s29, 4  ;;  %s65_s16 = sshll.u32 %s2301_s15, 4  ;;  %s47_s30 = int_to_ptr.vmem [resolvable:$true] %s46_s30  ;;  %s2402_s16 = int_to_ptr.vmem [resolvable:$true] %s65_s16 }
   0xa   :  { %s1952_s19 = scalar_lea.hbm %s2878_s1, 16 }
   0xb   :  { %p1953_p0 = scmp.ne.s32.totalorder %s2878_s1, %s1952_s19  ;;  %p1956_p1 = scmp.lt.u32.totalorder %s1952_s19, %s2878_s1 }
   0xd   :  { %p1958_p2 = pnand %p1956_p1, %p1953_p0 }
   0xf   :  { %1961 = shalt.err (!%p1958_p2)
}
  0x10   :  { %s1962_s24 = scalar_lea.vmem %s47_s30, 16  ;;  %s1966_s25 = scalar_lea.vmem %s47_s30, 32 }
  0x11   :  { %p1963_p3 = scmp.ne.s32.totalorder %s47_s30, %s1962_s24  ;;  %p1967_p4 = scmp.lt.s32.totalorder %s47_s30, %s47_s30 }
  0x12   :  { %p1968_p5 = scmp.lt.s32.totalorder %s1966_s25, %s1962_s24 }
  0x14   :  { %p1969_p6 = por %p1968_p5, %p1967_p4 }
  0x16   :  { %p1970_p7 = pnand %p1969_p6, %p1963_p3 }
  0x18   :  { %1973 = shalt.err (!%p1970_p7)
}
  0x19   :  { %49 = dma.hbm_to_vmem [thread:$0]  %s2878_s1, 16, %s47_s30, [#allocation6]  }
  0x1a   :  { %s1974_s15 = scalar_lea.hbm %s2880_s3, 256 }
  0x1b   :  { %p1975_p8 = scmp.ne.s32.totalorder %s2880_s3, %s1974_s15  ;;  %p1978_p9 = scmp.lt.u32.totalorder %s1974_s15, %s2880_s3 }
  0x1d   :  { %p1980_p10 = pnand %p1978_p9, %p1975_p8 }
  0x1f   :  { %1983 = shalt.err (!%p1980_p10)
}
  0x20   :  { %s1984_s21 = scalar_lea.vmem %s2402_s16, 256  ;;  %p1989_p12 = scmp.lt.s32.totalorder %s2402_s16, %s2402_s16 }
  0x21   :  { %p1985_p11 = scmp.ne.s32.totalorder %s2402_s16, %s1984_s21  ;;  %p1990_p13 = scmp.lt.s32.totalorder %s1984_s21, %s1984_s21 }
  0x23   :  { %p1991_p0 = por %p1990_p13, %p1989_p12 }
  0x25   :  { %p1992_p1 = pnand %p1991_p0, %p1985_p11 }
  0x27   :  { %1995 = shalt.err (!%p1992_p1)
}
  0x28   :  { %s2302_s1 = smov 64   ;;  %s2303_s30 = smov 4  }
  0x29   :  { %71 = dma.hbm_to_vmem [thread:$0]  %s2880_s3, 256, %s2402_s16, [#allocation9], %s2302_s1, %s2302_s1, %s2303_s30  }
  0x2a   :  { %s2304_s24 = smov [#allocation11]   ;;  %s2305_s26 = smov [#allocation14]  }
  0x2b   :  { %s87_s25 = sshll.u32 %s2304_s24, 4  ;;  %s110_s27 = sshll.u32 %s2305_s26, 4  ;;  %s88_s25 = int_to_ptr.vmem [resolvable:$true] %s87_s25  ;;  %s111_s27 = int_to_ptr.vmem [resolvable:$true] %s110_s27 }
  0x2c   :  { %s1996_s15 = scalar_lea.hbm %s2882_s5, 256 }
  0x2d   :  { %p1997_p2 = scmp.ne.s32.totalorder %s2882_s5, %s1996_s15  ;;  %p2000_p3 = scmp.lt.u32.totalorder %s1996_s15, %s2882_s5 }
  0x2f   :  { %p2002_p4 = pnand %p2000_p3, %p1997_p2 }
  0x31   :  { %2005 = shalt.err (!%p2002_p4)
}
  0x32   :  { %s2006_s3 = scalar_lea.vmem %s88_s25, 256  ;;  %p2011_p6 = scmp.lt.s32.totalorder %s88_s25, %s88_s25 }
  0x33   :  { %p2007_p5 = scmp.ne.s32.totalorder %s88_s25, %s2006_s3  ;;  %p2012_p7 = scmp.lt.s32.totalorder %s2006_s3, %s2006_s3 }
  0x35   :  { %p2013_p8 = por %p2012_p7, %p2011_p6 }
  0x37   :  { %p2014_p9 = pnand %p2013_p8, %p2007_p5 }
  0x39   :  { %2017 = shalt.err (!%p2014_p9)
}
  0x3a   :  { %93 = dma.hbm_to_vmem [thread:$0]  %s2882_s5, 256, %s88_s25, [#allocation12], %s2302_s1, %s2302_s1, %s2303_s30  }
  0x3b   :  { %s2018_s24 = scalar_lea.hbm %s2884_s7, 16 }
  0x3c   :  { %p2019_p10 = scmp.ne.s32.totalorder %s2884_s7, %s2018_s24  ;;  %p2022_p11 = scmp.lt.u32.totalorder %s2018_s24, %s2884_s7 }
  0x3e   :  { %p2024_p12 = pnand %p2022_p11, %p2019_p10 }
  0x40   :  { %2027 = shalt.err (!%p2024_p12)
}
  0x41   :  { %s2028_s17 = scalar_lea.vmem %s111_s27, 16  ;;  %s2032_s18 = scalar_lea.vmem %s111_s27, 32 }
  0x42   :  { %p2029_p13 = scmp.ne.s32.totalorder %s111_s27, %s2028_s17  ;;  %p2033_p0 = scmp.lt.s32.totalorder %s111_s27, %s111_s27 }
  0x43   :  { %p2034_p1 = scmp.lt.s32.totalorder %s2032_s18, %s2028_s17 }
  0x45   :  { %p2035_p2 = por %p2034_p1, %p2033_p0 }
  0x47   :  { %p2036_p3 = pnand %p2035_p2, %p2029_p13 }
  0x49   :  { %2039 = shalt.err (!%p2036_p3)
}
  0x4a   :  { %113 = dma.hbm_to_vmem [thread:$0]  %s2884_s7, 16, %s111_s27, [#allocation15]  }
  0x4b   :  { %s2306_s19 = smov [#allocation17]   ;;  %s2307_s3 = smov [#allocation20]  }
  0x4c   :  { %s129_s20 = sshll.u32 %s2306_s19, 4  ;;  %s151_s16 = sshll.u32 %s2307_s3, 4  ;;  %s130_s20 = int_to_ptr.vmem [resolvable:$true] %s129_s20  ;;  %s2463_s16 = int_to_ptr.vmem [resolvable:$true] %s151_s16 }
  0x4d   :  { %s2040_s23 = scalar_lea.hbm %s2886_s9, 256 }
  0x4e   :  { %p2041_p4 = scmp.ne.s32.totalorder %s2886_s9, %s2040_s23  ;;  %p2044_p5 = scmp.lt.u32.totalorder %s2040_s23, %s2886_s9 }
  0x50   :  { %p2046_p6 = pnand %p2044_p5, %p2041_p4 }
  0x52   :  { %2049 = shalt.err (!%p2046_p6)
}
  0x53   :  { %s2050_s7 = scalar_lea.vmem %s130_s20, 256  ;;  %p2055_p8 = scmp.lt.s32.totalorder %s130_s20, %s130_s20 }
  0x54   :  { %p2051_p7 = scmp.ne.s32.totalorder %s130_s20, %s2050_s7  ;;  %p2056_p9 = scmp.lt.s32.totalorder %s2050_s7, %s2050_s7 }
  0x56   :  { %p2057_p10 = por %p2056_p9, %p2055_p8 }
  0x58   :  { %p2058_p11 = pnand %p2057_p10, %p2051_p7 }
  0x5a   :  { %2061 = shalt.err (!%p2058_p11)
}
  0x5b   :  { %135 = dma.hbm_to_vmem [thread:$0]  %s2886_s9, 256, %s130_s20, [#allocation18], %s2302_s1, %s2302_s1, %s2303_s30  }
  0x5c   :  { %s2062_s5 = scalar_lea.hbm %s2888_s11, 1024 }
  0x5d   :  { %p2063_p12 = scmp.ne.s32.totalorder %s2888_s11, %s2062_s5  ;;  %p2066_p13 = scmp.lt.u32.totalorder %s2062_s5, %s2888_s11 }
  0x5f   :  { %p2068_p0 = pnand %p2066_p13, %p2063_p12 }
  0x61   :  { %2071 = shalt.err (!%p2068_p0)
}
  0x62   :  { %s2072_s22 = scalar_lea.vmem %s2463_s16, 1024  ;;  %p2077_p2 = scmp.lt.s32.totalorder %s2463_s16, %s2463_s16 }
  0x63   :  { %p2073_p1 = scmp.ne.s32.totalorder %s2463_s16, %s2072_s22  ;;  %p2078_p3 = scmp.lt.s32.totalorder %s2072_s22, %s2072_s22 }
  0x65   :  { %p2079_p4 = por %p2078_p3, %p2077_p2 }
  0x67   :  { %p2080_p5 = pnand %p2079_p4, %p2073_p1 }
  0x69   :  { %2083 = shalt.err (!%p2080_p5)
}
  0x6a   :  { %157 = dma.hbm_to_vmem [thread:$0]  %s2888_s11, 1024, %s2463_s16, [#allocation21], %s2302_s1, %s2302_s1, %s2303_s30  }
  0x6b   :  { %s2308_s23 = smov [#allocation2]   ;;  %s2084_s29 = scalar_lea.hbm %s2877_s0, 256 }
  0x6c   :  { %s33_s24 = sshll.u32 %s2308_s23, 4  ;;  %p2085_p6 = scmp.ne.s32.totalorder %s2877_s0, %s2084_s29  ;;  %s34_s24 = int_to_ptr.vmem [resolvable:$true] %s33_s24 }
  0x6d   :  { %p2088_p7 = scmp.lt.u32.totalorder %s2084_s29, %s2877_s0 }
  0x6f   :  { %p2090_p8 = pnand %p2088_p7, %p2085_p6 }
  0x71   :  { %2093 = shalt.err (!%p2090_p8)
}
  0x72   :  { %s2094_s18 = scalar_lea.vmem %s34_s24, 256  ;;  %p2099_p10 = scmp.lt.s32.totalorder %s34_s24, %s34_s24 }
  0x73   :  { %p2095_p9 = scmp.ne.s32.totalorder %s34_s24, %s2094_s18  ;;  %p2100_p11 = scmp.lt.s32.totalorder %s2094_s18, %s2094_s18 }
  0x75   :  { %p2101_p12 = por %p2100_p11, %p2099_p10 }
  0x77   :  { %p2102_p13 = pnand %p2101_p12, %p2095_p9 }
  0x79   :  { %2105 = shalt.err (!%p2102_p13)
}
  0x7a   :  { %s2309_s11 = smov 128   ;;  %s2310_s30 = smov 8  }
  0x7b   :  { %39 = dma.hbm_to_vmem [thread:$0]  %s2877_s0, 256, %s34_s24, [#allocation3], %s2309_s11, %s2309_s11, %s2310_s30  }
  0x7c   :  { %s2311_s25 = smov [#allocation7]   ;;  %s2312_s3 = smov [#allocation10]  }
  0x7d   :  { %s56_s19 = sshll.u32 %s2311_s25, 4  ;;  %s78_s21 = sshll.u32 %s2312_s3, 4  ;;  %s57_s19 = int_to_ptr.vmem [resolvable:$true] %s56_s19  ;;  %s79_s21 = int_to_ptr.vmem [resolvable:$true] %s78_s21 }
  0x7e   :  { %s2106_s20 = scalar_lea.hbm %s2879_s2, 16 }
  0x7f   :  { %p2107_p0 = scmp.ne.s32.totalorder %s2879_s2, %s2106_s20  ;;  %p2110_p1 = scmp.lt.u32.totalorder %s2106_s20, %s2879_s2 }
  0x81   :  { %p2112_p2 = pnand %p2110_p1, %p2107_p0 }
  0x83   :  { %2115 = shalt.err (!%p2112_p2)
}
  0x84   :  { %s2116_s0 = scalar_lea.vmem %s57_s19, 16  ;;  %s2120_s24 = scalar_lea.vmem %s57_s19, 32 }
  0x85   :  { %p2117_p3 = scmp.ne.s32.totalorder %s57_s19, %s2116_s0  ;;  %p2121_p4 = scmp.lt.s32.totalorder %s57_s19, %s57_s19 }
  0x86   :  { %p2122_p5 = scmp.lt.s32.totalorder %s2120_s24, %s2116_s0 }
  0x88   :  { %p2123_p6 = por %p2122_p5, %p2121_p4 }
  0x8a   :  { %p2124_p7 = pnand %p2123_p6, %p2117_p3 }
  0x8c   :  { %2127 = shalt.err (!%p2124_p7)
}
  0x8d   :  { %59 = dma.hbm_to_vmem [thread:$0]  %s2879_s2, 16, %s57_s19, [#allocation6]  }
  0x8e   :  { %s2128_s18 = scalar_lea.hbm %s2881_s4, 16 }
  0x8f   :  { %p2129_p8 = scmp.ne.s32.totalorder %s2881_s4, %s2128_s18  ;;  %p2132_p9 = scmp.lt.u32.totalorder %s2128_s18, %s2881_s4 }
  0x91   :  { %p2134_p10 = pnand %p2132_p9, %p2129_p8 }
  0x93   :  { %2137 = shalt.err (!%p2134_p10)
}
  0x94   :  { %s2138_s22 = scalar_lea.vmem %s79_s21, 16  ;;  %s2142_s9 = scalar_lea.vmem %s79_s21, 32 }
  0x95   :  { %p2139_p11 = scmp.ne.s32.totalorder %s79_s21, %s2138_s22  ;;  %p2143_p12 = scmp.lt.s32.totalorder %s79_s21, %s79_s21 }
  0x96   :  { %p2144_p13 = scmp.lt.s32.totalorder %s2142_s9, %s2138_s22 }
  0x98   :  { %p2145_p0 = por %p2144_p13, %p2143_p12 }
  0x9a   :  { %p2146_p1 = pnand %p2145_p0, %p2139_p11 }
  0x9c   :  { %2149 = shalt.err (!%p2146_p1)
}
  0x9d   :  { %81 = dma.hbm_to_vmem [thread:$0]  %s2881_s4, 16, %s79_s21, [#allocation9]  }
  0x9e   :  { %s2313_s20 = smov [#allocation13]   ;;  %s2314_s26 = smov [#allocation16]  }
  0x9f   :  { %s100_s23 = sshll.u32 %s2313_s20, 4  ;;  %s120_s28 = sshll.u32 %s2314_s26, 4  ;;  %s101_s23 = int_to_ptr.vmem [resolvable:$true] %s100_s23  ;;  %s121_s28 = int_to_ptr.vmem [resolvable:$true] %s120_s28 }
  0xa0   :  { %s2150_s24 = scalar_lea.hbm %s2883_s6, 16 }
  0xa1   :  { %p2151_p2 = scmp.ne.s32.totalorder %s2883_s6, %s2150_s24  ;;  %p2154_p3 = scmp.lt.u32.totalorder %s2150_s24, %s2883_s6 }
  0xa3   :  { %p2156_p4 = pnand %p2154_p3, %p2151_p2 }
  0xa5   :  { %2159 = shalt.err (!%p2156_p4)
}
  0xa6   :  { %s2160_s4 = scalar_lea.vmem %s101_s23, 16  ;;  %s2164_s21 = scalar_lea.vmem %s101_s23, 32 }
  0xa7   :  { %p2161_p5 = scmp.ne.s32.totalorder %s101_s23, %s2160_s4  ;;  %p2165_p6 = scmp.lt.s32.totalorder %s101_s23, %s101_s23 }
  0xa8   :  { %p2166_p7 = scmp.lt.s32.totalorder %s2164_s21, %s2160_s4 }
  0xaa   :  { %p2167_p8 = por %p2166_p7, %p2165_p6 }
  0xac   :  { %p2168_p9 = pnand %p2167_p8, %p2161_p5 }
  0xae   :  { %2171 = shalt.err (!%p2168_p9)
}
  0xaf   :  { %103 = dma.hbm_to_vmem [thread:$0]  %s2883_s6, 16, %s101_s23, [#allocation12]  }
  0xb0   :  { %s2172_s3 = scalar_lea.hbm %s2885_s8, 16 }
  0xb1   :  { %p2173_p10 = scmp.ne.s32.totalorder %s2885_s8, %s2172_s3  ;;  %p2176_p11 = scmp.lt.u32.totalorder %s2172_s3, %s2885_s8 }
  0xb3   :  { %p2178_p12 = pnand %p2176_p11, %p2173_p10 }
  0xb5   :  { %2181 = shalt.err (!%p2178_p12)
}
  0xb6   :  { %s2182_s20 = scalar_lea.vmem %s121_s28, 16  ;;  %s2186_s26 = scalar_lea.vmem %s121_s28, 32 }
  0xb7   :  { %p2183_p13 = scmp.ne.s32.totalorder %s121_s28, %s2182_s20  ;;  %p2187_p0 = scmp.lt.s32.totalorder %s121_s28, %s121_s28 }
  0xb8   :  { %p2188_p1 = scmp.lt.s32.totalorder %s2186_s26, %s2182_s20 }
  0xba   :  { %p2189_p2 = por %p2188_p1, %p2187_p0 }
  0xbc   :  { %p2190_p3 = pnand %p2189_p2, %p2183_p13 }
  0xbe   :  { %2193 = shalt.err (!%p2190_p3)
}
  0xbf   :  { %123 = dma.hbm_to_vmem [thread:$0]  %s2885_s8, 16, %s121_s28, [#allocation15]  }
  0xc0   :  { %s2315_s29 = smov [#allocation19]   ;;  %s2316_s24 = smov [#allocation22]  }
  0xc1   :  { %s142_s0 = sshll.u32 %s2315_s29, 4  ;;  %s164_s7 = sshll.u32 %s2316_s24, 4  ;;  %s143_s0 = int_to_ptr.vmem [resolvable:$true] %s142_s0  ;;  %s165_s7 = int_to_ptr.vmem [resolvable:$true] %s164_s7 }
  0xc2   :  { %s2194_s17 = scalar_lea.hbm %s2887_s10, 16 }
  0xc3   :  { %p2195_p4 = scmp.ne.s32.totalorder %s2887_s10, %s2194_s17  ;;  %p2198_p5 = scmp.lt.u32.totalorder %s2194_s17, %s2887_s10 }
  0xc5   :  { %p2200_p6 = pnand %p2198_p5, %p2195_p4 }
  0xc7   :  { %2203 = shalt.err (!%p2200_p6)
}
  0xc8   :  { %s2204_s8 = scalar_lea.vmem %s143_s0, 16  ;;  %s2208_s28 = scalar_lea.vmem %s143_s0, 32 }
  0xc9   :  { %p2205_p7 = scmp.ne.s32.totalorder %s143_s0, %s2204_s8  ;;  %p2209_p8 = scmp.lt.s32.totalorder %s143_s0, %s143_s0 }
  0xca   :  { %p2210_p9 = scmp.lt.s32.totalorder %s2208_s28, %s2204_s8 }
  0xcc   :  { %p2211_p10 = por %p2210_p9, %p2209_p8 }
  0xce   :  { %p2212_p11 = pnand %p2211_p10, %p2205_p7 }
  0xd0   :  { %2215 = shalt.err (!%p2212_p11)
}
  0xd1   :  { %145 = dma.hbm_to_vmem [thread:$0]  %s2887_s10, 16, %s143_s0, [#allocation18]  }
  0xd2   :  { %s2216_s9 = scalar_lea.hbm %s2889_s12, 16 }
  0xd3   :  { %p2217_p12 = scmp.ne.s32.totalorder %s2889_s12, %s2216_s9  ;;  %p2220_p13 = scmp.lt.u32.totalorder %s2216_s9, %s2889_s12 }
  0xd5   :  { %p2222_p0 = pnand %p2220_p13, %p2217_p12 }
  0xd7   :  { %2225 = shalt.err (!%p2222_p0)
}
  0xd8   :  { %s2226_s6 = scalar_lea.vmem %s165_s7, 16  ;;  %s2230_s23 = scalar_lea.vmem %s165_s7, 32 }
  0xd9   :  { %p2227_p1 = scmp.ne.s32.totalorder %s165_s7, %s2226_s6  ;;  %p2231_p2 = scmp.lt.s32.totalorder %s165_s7, %s165_s7 }
  0xda   :  { %p2232_p3 = scmp.lt.s32.totalorder %s2230_s23, %s2226_s6 }
  0xdc   :  { %p2233_p4 = por %p2232_p3, %p2231_p2 }
  0xde   :  { %p2234_p5 = pnand %p2233_p4, %p2227_p1 }
  0xe0   :  { %2237 = shalt.err (!%p2234_p5)
}
  0xe1   :  { %167 = dma.hbm_to_vmem [thread:$0]  %s2889_s12, 16, %s165_s7, [#allocation21]  }
  0xe2   :  { %s2317_s0 = smov [#allocation23]   ;;  %s2238_s17 = scalar_lea.hbm %s2890_s13, 128 }
  0xe3   :  { %s174_s24 = sshll.u32 %s2317_s0, 4  ;;  %p2239_p6 = scmp.ne.s32.totalorder %s2890_s13, %s2238_s17  ;;  %s175_s24 = int_to_ptr.vmem [resolvable:$true] %s174_s24 }
  0xe4   :  { %p2242_p7 = scmp.lt.u32.totalorder %s2238_s17, %s2890_s13 }
  0xe6   :  { %p2244_p8 = pnand %p2242_p7, %p2239_p6 }
  0xe8   :  { %2247 = shalt.err (!%p2244_p8)
}
  0xe9   :  { %s2248_s8 = scalar_lea.vmem %s175_s24, 128  ;;  %p2253_p10 = scmp.lt.s32.totalorder %s175_s24, %s175_s24 }
  0xea   :  { %p2249_p9 = scmp.ne.s32.totalorder %s175_s24, %s2248_s8  ;;  %p2254_p11 = scmp.lt.s32.totalorder %s2248_s8, %s2248_s8 }
  0xec   :  { %p2255_p12 = por %p2254_p11, %p2253_p10 }
  0xee   :  { %p2256_p13 = pnand %p2255_p12, %p2249_p9 }
  0xf0   :  { %2259 = shalt.err (!%p2256_p13)
}
  0xf1   :  { %177 = dma.hbm_to_vmem [thread:$0]  %s2890_s13, 128, %s175_s24, [#allocation24]  }
  0xf2   :  { %2282 = dma.done.wait [#allocation3], 256  }
  0xf3   :  { %2283 = vsyncadd [#allocation3], 4294967040 }
  0xf4   :  { %2284 = dma.done.wait [#allocation6], 32  }
  0xf5   :  { %2285 = vsyncadd [#allocation6], 4294967264 }
  0xf6   :  { %2286 = dma.done.wait [#allocation9], 272  }
  0xf7   :  { %2287 = vsyncadd [#allocation9], 4294967024 }
  0xf8   :  { %2288 = dma.done.wait [#allocation12], 272  }
  0xf9   :  { %2289 = vsyncadd [#allocation12], 4294967024 }
  0xfa   :  { %2290 = dma.done.wait [#allocation15], 32  }
  0xfb   :  { %2291 = vsyncadd [#allocation15], 4294967264 }
  0xfc   :  { %2292 = dma.done.wait [#allocation18], 272  }
  0xfd   :  { %2293 = vsyncadd [#allocation18], 4294967024 }
  0xfe   :  { %2294 = dma.done.wait [#allocation21], 1040  }
  0xff   :  { %2295 = vsyncadd [#allocation21], 4294966256 }
 0x100   :  { %2296 = dma.done.wait [#allocation24], 128  }
 0x101   :  { %2297 = vsyncadd [#allocation24], 4294967168  ;;  %vm225_vm0 = vcmask 261120   ;;  %v2599_v0 = vld [vmem:[#allocation2] sm:$0xff]  ;;  %v2601_v1 = vld [vmem:[#allocation2 + $0x8] sm:$0xff]  ;;  %v2318_v15 = vmov 0.0  }
 0x102   :  { %v226_v2 = vsel %vm225_vm0, %v2599_v0, 0.0  ;;  %v229_v3 = vsel %vm225_vm0, %v2601_v1, 0.0  ;;  %v1890_v14 = vld [vmem:[#allocation8] sm:$0xff]   ;;  %1723 = vmatprep.subr.bf16.mxu0 %v2318_v15  ;;  %1743 = vmatprep.subr.bf16.mxu1 %v2318_v15  ;;  %v1891_v16 = vld [vmem:[#allocation8 + $0x8] sm:$0xff]   ;;  %vm2319_vm1 = vmmov 0   ;;  %s2320_s13 = smov 112  }
 0x103   :  { %227 = vadd.xlane.f32.xlu0 %v226_v2  ;;  %1724 = vmatpush3.bf16.msra.mxu0 %v1890_v14  ;;  %v1619_v25 = vld [vmem:[#allocation5] ss:$0 sm:$0xff]  ;;  %v1620_v29 = vld [vmem:[#allocation7] ss:$0 sm:$0xff]  ;;  %v1621_v34 = vld [vmem:[#allocation10] ss:$0 sm:$0xff] }
 0x104   :  { %1727 = vmatprep.mubr.msk.bf16.mxu0 %vm2319_vm1, %v2318_v15  ;;  %1725 = vmatprep.subr.bf16.mxu0 %v2318_v15  ;;  %s2321_s28 = smov 120   ;;  %s2322_s5 = smov 104   ;;  %vm358_vm2 = vcmask 64512   ;;  %vm854_vm3 = vcmask 1043456   ;;  %vm1266_vm4 = vcmask 130048   ;;  %vm1271_vm5 = vcmask 195584  }
 0x105   :  { %1745 = vmatprep.mubr.msk.bf16.mxu1 %vm2319_vm1, %v2318_v15  ;;  %s2323_s25 = smov 96   ;;  %s2325_s3 = smov 24  }
 0x106   :  { %s2326_s22 = smov [#allocation25]  }
 0x107   :  { %230 = vadd.xlane.f32.xlu0 %v229_v3  ;;  %1726 = vmatpush3.bf16.msra.mxu0 %v1891_v16  ;;  %s1600_s9 = sshll.u32 %s2326_s22, 4  ;;  %s1601_s9 = int_to_ptr.vmem [resolvable:$true] %s1600_s9 }
 0x108   :  { %1731 = vmatprep.subr.bf16.mxu0 %v2318_v15  ;;  %s2260_s2 = scalar_lea.vmem %s1601_s9, 256  ;;  %p2265_p1 = scmp.lt.s32.totalorder %s1601_s9, %s1601_s9 }
 0x109   :  { %p2261_p0 = scmp.ne.s32.totalorder %s1601_s9, %s2260_s2  ;;  %p2266_p2 = scmp.lt.s32.totalorder %s2260_s2, %s2260_s2 }
 0x10b   :  { %p2267_p3 = por %p2266_p2, %p2265_p1 }
 0x10d   :  { %p2268_p4 = pnand %p2267_p3, %p2261_p0 }
 0x190   :  { %v228_v4 = vpop.xlane.xlu0 %227 }
 0x191   :  { %v233_v5 = vmul.f32 0.03125, %v228_v4 }
 0x193   :  { %v235_v6 = vsub.f32 %v2599_v0, %v233_v5 }
 0x194   :  { %v231_v7 = vpop.xlane.xlu0 %230 }
 0x195   :  { %v234_v8 = vmul.f32 0.03125, %v231_v7  ;;  %v237_v9 = vmul.f32 %v235_v6, %v235_v6 }
 0x197   :  { %v236_v10 = vsub.f32 %v2601_v1, %v234_v8  ;;  %v239_v11 = vsel %vm225_vm0, %v237_v9, 0.0  ;;  %v355_v9 = vld [vmem:[#allocation23] sm:$0xff] }
 0x198   :  { %240 = vadd.xlane.f32.xlu1 %v239_v11 }
 0x199   :  { %v238_v12 = vmul.f32 %v236_v10, %v236_v10 }
 0x19b   :  { %v242_v13 = vsel %vm225_vm0, %v238_v12, 0.0 }
 0x19c   :  { %243 = vadd.xlane.f32.xlu1 %v242_v13 }
 0x225   :  { %v241_v17 = vpop.xlane.xlu1 %240 }
 0x226   :  { %v245_v18 = vmul.f32 0.03125, %v241_v17 }
 0x228   :  { %v247_v19 = vadd.f32 1e-05, %v245_v18 }
 0x229   :  { %v244_v20 = vpop.xlane.xlu1 %243 }
 0x22a   :  { %1904 = vrsqrt.f32 %v247_v19  ;;  %v246_v21 = vmul.f32 0.03125, %v244_v20 }
 0x22c   :  { %v248_v22 = vadd.f32 1e-05, %v246_v21 }
 0x22e   :  { %1906 = vrsqrt.f32 %v248_v22 }
 0x234   :  { %v1905_v23 = vpop.eup %1904 }
 0x235   :  { %v251_v24 = vmul.f32 %v1905_v23, %v235_v6 }
 0x237   :  { %v259_v28 = vmul.f32 %v1619_v25, %v251_v24 }
 0x238   :  { %v1907_v26 = vpop.eup %1906 }
 0x239   :  { %v252_v27 = vmul.f32 %v1907_v26, %v236_v10  ;;  %v267_v31 = vadd.f32 %v1620_v29, %v259_v28 }
 0x23b   :  { %v260_v30 = vmul.f32 %v1619_v25, %v252_v27 }
 0x23d   :  { %v268_v32 = vadd.f32 %v1620_v29, %v260_v30 }
 0x23f   :  { %v269_v33 = vpack.c.bf16 %v268_v32, %v267_v31 }
 0x241   :  { %1728 = vmatmul.mubr.msk.bf16.vlgmr.msra.gmra.mrb[0].mxu0 %vm225_vm0, %v269_v33 }
 0x242   :  { %1733 = vmatprep.mubr.msk.bf16.mxu0 %vm2319_vm1, %v2318_v15 }
 0x314   :  { %v330_v35 = vpop.f32.mrb[0].mxu0 }
 0x315   :  { %v331_v36 = vadd.f32 %v1621_v34, %v330_v35  ;;  %v1729_v37 = vpop.f32.mrb[1].mxu0 }
 0x316   :  { %v333_v38 = vpop.f32.mrb[2].mxu0 }
 0x317   :  { %v2622_v39 = vpack.c.bf16 %v331_v36, %v331_v36  ;;  %v334_v40 = vadd.f32 %v1621_v34, %v333_v38  ;;  %v1730_v41 = vpop.f32.mrb[3].mxu0 }
 0x319   :  { %347 = vrot.lane.b32.xlu1 %v2622_v39, %s2320_s13  ;;  %343 = vrot.lane.b32.xlu0 %v2622_v39, %s2321_s28  ;;  %v2626_v42 = vpack.c.bf16 %v334_v40, %v334_v40 }
 0x31d   :  { %351 = vrot.lane.b32.xlu1 %v2622_v39, %s2322_s5  ;;  %349 = vrot.lane.b32.xlu0 %v2626_v42, %s2320_s13 }
 0x321   :  { %356 = vrot.lane.b32.xlu0 %v2622_v39, %s2323_s25  ;;  %345 = vrot.lane.b32.xlu1 %v2626_v42, %s2321_s28 }
 0x325   :  { %353 = vrot.lane.b32.xlu1 %v2626_v42, %s2322_s5 }
 0x38b   :  { %v348_v43 = vpop.permute.xlu1 %347  ;;  %v344_v44 = vpop.permute.xlu0 %343 }
 0x38c   :  { %v2633_v45 = vcombine.low %v348_v43, %v348_v43  ;;  %v2635_v46 = vcombine.low %v344_v44, %v344_v44 }
 0x38e   :  { %457 = vrot.lane.b32.xlu0 %v2633_v45, %s2323_s25  ;;  %407 = vrot.lane.b32.xlu1 %v2635_v46, %s2323_s25 }
 0x38f   :  { %v352_v47 = vpop.permute.xlu1 %351  ;;  %v350_v48 = vpop.permute.xlu0 %349 }
 0x390   :  { %v2639_v49 = vcombine.low %v352_v47, %v352_v47  ;;  %v2643_v52 = vcombine.low %v350_v48, %v350_v48 }
 0x392   :  { %555 = vrot.lane.b32.xlu0 %v2626_v42, %s2323_s25  ;;  %507 = vrot.lane.b32.xlu1 %v2639_v49, %s2323_s25 }
 0x393   :  { %v357_v50 = vpop.permute.xlu0 %356  ;;  %v346_v51 = vpop.permute.xlu1 %345 }
 0x394   :  { %v363_v53 = vsel %vm358_vm2, %v357_v50, 0  ;;  %v2646_v54 = vcombine.low %v346_v51, %v346_v51 }
 0x395   :  { %1732 = vmatpush3.bf16.xpose.msra.mxu0 %v363_v53 }
 0x396   :  { %655 = vrot.lane.b32.xlu0 %v2643_v52, %s2323_s25  ;;  %605 = vrot.lane.b32.xlu1 %v2646_v54, %s2323_s25 }
 0x397   :  { %v354_v55 = vpop.permute.xlu1 %353  ;;  %1737 = vmatprep.subr.bf16.mxu0 %v2318_v15 }
 0x398   :  { %v2651_v56 = vcombine.low %v354_v55, %v354_v55 }
 0x39a   :  { %705 = vrot.lane.b32.xlu1 %v2651_v56, %s2323_s25 }
 0x39c   :  { %1734 = vmatmul.mubr.msk.bf16.vlgmr.msra.gmra.mrb[4].mxu0 %vm358_vm2, %v2622_v39 }
 0x39d   :  { %1739 = vmatprep.mubr.msk.bf16.mxu0 %vm2319_vm1, %v2318_v15 }
 0x400   :  { %v458_v57 = vpop.permute.xlu0 %457  ;;  %v408_v58 = vpop.permute.xlu1 %407 }
 0x401   :  { %v413_v59 = vsel %vm358_vm2, %v408_v58, 0  ;;  %v463_v60 = vsel %vm358_vm2, %v458_v57, 0 }
 0x402   :  { %1738 = vmatpush3.bf16.xpose.msra.mxu0 %v413_v59  ;;  %1744 = vmatpush3.bf16.xpose.msra.mxu1 %v463_v60 }
 0x403   :  { %1749 = vmatprep.subr.bf16.mxu0 %v2318_v15  ;;  %1755 = vmatprep.subr.bf16.mxu1 %v2318_v15 }
 0x404   :  { %v556_v61 = vpop.permute.xlu0 %555  ;;  %v508_v62 = vpop.permute.xlu1 %507 }
 0x405   :  { %v561_v63 = vsel %vm358_vm2, %v556_v61, 0  ;;  %v513_v2 = vsel %vm358_vm2, %v508_v62, 0 }
 0x408   :  { %v656_v3 = vpop.permute.xlu0 %655  ;;  %v606_v4 = vpop.permute.xlu1 %605 }
 0x409   :  { %1740 = vmatmul.mubr.msk.bf16.vlgmr.msra.gmra.mrb[8].mxu0 %vm358_vm2, %v344_v44  ;;  %1746 = vmatmul.mubr.msk.bf16.vlgmr.msra.gmra.mrb[0].mxu1 %vm358_vm2, %v348_v43  ;;  %v661_v5 = vsel %vm358_vm2, %v656_v3, 0  ;;  %v611_v6 = vsel %vm358_vm2, %v606_v4, 0 }
 0x40a   :  { %1750 = vmatpush3.bf16.xpose.msra.mxu0 %v513_v2  ;;  %1756 = vmatpush3.bf16.xpose.msra.mxu1 %v561_v63 }
 0x40b   :  { %1751 = vmatprep.mubr.msk.bf16.mxu0 %vm2319_vm1, %v2318_v15  ;;  %1757 = vmatprep.mubr.msk.bf16.mxu1 %vm2319_vm1, %v2318_v15 }
 0x40c   :  { %1761 = vmatprep.subr.bf16.mxu0 %v2318_v15  ;;  %1767 = vmatprep.subr.bf16.mxu1 %v2318_v15  ;;  %v706_v7 = vpop.permute.xlu1 %705 }
 0x40d   :  { %v711_v8 = vsel %vm358_vm2, %v706_v7, 0 }
 0x411   :  { %1752 = vmatmul.mubr.msk.bf16.vlgmr.msra.gmra.mrb[12].mxu0 %vm358_vm2, %v352_v47  ;;  %1758 = vmatmul.mubr.msk.bf16.vlgmr.msra.gmra.mrb[4].mxu1 %vm358_vm2, %v2626_v42 }
 0x412   :  { %1762 = vmatpush3.bf16.xpose.msra.mxu0 %v611_v6  ;;  %1768 = vmatpush3.bf16.xpose.msra.mxu1 %v661_v5 }
 0x413   :  { %1763 = vmatprep.mubr.msk.bf16.mxu0 %vm2319_vm1, %v2318_v15  ;;  %1769 = vmatprep.mubr.msk.bf16.mxu1 %vm2319_vm1, %v2318_v15 }
 0x414   :  { %1773 = vmatprep.subr.bf16.mxu0 %v2318_v15  ;;  %1779 = vmatprep.subr.bf16.mxu1 %v2318_v15 }
 0x419   :  { %1764 = vmatmul.mubr.msk.bf16.vlgmr.msra.gmra.mrb[16].mxu0 %vm358_vm2, %v346_v51  ;;  %1770 = vmatmul.mubr.msk.bf16.vlgmr.msra.gmra.mrb[8].mxu1 %vm358_vm2, %v350_v48 }
 0x41a   :  { %1774 = vmatpush3.bf16.xpose.msra.mxu0 %v711_v8  ;;  %1775 = vmatprep.mubr.msk.bf16.mxu0 %vm2319_vm1, %v2318_v15 }
 0x41b   :  { %1785 = vmatprep.subr.bf16.mxu0 %v2318_v15  ;;  %1781 = vmatprep.mubr.msk.bf16.mxu1 %vm2319_vm1, %v2318_v15 }
 0x421   :  { %1776 = vmatmul.mubr.msk.bf16.vlgmr.msra.gmra.mrb[20].mxu0 %vm358_vm2, %v354_v55 }
 0x422   :  { %1787 = vmatprep.mubr.msk.bf16.mxu0 %vm2319_vm1, %v2318_v15 }
 0x46f   :  { %v399_v10 = vpop.f32.mrb[4].mxu0 }
 0x470   :  { %v400_v11 = vadd.f32 %v399_v10, %v355_v9  ;;  %v1735_v12 = vpop.f32.mrb[5].mxu0 }
 0x471   :  { %v402_v13 = vpop.f32.mrb[6].mxu0 }
 0x472   :  { %v1736_v14 = vpop.f32.mrb[7].mxu0  ;;  %v753_v16 = vsel %vm358_vm2, %v400_v11, -inf }
 0x473   :  { %754 = vmax.xlane.f32.xlu0 %v753_v16 }
 0x4dc   :  { %v449_v17 = vpop.f32.mrb[8].mxu0  ;;  %v499_v18 = vpop.f32.mrb[0].mxu1 }
 0x4dd   :  { %v2695_v19 = vadd.f32 %v449_v17, %v355_v9  ;;  %v500_v20 = vadd.f32 %v499_v18, %v355_v9  ;;  %v1741_v21 = vpop.f32.mrb[9].mxu0  ;;  %v1747_v22 = vpop.f32.mrb[1].mxu1 }
 0x4de   :  { %v452_v23 = vpop.f32.mrb[10].mxu0  ;;  %v502_v24 = vpop.f32.mrb[2].mxu1 }
 0x4df   :  { %v1742_v25 = vpop.f32.mrb[11].mxu0  ;;  %v1748_v26 = vpop.f32.mrb[3].mxu1  ;;  %v759_v27 = vsel %vm358_vm2, %v500_v20, -inf  ;;  %v756_v28 = vsel %vm358_vm2, %v2695_v19, -inf }
 0x4e0   :  { %760 = vmax.xlane.f32.xlu0 %v759_v27  ;;  %757 = vmax.xlane.f32.xlu1 %v756_v28 }
 0x4e4   :  { %v549_v29 = vpop.f32.mrb[12].mxu0  ;;  %v597_v30 = vpop.f32.mrb[4].mxu1 }
 0x4e5   :  { %v2700_v31 = vadd.f32 %v549_v29, %v355_v9  ;;  %v1753_v32 = vpop.f32.mrb[13].mxu0  ;;  %v1759_v33 = vpop.f32.mrb[5].mxu1  ;;  %v2702_v36 = vadd.f32 %v597_v30, %v355_v9 }
 0x4e6   :  { %v552_v34 = vpop.f32.mrb[14].mxu0  ;;  %v600_v35 = vpop.f32.mrb[6].mxu1 }
 0x4e7   :  { %v1754_v37 = vpop.f32.mrb[15].mxu0  ;;  %v1760_v38 = vpop.f32.mrb[7].mxu1  ;;  %v762_v40 = vsel %vm358_vm2, %v2700_v31, -inf  ;;  %v765_v41 = vsel %vm358_vm2, %v2702_v36, -inf }
 0x4e8   :  { %763 = vmax.xlane.f32.xlu0 %v762_v40 }
 0x4ec   :  { %v697_v43 = vpop.f32.mrb[8].mxu1  ;;  %766 = vmax.xlane.f32.xlu0 %v765_v41  ;;  %v647_v44 = vpop.f32.mrb[16].mxu0 }
 0x4ed   :  { %v2708_v47 = vadd.f32 %v697_v43, %v355_v9  ;;  %v2710_v48 = vadd.f32 %v647_v44, %v355_v9  ;;  %v1765_v50 = vpop.f32.mrb[17].mxu0  ;;  %v1771_v51 = vpop.f32.mrb[9].mxu1 }
 0x4ee   :  { %v650_v53 = vpop.f32.mrb[18].mxu0  ;;  %v700_v55 = vpop.f32.mrb[10].mxu1 }
 0x4ef   :  { %v1766_v57 = vpop.f32.mrb[19].mxu0  ;;  %v1772_v58 = vpop.f32.mrb[11].mxu1  ;;  %v771_v59 = vsel %vm358_vm2, %v2708_v47, -inf  ;;  %v768_v60 = vsel %vm358_vm2, %v2710_v48, -inf }
 0x4f0   :  { %772 = vmax.xlane.f32.xlu0 %v771_v59  ;;  %769 = vmax.xlane.f32.xlu1 %v768_v60 }
 0x4f4   :  { %v747_v61 = vpop.f32.mrb[20].mxu0 }
 0x4f5   :  { %v1777_v62 = vpop.f32.mrb[21].mxu0  ;;  %v2724_v7 = vadd.f32 %v747_v61, %v355_v9 }
 0x4f6   :  { %v750_v63 = vpop.f32.mrb[22].mxu0 }
 0x4f7   :  { %v1778_v2 = vpop.f32.mrb[23].mxu0 }
 0x500   :  { %v755_v3 = vpop.xlane.xlu0 %754 }
 0x501   :  { %898 = vrot.lane.b32.xlu1 %v2635_v46, %s2302_s1  ;;  %v777_v4 = vsub.f32 %v400_v11, %v755_v3  ;;  %v774_v46 = vsel %vm358_vm2, %v2724_v7, -inf }
 0x503   :  { %v785_v5 = vmul.f32 1.442695, %v777_v4 }
 0x505   :  { %946 = vrot.lane.b32.xlu1 %v2633_v45, %s2302_s1  ;;  %1908 = vpow2.f32 %v785_v5 }
 0x506   :  { %849 = vrot.lane.b32.xlu0 %v2622_v39, %s2302_s1 }
 0x50f   :  { %v2722_v6 = vpop.eup %1908 }
 0x510   :  { %v801_v8 = vsel %vm358_vm2, %v2722_v6, 0.0 }
 0x525   :  { %802 = vadd.xlane.f32.xlu0 %v801_v8 }
 0x529   :  { %775 = vmax.xlane.f32.xlu1 %v774_v46 }
 0x53a   :  { %994 = vrot.lane.b32.xlu1 %v2639_v49, %s2302_s1 }
 0x56d   :  { %v761_v39 = vpop.xlane.xlu0 %760  ;;  %v758_v45 = vpop.xlane.xlu1 %757 }
 0x56e   :  { %v779_v10 = vsub.f32 %v500_v20, %v761_v39  ;;  %v778_v11 = vsub.f32 %v2695_v19, %v758_v45 }
 0x570   :  { %v789_v12 = vmul.f32 1.442695, %v779_v10  ;;  %v787_v13 = vmul.f32 1.442695, %v778_v11 }
 0x572   :  { %1910 = vpow2.f32 %v789_v12 }
 0x573   :  { %1912 = vpow2.f32 %v787_v13 }
 0x575   :  { %v764_v9 = vpop.xlane.xlu0 %763 }
 0x576   :  { %v780_v26 = vsub.f32 %v2700_v31, %v764_v9 }
 0x578   :  { %v791_v29 = vmul.f32 1.442695, %v780_v26 }
 0x579   :  { %v767_v14 = vpop.xlane.xlu0 %766 }
 0x57a   :  { %v781_v25 = vsub.f32 %v2702_v36, %v767_v14 }
 0x57c   :  { %v2733_v16 = vpop.eup %1910  ;;  %v793_v27 = vmul.f32 1.442695, %v781_v25 }
 0x57d   :  { %v2735_v17 = vpop.eup %1912  ;;  %v773_v18 = vpop.xlane.xlu0 %772  ;;  %v807_v49 = vsel %vm358_vm2, %v2733_v16, 0.0 }
 0x57e   :  { %v770_v21 = vpop.xlane.xlu1 %769  ;;  %808 = vadd.xlane.f32.xlu0 %v807_v49  ;;  %v804_v20 = vsel %vm358_vm2, %v2735_v17, 0.0  ;;  %v783_v28 = vsub.f32 %v2708_v47, %v773_v18  ;;  %1914 = vpow2.f32 %v793_v27 }
 0x57f   :  { %805 = vadd.xlane.f32.xlu1 %v804_v20  ;;  %v782_v30 = vsub.f32 %v2710_v48, %v770_v21  ;;  %1916 = vpow2.f32 %v791_v29 }
 0x580   :  { %v797_v32 = vmul.f32 1.442695, %v783_v28 }
 0x581   :  { %v850_v19 = vpop.permute.xlu0 %849  ;;  %v795_v33 = vmul.f32 1.442695, %v782_v30 }
 0x582   :  { %v899_v22 = vpop.permute.xlu1 %898  ;;  %v856_v23 = vsel %vm854_vm3, %v850_v19, 0  ;;  %1918 = vpow2.f32 %v797_v32 }
 0x583   :  { %v904_v24 = vsel %vm854_vm3, %v899_v22, 0  ;;  %1780 = vmatpush3.bf16.msra.mxu1 %v856_v23  ;;  %1920 = vpow2.f32 %v795_v33 }
 0x584   :  { %1786 = vmatpush3.bf16.msra.mxu0 %v904_v24  ;;  %1791 = vmatprep.subr.bf16.mxu1 %v2318_v15 }
 0x585   :  { %1797 = vmatprep.subr.bf16.mxu0 %v2318_v15 }
 0x590   :  { %1090 = vrot.lane.b32.xlu1 %v2646_v54, %s2302_s1  ;;  %v2753_v54 = vpop.eup %1914 }
 0x591   :  { %v2755_v34 = vpop.eup %1916  ;;  %v813_v31 = vsel %vm358_vm2, %v2753_v54, 0.0 }
 0x592   :  { %v2759_v36 = vpop.eup %1918  ;;  %v810_v37 = vsel %vm358_vm2, %v2755_v34, 0.0 }
 0x593   :  { %v2763_v38 = vpop.eup %1920  ;;  %v819_v41 = vsel %vm358_vm2, %v2759_v36, 0.0 }
 0x594   :  { %1042 = vrot.lane.b32.xlu0 %v2626_v42, %s2302_s1  ;;  %v947_v42 = vpop.permute.xlu1 %946  ;;  %v816_v44 = vsel %vm358_vm2, %v2763_v38, 0.0 }
 0x595   :  { %v952_v53 = vsel %vm854_vm3, %v947_v42, 0 }
 0x5b2   :  { %v803_v35 = vpop.xlane.xlu0 %802 }
 0x5b3   :  { %1922 = vrcp.f32 %v803_v35  ;;  %814 = vadd.xlane.f32.xlu0 %v813_v31 }
 0x5b4   :  { %811 = vadd.xlane.f32.xlu1 %v810_v37 }
 0x5b6   :  { %v776_v40 = vpop.xlane.xlu1 %775 }
 0x5b7   :  { %v784_v43 = vsub.f32 %v2724_v7, %v776_v40  ;;  %820 = vadd.xlane.f32.xlu0 %v819_v41 }
 0x5b8   :  { %817 = vadd.xlane.f32.xlu1 %v816_v44 }
 0x5b9   :  { %v799_v47 = vmul.f32 1.442695, %v784_v43 }
 0x5ba   :  { %v995_v58 = vpop.permute.xlu1 %994 }
 0x5bb   :  { %1924 = vpow2.f32 %v799_v47 }
 0x5bd   :  { %v1923_v48 = vpop.eup %1922 }
 0x5be   :  { %v833_v50 = vmul.f32 %v1923_v48, %v2722_v6 }
 0x5c0   :  { %v841_v51 = vpack.c.bf16 %v833_v50, %v833_v50 }
 0x5c2   :  { %1782 = vmatmul.mubr.msk.bf16.vlgmr.msra.gmra.mrb[12].mxu1 %vm358_vm2, %v841_v51 }
 0x5c3   :  { %1792 = vmatpush3.bf16.msra.mxu1 %v952_v53  ;;  %1793 = vmatprep.mubr.msk.bf16.mxu1 %vm2319_vm1, %v2318_v15 }
 0x5c4   :  { %1803 = vmatprep.subr.bf16.mxu1 %v2318_v15 }
 0x5c5   :  { %v2776_v55 = vpop.eup %1924 }
 0x5c6   :  { %v822_v57 = vsel %vm358_vm2, %v2776_v55, 0.0 }
 0x5c7   :  { %823 = vadd.xlane.f32.xlu1 %v822_v57  ;;  %v1892_v57 = vld [vmem:[#allocation11] sm:$0xff]  }
 0x5cd   :  { %1138 = vrot.lane.b32.xlu0 %v2643_v52, %s2302_s1  ;;  %v1000_v52 = vsel %vm854_vm3, %v995_v58, 0 }
 0x5d8   :  { %1186 = vrot.lane.b32.xlu1 %v2651_v56, %s2302_s1  ;;  %s2324_s1 = smov 16  }
 0x60b   :  { %v809_v59 = vpop.xlane.xlu0 %808 }
 0x60c   :  { %1926 = vrcp.f32 %v809_v59  ;;  %v806_v60 = vpop.xlane.xlu1 %805 }
 0x60d   :  { %1928 = vrcp.f32 %v806_v60 }
 0x60f   :  { %v1043_v3 = vpop.permute.xlu0 %1042 }
 0x610   :  { %v1048_v6 = vsel %vm854_vm3, %v1043_v3, 0  ;;  %v1091_v56 = vpop.permute.xlu1 %1090  ;;  %v1893_v3 = vld [vmem:[#allocation11 + $0x8] sm:$0xff]  }
 0x611   :  { %v1096_v21 = vsel %vm854_vm3, %v1091_v56, 0 }
 0x616   :  { %v1927_v61 = vpop.eup %1926 }
 0x617   :  { %v1929_v62 = vpop.eup %1928  ;;  %v835_v63 = vmul.f32 %v1927_v61, %v2733_v16 }
 0x618   :  { %v834_v2 = vmul.f32 %v1929_v62, %v2735_v17 }
 0x619   :  { %v843_v4 = vpack.c.bf16 %v835_v63, %v835_v63 }
 0x61a   :  { %v842_v5 = vpack.c.bf16 %v834_v2, %v834_v2 }
 0x61b   :  { %1794 = vmatmul.mubr.msk.bf16.vlgmr.msra.gmra.mrb[16].mxu1 %vm358_vm2, %v843_v4 }
 0x61c   :  { %1788 = vmatmul.mubr.msk.bf16.vlgmr.msra.gmra.mrb[24].mxu0 %vm358_vm2, %v842_v5  ;;  %1804 = vmatpush3.bf16.msra.mxu1 %v1048_v6 }
 0x61d   :  { %1798 = vmatpush3.bf16.msra.mxu0 %v1000_v52  ;;  %1799 = vmatprep.mubr.msk.bf16.mxu0 %vm2319_vm1, %v2318_v15 }
 0x61e   :  { %1805 = vmatprep.mubr.msk.bf16.mxu1 %vm2319_vm1, %v2318_v15  ;;  %1809 = vmatprep.subr.bf16.mxu0 %v2318_v15 }
 0x61f   :  { %1815 = vmatprep.subr.bf16.mxu1 %v2318_v15 }
 0x640   :  { %v815_v7 = vpop.xlane.xlu0 %814 }
 0x641   :  { %1930 = vrcp.f32 %v815_v7  ;;  %v812_v8 = vpop.xlane.xlu1 %811 }
 0x642   :  { %1932 = vrcp.f32 %v812_v8 }
 0x644   :  { %v821_v46 = vpop.xlane.xlu0 %820 }
 0x645   :  { %1934 = vrcp.f32 %v821_v46  ;;  %v818_v39 = vpop.xlane.xlu1 %817 }
 0x646   :  { %1936 = vrcp.f32 %v818_v39 }
 0x648   :  { %v1139_v13 = vpop.permute.xlu0 %1138 }
 0x649   :  { %v1144_v18 = vsel %vm854_vm3, %v1139_v13, 0 }
 0x64b   :  { %v1931_v45 = vpop.eup %1930 }
 0x64c   :  { %v1933_v10 = vpop.eup %1932  ;;  %v837_v11 = vmul.f32 %v1931_v45, %v2753_v54 }
 0x64d   :  { %v836_v12 = vmul.f32 %v1933_v10, %v2755_v34 }
 0x64e   :  { %v845_v9 = vpack.c.bf16 %v837_v11, %v837_v11 }
 0x64f   :  { %v1935_v14 = vpop.eup %1934  ;;  %v844_v16 = vpack.c.bf16 %v836_v12, %v836_v12 }
 0x650   :  { %v1937_v17 = vpop.eup %1936  ;;  %1806 = vmatmul.mubr.msk.bf16.vlgmr.msra.gmra.mrb[20].mxu1 %vm358_vm2, %v845_v9  ;;  %v839_v49 = vmul.f32 %v1935_v14, %v2759_v36 }
 0x651   :  { %1800 = vmatmul.mubr.msk.bf16.vlgmr.msra.gmra.mrb[28].mxu0 %vm358_vm2, %v844_v16  ;;  %1816 = vmatpush3.bf16.msra.mxu1 %v1144_v18  ;;  %v838_v20 = vmul.f32 %v1937_v17, %v2763_v38 }
 0x652   :  { %1810 = vmatpush3.bf16.msra.mxu0 %v1096_v21  ;;  %1811 = vmatprep.mubr.msk.bf16.mxu0 %vm2319_vm1, %v2318_v15  ;;  %v847_v22 = vpack.c.bf16 %v839_v49, %v839_v49 }
 0x653   :  { %1817 = vmatprep.mubr.msk.bf16.mxu1 %vm2319_vm1, %v2318_v15  ;;  %1821 = vmatprep.subr.bf16.mxu0 %v2318_v15  ;;  %v846_v23 = vpack.c.bf16 %v838_v20, %v838_v20 }
 0x654   :  { %v824_v19 = vpop.xlane.xlu1 %823  ;;  %1827 = vmatprep.subr.bf16.mxu1 %v2318_v15 }
 0x655   :  { %1938 = vrcp.f32 %v824_v19 }
 0x658   :  { %1818 = vmatmul.mubr.msk.bf16.vlgmr.msra.gmra.mrb[24].mxu1 %vm358_vm2, %v847_v22  ;;  %v1187_v24 = vpop.permute.xlu1 %1186 }
 0x659   :  { %1812 = vmatmul.mubr.msk.bf16.vlgmr.msra.gmra.mrb[32].mxu0 %vm358_vm2, %v846_v23  ;;  %v1192_v25 = vsel %vm854_vm3, %v1187_v24, 0  ;;  %1831 = vmatprep.mubr.msk.bf16.mxu1 %vm2319_vm1, %v2318_v15  ;;  %v1649_v23 = vld [vmem:[#allocation13] ss:$0 sm:$0xff] }
 0x65a   :  { %1822 = vmatpush3.bf16.msra.mxu0 %v1192_v25  ;;  %1823 = vmatprep.mubr.msk.bf16.mxu0 %vm2319_vm1, %v2318_v15 }
 0x65b   :  { %1835 = vmatprep.subr.bf16.mxu0 %v2318_v15  ;;  %1828 = vmatpush3.bf16.msra.mxu1 %v1892_v57 }
 0x65c   :  { %1829 = vmatprep.subr.bf16.mxu1 %v2318_v15 }
 0x65f   :  { %v1939_v26 = vpop.eup %1938  ;;  %1830 = vmatpush3.bf16.msra.mxu1 %v1893_v3 }
 0x660   :  { %v840_v27 = vmul.f32 %v1939_v26, %v2776_v55  ;;  %1843 = vmatprep.subr.bf16.mxu1 %v2318_v15 }
 0x662   :  { %v848_v28 = vpack.c.bf16 %v840_v27, %v840_v27 }
 0x664   :  { %1824 = vmatmul.mubr.msk.bf16.vlgmr.msra.gmra.mrb[36].mxu0 %vm358_vm2, %v848_v28 }
 0x665   :  { %1839 = vmatprep.mubr.msk.bf16.mxu0 %vm2319_vm1, %v2318_v15 }
 0x695   :  { %v2822_v29 = vpop.f32.mrb[12].mxu1 }
 0x696   :  { %v1783_v30 = vpop.f32.mrb[13].mxu1  ;;  %v1234_v13 = vpack.c.bf16 %v2822_v29, %v2822_v29 }
 0x697   :  { %v895_v32 = vpop.f32.mrb[14].mxu1 }
 0x698   :  { %v1784_v33 = vpop.f32.mrb[15].mxu1 }
 0x6ee   :  { %v988_v54 = vpop.f32.mrb[16].mxu1 }
 0x6ef   :  { %v940_v34 = vpop.f32.mrb[24].mxu0  ;;  %v1795_v42 = vpop.f32.mrb[17].mxu1  ;;  %v1236_v41 = vpack.c.bf16 %v988_v54, %v988_v54 }
 0x6f0   :  { %v1235_v35 = vpack.c.bf16 %v940_v34, %v940_v34  ;;  %v1789_v31 = vpop.f32.mrb[25].mxu0  ;;  %v991_v36 = vpop.f32.mrb[18].mxu1 }
 0x6f1   :  { %v943_v37 = vpop.f32.mrb[26].mxu0  ;;  %v1796_v38 = vpop.f32.mrb[19].mxu1 }
 0x6f2   :  { %1244 = vrot.lane.b32.xlu0 %v1235_v35, %s2310_s30  ;;  %v1790_v40 = vpop.f32.mrb[27].mxu0 }
 0x6f6   :  { %1250 = vrot.lane.b32.xlu0 %v1236_v41, %s2324_s1  ;;  %v1894_v41 = vld [vmem:[#allocation17] sm:$0xff]  }
 0x6f7   :  { %1836 = vmatpush3.bf16.msra.mxu0 %v1894_v41 }
 0x6f8   :  { %1837 = vmatprep.subr.bf16.mxu0 %v2318_v15 }
 0x723   :  { %v1084_v43 = vpop.f32.mrb[20].mxu1 }
 0x724   :  { %v1036_v44 = vpop.f32.mrb[28].mxu0  ;;  %v1807_v47 = vpop.f32.mrb[21].mxu1  ;;  %v1238_v9 = vpack.c.bf16 %v1084_v43, %v1084_v43  ;;  %v1895_v43 = vld [vmem:[#allocation17 + $0x8] sm:$0xff]  }
 0x725   :  { %v1237_v48 = vpack.c.bf16 %v1036_v44, %v1036_v44  ;;  %v1801_v50 = vpop.f32.mrb[29].mxu0  ;;  %v1087_v51 = vpop.f32.mrb[22].mxu1  ;;  %1838 = vmatpush3.bf16.msra.mxu0 %v1895_v43 }
 0x726   :  { %v1039_v53 = vpop.f32.mrb[30].mxu0  ;;  %v1808_v55 = vpop.f32.mrb[23].mxu1 }
 0x727   :  { %1256 = vrot.lane.b32.xlu0 %v1237_v48, %s2325_s3  ;;  %v1802_v58 = vpop.f32.mrb[31].mxu0 }
 0x728   :  { %v1654_v58 = vld [vmem:[#allocation14] ss:$0 sm:$0xff] }
 0x72b   :  { %v1180_v59 = vpop.f32.mrb[24].mxu1 }
 0x72c   :  { %v1132_v60 = vpop.f32.mrb[32].mxu0  ;;  %v1819_v61 = vpop.f32.mrb[25].mxu1  ;;  %v1240_v52 = vpack.c.bf16 %v1180_v59, %v1180_v59 }
 0x72d   :  { %v1239_v62 = vpack.c.bf16 %v1132_v60, %v1132_v60  ;;  %v1813_v63 = vpop.f32.mrb[33].mxu0  ;;  %v1183_v2 = vpop.f32.mrb[26].mxu1 }
 0x72e   :  { %v1135_v4 = vpop.f32.mrb[34].mxu0  ;;  %v1820_v5 = vpop.f32.mrb[27].mxu1 }
 0x72f   :  { %1246 = vrot.lane.b32.xlu1 %v1239_v62, %s2310_s30  ;;  %v1814_v6 = vpop.f32.mrb[35].mxu0  ;;  %v1655_v62 = vld [vmem:[#allocation16] ss:$0 sm:$0xff]  ;;  %v1896_v5 = vld [vmem:[#allocation20] sm:$0xff]  }
 0x730   :  { %v1897_v6 = vld [vmem:[#allocation20 + $0x8] sm:$0xff]  }
 0x733   :  { %1252 = vrot.lane.b32.xlu1 %v1240_v52, %s2324_s1  ;;  %v1898_v52 = vld [vmem:[#allocation20 + $0x10] sm:$0xff]  }
 0x737   :  { %v1228_v56 = vpop.f32.mrb[36].mxu0 }
 0x738   :  { %v1241_v7 = vpack.c.bf16 %v1228_v56, %v1228_v56  ;;  %v1825_v8 = vpop.f32.mrb[37].mxu0  ;;  %v1899_v56 = vld [vmem:[#allocation20 + $0x18] sm:$0xff]  }
 0x739   :  { %v1231_v46 = vpop.f32.mrb[38].mxu0  ;;  %v1901_v8 = vld [vmem:[#allocation20 + $0x28] sm:$0xff]  }
 0x73a   :  { %1258 = vrot.lane.b32.xlu1 %v1241_v7, %s2325_s3  ;;  %v1826_v39 = vpop.f32.mrb[39].mxu0  ;;  %v1900_v7 = vld [vmem:[#allocation20 + $0x20] sm:$0xff]   ;;  %v1902_v46 = vld [vmem:[#allocation20 + $0x30] sm:$0xff]  }
 0x73b   :  { %v1903_v39 = vld [vmem:[#allocation20 + $0x38] sm:$0xff]  }
 0x764   :  { %v1245_v45 = vpop.permute.xlu0 %1244 }
 0x765   :  { %v1262_v16 = vsel %vm358_vm2, %v1234_v13, %v1245_v45  ;;  %v1656_v45 = vld [vmem:[#allocation19] ss:$0 sm:$0xff] }
 0x768   :  { %v1251_v11 = vpop.permute.xlu0 %1250 }
 0x769   :  { %v1268_v18 = vsel %vm1266_vm4, %v1262_v16, %v1251_v11 }
 0x799   :  { %v1257_v14 = vpop.permute.xlu0 %1256 }
 0x79a   :  { %v1273_v20 = vsel %vm1271_vm5, %v1268_v18, %v1257_v14 }
 0x7a1   :  { %v1247_v10 = vpop.permute.xlu1 %1246 }
 0x7a2   :  { %v1265_v17 = vsel %vm358_vm2, %v1238_v9, %v1247_v10 }
 0x7a5   :  { %v1253_v12 = vpop.permute.xlu1 %1252 }
 0x7a6   :  { %v1270_v21 = vsel %vm1266_vm4, %v1265_v17, %v1253_v12 }
 0x7ac   :  { %v1259_v49 = vpop.permute.xlu1 %1258 }
 0x7ad   :  { %v1275_v19 = vsel %vm1271_vm5, %v1270_v21, %v1259_v49 }
 0x7ae   :  { %v1650_v22 = vcombine.low %v1273_v20, %v1275_v19 }
 0x7b0   :  { %1832 = vmatmul.mubr.msk.bf16.vlgmr.msra.gmra.mrb[28].mxu1 %vm225_vm0, %v1650_v22 }
 0x7b1   :  { %1859 = vmatprep.mubr.msk.bf16.mxu1 %vm2319_vm1, %v2318_v15  ;;  %1844 = vmatpush3.bf16.msra.mxu1 %v1896_v5 }
 0x7b2   :  { %1845 = vmatprep.subr.bf16.mxu1 %v2318_v15 }
 0x7b5   :  { %1846 = vmatpush3.bf16.msra.mxu1 %v1897_v6 }
 0x7b6   :  { %1847 = vmatprep.subr.bf16.mxu1 %v2318_v15 }
 0x7b9   :  { %1848 = vmatpush3.bf16.msra.mxu1 %v1898_v52 }
 0x7ba   :  { %1849 = vmatprep.subr.bf16.mxu1 %v2318_v15 }
 0x7bd   :  { %1850 = vmatpush3.bf16.msra.mxu1 %v1899_v56 }
 0x7be   :  { %1851 = vmatprep.subr.bf16.mxu1 %v2318_v15 }
 0x7c1   :  { %1852 = vmatpush3.bf16.msra.mxu1 %v1900_v7 }
 0x7c2   :  { %1853 = vmatprep.subr.bf16.mxu1 %v2318_v15 }
 0x7c5   :  { %1854 = vmatpush3.bf16.msra.mxu1 %v1901_v8 }
 0x7c6   :  { %1855 = vmatprep.subr.bf16.mxu1 %v2318_v15 }
 0x7c9   :  { %1856 = vmatpush3.bf16.msra.mxu1 %v1902_v46 }
 0x7ca   :  { %1857 = vmatprep.subr.bf16.mxu1 %v2318_v15 }
 0x7cd   :  { %1858 = vmatpush3.bf16.msra.mxu1 %v1903_v39 }
 0x883   :  { %v1341_v24 = vpop.f32.mrb[28].mxu1 }
 0x884   :  { %v1342_v25 = vadd.f32 %v1649_v23, %v1341_v24  ;;  %v1833_v26 = vpop.f32.mrb[29].mxu1 }
 0x885   :  { %v1344_v27 = vpop.f32.mrb[30].mxu1 }
 0x886   :  { %v2836_v28 = vadd.f32 %v1342_v25, %v2599_v0  ;;  %v1345_v29 = vadd.f32 %v1649_v23, %v1344_v27  ;;  %v1834_v30 = vpop.f32.mrb[31].mxu1  ;;  %v1662_v27 = vld [vmem:[#allocation22] ss:$0 sm:$0xff] }
 0x888   :  { %v2839_v32 = vadd.f32 %v1345_v29, %v2601_v1  ;;  %v1352_v33 = vsel %vm225_vm0, %v2836_v28, 0.0 }
 0x889   :  { %1353 = vadd.xlane.f32.xlu0 %v1352_v33 }
 0x88a   :  { %v1355_v54 = vsel %vm225_vm0, %v2839_v32, 0.0 }
 0x88b   :  { %1356 = vadd.xlane.f32.xlu1 %v1355_v54 }
 0x916   :  { %v1354_v34 = vpop.xlane.xlu0 %1353 }
 0x917   :  { %v1358_v42 = vmul.f32 0.03125, %v1354_v34 }
 0x918   :  { %v1357_v35 = vpop.xlane.xlu1 %1356 }
 0x919   :  { %v1360_v31 = vsub.f32 %v2836_v28, %v1358_v42  ;;  %v1359_v0 = vmul.f32 0.03125, %v1357_v35 }
 0x91b   :  { %v1361_v36 = vsub.f32 %v2839_v32, %v1359_v0  ;;  %v1362_v37 = vmul.f32 %v1360_v31, %v1360_v31 }
 0x91d   :  { %v1364_v1 = vsel %vm225_vm0, %v1362_v37, 0.0  ;;  %v1363_v38 = vmul.f32 %v1361_v36, %v1361_v36 }
 0x91e   :  { %1365 = vadd.xlane.f32.xlu0 %v1364_v1 }
 0x91f   :  { %v1367_v40 = vsel %vm225_vm0, %v1363_v38, 0.0 }
 0x922   :  { %1368 = vadd.xlane.f32.xlu0 %v1367_v40 }
 0x9ab   :  { %v1366_v44 = vpop.xlane.xlu0 %1365 }
 0x9ac   :  { %v1370_v47 = vmul.f32 0.03125, %v1366_v44 }
 0x9ae   :  { %v1372_v48 = vadd.f32 1e-05, %v1370_v47 }
 0x9af   :  { %v1369_v50 = vpop.xlane.xlu0 %1368 }
 0x9b0   :  { %1940 = vrsqrt.f32 %v1372_v48  ;;  %v1371_v51 = vmul.f32 0.03125, %v1369_v50 }
 0x9b2   :  { %v1373_v53 = vadd.f32 1e-05, %v1371_v51 }
 0x9b4   :  { %1942 = vrsqrt.f32 %v1373_v53 }
 0x9ba   :  { %v1941_v55 = vpop.eup %1940 }
 0x9bb   :  { %v1376_v57 = vmul.f32 %v1941_v55, %v1360_v31 }
 0x9bd   :  { %v1384_v60 = vmul.f32 %v1654_v58, %v1376_v57 }
 0x9be   :  { %v1943_v59 = vpop.eup %1942 }
 0x9bf   :  { %v1377_v61 = vmul.f32 %v1943_v59, %v1361_v36  ;;  %v1392_v2 = vadd.f32 %v1655_v62, %v1384_v60 }
 0x9c1   :  { %v1385_v63 = vmul.f32 %v1654_v58, %v1377_v61 }
 0x9c3   :  { %v1393_v3 = vadd.f32 %v1655_v62, %v1385_v63 }
 0x9c5   :  { %v1394_v4 = vpack.c.bf16 %v1393_v3, %v1392_v2 }
 0x9c7   :  { %1840 = vmatmul.mubr.msk.bf16.vlgmr.msra.gmra.mrb[40].mxu0 %vm225_vm0, %v1394_v4 }
 0xa9a   :  { %v1455_v10 = vpop.f32.mrb[40].mxu0 }
 0xa9b   :  { %v1456_v11 = vadd.f32 %v1656_v45, %v1455_v10  ;;  %v1841_v12 = vpop.f32.mrb[41].mxu0 }
 0xa9c   :  { %v1458_v13 = vpop.f32.mrb[42].mxu0 }
 0xa9d   :  { %v1660_v9 = vmul.f32 -1.702, %v1456_v11  ;;  %v1459_v14 = vadd.f32 %v1656_v45, %v1458_v13  ;;  %v1842_v16 = vpop.f32.mrb[43].mxu0 }
 0xa9f   :  { %v1466_v17 = vmul.f32 1.442695, %v1660_v9  ;;  %v1661_v18 = vmul.f32 -1.702, %v1459_v14 }
 0xaa1   :  { %1944 = vpow2.f32 %v1466_v17  ;;  %v1468_v21 = vmul.f32 1.442695, %v1661_v18 }
 0xaa3   :  { %1946 = vpow2.f32 %v1468_v21 }
 0xaab   :  { %v1945_v49 = vpop.eup %1944 }
 0xaac   :  { %v1470_v20 = vadd.f32 1.0, %v1945_v49 }
 0xaad   :  { %v1947_v19 = vpop.eup %1946 }
 0xaae   :  { %1948 = vrcp.f32 %v1470_v20  ;;  %v1471_v15 = vadd.f32 1.0, %v1947_v19 }
 0xab0   :  { %1950 = vrcp.f32 %v1471_v15 }
 0xab8   :  { %v1949_v22 = vpop.eup %1948 }
 0xab9   :  { %v1476_v24 = vmul.f32 %v1949_v22, %v1456_v11 }
 0xaba   :  { %v1951_v23 = vpop.eup %1950 }
 0xabb   :  { %v1477_v25 = vmul.f32 %v1951_v23, %v1459_v14 }
 0xabd   :  { %v1478_v26 = vpack.c.bf16 %v1477_v25, %v1476_v24 }
 0xabf   :  { %1860 = vmatmul.mubr.bf16.vlgmr.msra.gmra.mrb[32].mxu1 %v1478_v26 }
 0xb92   :  { %v1584_v29 = vpop.f32.mrb[32].mxu1 }
 0xb93   :  { %v1585_v30 = vadd.f32 %v1662_v27, %v1584_v29  ;;  %v1861_v33 = vpop.f32.mrb[33].mxu1 }
 0xb94   :  { %v1587_v54 = vpop.f32.mrb[34].mxu1 }
 0xb95   :  { %v1591_v34 = vadd.f32 %v1585_v30, %v2836_v28  ;;  %v1588_v42 = vadd.f32 %v1662_v27, %v1587_v54  ;;  %v1862_v35 = vpop.f32.mrb[35].mxu1 }
 0xb97   :  { %1593 = vst.msk [vmem:[#allocation25] sm:$0xff] %vm225_vm0, %v1591_v34  ;;  %v1592_v31 = vadd.f32 %v1588_v42, %v2839_v32 }
 0xb99   :  { %1594 = vst.msk [vmem:[#allocation25 + $0x8] sm:$0xff] %vm225_vm0, %v1592_v31 }
 0xb9a   :  { %2271 = shalt.err (!%p2268_p4)
}
 0xb9b   :  { %s2272_s26 = scalar_lea.hbm %s2891_s14, 256 }
 0xb9c   :  { %p2273_p5 = scmp.ne.s32.totalorder %s2891_s14, %s2272_s26  ;;  %p2276_p6 = scmp.lt.u32.totalorder %s2272_s26, %s2891_s14 }
 0xb9e   :  { %p2278_p7 = pnand %p2276_p6, %p2273_p5 }
 0xba0   :  { %2281 = shalt.err (!%p2278_p7)
}
 0xba1   :  { %1606 = dma.vmem_to_hbm [thread:$0]  %s1601_s9, 256, %s2891_s14, [#allocation4], %s2309_s11, %s2309_s11, %s2310_s30  }
 0xba2   :  { %2298 = dma.done.wait [#allocation4], 256  }
 0xba3   :  { %2299 = vsyncadd [#allocation4], 4294967040 }
 0xba4   :  { %1610 = vsyncpa [#allocation3], 1 }
 0xba5   :  { %1611 = vsyncpa [#allocation6], 1 }
 0xba6   :  { %1612 = vsyncpa [#allocation9], 1 }
 0xba7   :  { %1613 = vsyncpa [#allocation12], 1 }
 0xba8   :  { %1614 = vsyncpa [#allocation15], 1 }
 0xba9   :  { %1615 = vsyncpa [#allocation18], 1 }
 0xbaa   :  { %1616 = vsyncpa [#allocation21], 1 }
 0xbab   :  { %1617 = vsyncpa [#allocation24], 1 }
 0xbac   :  { %1618 = vsyncpa [#allocation4], 1 }

// kernel: tpu_custom_call.1
= control target key start
LH: loop header
LB: loop body
LE: loop exit
PB: predicated region body
PF: predicated region fallthrough
CT: control target
= control target key end

     0   :  { %19 = vsyncpa [#allocation3], 0  ;;  %s2877_s0 = inlined_call_operand.hbm [shape: f32[2,8,32], index: 0, kind: input, shape index: {}]   ;;  %s2878_s1 = inlined_call_operand.hbm [shape: f32[1,32], index: 1, kind: input, shape index: {}]   ;;  %s2879_s2 = inlined_call_operand.hbm [shape: f32[1,32], index: 2, kind: input, shape index: {}]   ;;  %s2880_s3 = inlined_call_operand.hbm [shape: bf16[32,96], index: 3, kind: input, shape index: {}]   ;;  %s2881_s4 = inlined_call_operand.hbm [shape: f32[1,96], index: 4, kind: input, shape index: {}]   ;;  %s2882_s5 = inlined_call_operand.hbm [shape: bf16[32,32], index: 5, kind: input, shape index: {}]   ;;  %s2883_s6 = inlined_call_operand.hbm [shape: f32[1,32], index: 6, kind: input, shape index: {}]   ;;  %s2884_s7 = inlined_call_operand.hbm [shape: f32[1,32], index: 7, kind: input, shape index: {}]   ;;  %s2885_s8 = inlined_call_operand.hbm [shape: f32[1,32], index: 8, kind: input, shape index: {}]   ;;  %s2886_s9 = inlined_call_operand.hbm [shape: bf16[32,128], index: 9, kind: input, shape index: {}]   ;;  %s2887_s10 = inlined_call_operand.hbm [shape: f32[1,128], index: 10, kind: input, shape index: {}]   ;;  %s2888_s11 = inlined_call_operand.hbm [shape: bf16[128,32], index: 11, kind: input, shape index: {}]   ;;  %s2889_s12 = inlined_call_operand.hbm [shape: f32[1,32], index: 12, kind: input, shape index: {}]   ;;  %s2890_s13 = inlined_call_operand.hbm [shape: f32[8,8], index: 13, kind: input, shape index: {}]   ;;  %s2891_s14 = inlined_call_operand.hbm [shape: f32[2,8,32], index: 14, kind: output, shape index: {}]  }
   0x1   :  { %20 = vsyncpa [#allocation6], 0 }
   0x2   :  { %21 = vsyncpa [#allocation9], 0 }
   0x3   :  { %22 = vsyncpa [#allocation12], 0 }
   0x4   :  { %23 = vsyncpa [#allocation15], 0 }
   0x5   :  { %24 = vsyncpa [#allocation18], 0 }
   0x6   :  { %25 = vsyncpa [#allocation21], 0 }
   0x7   :  { %26 = vsyncpa [#allocation24], 0 }
   0x8   :  { %27 = vsyncpa [#allocation4], 0  ;;  %s2300_s29 = smov [#allocation5]   ;;  %s2301_s15 = smov [#allocation8]  }
   0x9   :  { %s46_s30 = sshll.u32 %s2300_s29, 4  ;;  %s65_s16 = sshll.u32 %s2301_s15, 4  ;;  %s47_s30 = int_to_ptr.vmem [resolvable:$true] %s46_s30  ;;  %s2402_s16 = int_to_ptr.vmem [resolvable:$true] %s65_s16 }
   0xa   :  { %s1952_s19 = scalar_lea.hbm %s2878_s1, 16 }
   0xb   :  { %p1953_p0 = scmp.ne.s32.totalorder %s2878_s1, %s1952_s19  ;;  %p1956_p1 = scmp.lt.u32.totalorder %s1952_s19, %s2878_s1 }
   0xd   :  { %p1958_p2 = pnand %p1956_p1, %p1953_p0 }
   0xf   :  { %1961 = shalt.err (!%p1958_p2)
}
  0x10   :  { %s1962_s24 = scalar_lea.vmem %s47_s30, 16  ;;  %s1966_s25 = scalar_lea.vmem %s47_s30, 32 }
  0x11   :  { %p1963_p3 = scmp.ne.s32.totalorder %s47_s30, %s1962_s24  ;;  %p1967_p4 = scmp.lt.s32.totalorder %s47_s30, %s47_s30 }
  0x12   :  { %p1968_p5 = scmp.lt.s32.totalorder %s1966_s25, %s1962_s24 }
  0x14   :  { %p1969_p6 = por %p1968_p5, %p1967_p4 }
  0x16   :  { %p1970_p7 = pnand %p1969_p6, %p1963_p3 }
  0x18   :  { %1973 = shalt.err (!%p1970_p7)
}
  0x19   :  { %49 = dma.hbm_to_vmem [thread:$0]  %s2878_s1, 16, %s47_s30, [#allocation6]  }
  0x1a   :  { %s1974_s15 = scalar_lea.hbm %s2880_s3, 256 }
  0x1b   :  { %p1975_p8 = scmp.ne.s32.totalorder %s2880_s3, %s1974_s15  ;;  %p1978_p9 = scmp.lt.u32.totalorder %s1974_s15, %s2880_s3 }
  0x1d   :  { %p1980_p10 = pnand %p1978_p9, %p1975_p8 }
  0x1f   :  { %1983 = shalt.err (!%p1980_p10)
}
  0x20   :  { %s1984_s21 = scalar_lea.vmem %s2402_s16, 256  ;;  %p1989_p12 = scmp.lt.s32.totalorder %s2402_s16, %s2402_s16 }
  0x21   :  { %p1985_p11 = scmp.ne.s32.totalorder %s2402_s16, %s1984_s21  ;;  %p1990_p13 = scmp.lt.s32.totalorder %s1984_s21, %s1984_s21 }
  0x23   :  { %p1991_p0 = por %p1990_p13, %p1989_p12 }
  0x25   :  { %p1992_p1 = pnand %p1991_p0, %p1985_p11 }
  0x27   :  { %1995 = shalt.err (!%p1992_p1)
}
  0x28   :  { %s2302_s1 = smov 64   ;;  %s2303_s30 = smov 4  }
  0x29   :  { %71 = dma.hbm_to_vmem [thread:$0]  %s2880_s3, 256, %s2402_s16, [#allocation9], %s2302_s1, %s2302_s1, %s2303_s30  }
  0x2a   :  { %s2304_s24 = smov [#allocation11]   ;;  %s2305_s26 = smov [#allocation14]  }
  0x2b   :  { %s87_s25 = sshll.u32 %s2304_s24, 4  ;;  %s110_s27 = sshll.u32 %s2305_s26, 4  ;;  %s88_s25 = int_to_ptr.vmem [resolvable:$true] %s87_s25  ;;  %s111_s27 = int_to_ptr.vmem [resolvable:$true] %s110_s27 }
  0x2c   :  { %s1996_s15 = scalar_lea.hbm %s2882_s5, 256 }
  0x2d   :  { %p1997_p2 = scmp.ne.s32.totalorder %s2882_s5, %s1996_s15  ;;  %p2000_p3 = scmp.lt.u32.totalorder %s1996_s15, %s2882_s5 }
  0x2f   :  { %p2002_p4 = pnand %p2000_p3, %p1997_p2 }
  0x31   :  { %2005 = shalt.err (!%p2002_p4)
}
  0x32   :  { %s2006_s3 = scalar_lea.vmem %s88_s25, 256  ;;  %p2011_p6 = scmp.lt.s32.totalorder %s88_s25, %s88_s25 }
  0x33   :  { %p2007_p5 = scmp.ne.s32.totalorder %s88_s25, %s2006_s3  ;;  %p2012_p7 = scmp.lt.s32.totalorder %s2006_s3, %s2006_s3 }
  0x35   :  { %p2013_p8 = por %p2012_p7, %p2011_p6 }
  0x37   :  { %p2014_p9 = pnand %p2013_p8, %p2007_p5 }
  0x39   :  { %2017 = shalt.err (!%p2014_p9)
}
  0x3a   :  { %93 = dma.hbm_to_vmem [thread:$0]  %s2882_s5, 256, %s88_s25, [#allocation12], %s2302_s1, %s2302_s1, %s2303_s30  }
  0x3b   :  { %s2018_s24 = scalar_lea.hbm %s2884_s7, 16 }
  0x3c   :  { %p2019_p10 = scmp.ne.s32.totalorder %s2884_s7, %s2018_s24  ;;  %p2022_p11 = scmp.lt.u32.totalorder %s2018_s24, %s2884_s7 }
  0x3e   :  { %p2024_p12 = pnand %p2022_p11, %p2019_p10 }
  0x40   :  { %2027 = shalt.err (!%p2024_p12)
}
  0x41   :  { %s2028_s17 = scalar_lea.vmem %s111_s27, 16  ;;  %s2032_s18 = scalar_lea.vmem %s111_s27, 32 }
  0x42   :  { %p2029_p13 = scmp.ne.s32.totalorder %s111_s27, %s2028_s17  ;;  %p2033_p0 = scmp.lt.s32.totalorder %s111_s27, %s111_s27 }
  0x43   :  { %p2034_p1 = scmp.lt.s32.totalorder %s2032_s18, %s2028_s17 }
  0x45   :  { %p2035_p2 = por %p2034_p1, %p2033_p0 }
  0x47   :  { %p2036_p3 = pnand %p2035_p2, %p2029_p13 }
  0x49   :  { %2039 = shalt.err (!%p2036_p3)
}
  0x4a   :  { %113 = dma.hbm_to_vmem [thread:$0]  %s2884_s7, 16, %s111_s27, [#allocation15]  }
  0x4b   :  { %s2306_s19 = smov [#allocation17]   ;;  %s2307_s3 = smov [#allocation20]  }
  0x4c   :  { %s129_s20 = sshll.u32 %s2306_s19, 4  ;;  %s151_s16 = sshll.u32 %s2307_s3, 4  ;;  %s130_s20 = int_to_ptr.vmem [resolvable:$true] %s129_s20  ;;  %s2463_s16 = int_to_ptr.vmem [resolvable:$true] %s151_s16 }
  0x4d   :  { %s2040_s23 = scalar_lea.hbm %s2886_s9, 256 }
  0x4e   :  { %p2041_p4 = scmp.ne.s32.totalorder %s2886_s9, %s2040_s23  ;;  %p2044_p5 = scmp.lt.u32.totalorder %s2040_s23, %s2886_s9 }
  0x50   :  { %p2046_p6 = pnand %p2044_p5, %p2041_p4 }
  0x52   :  { %2049 = shalt.err (!%p2046_p6)
}
  0x53   :  { %s2050_s7 = scalar_lea.vmem %s130_s20, 256  ;;  %p2055_p8 = scmp.lt.s32.totalorder %s130_s20, %s130_s20 }
  0x54   :  { %p2051_p7 = scmp.ne.s32.totalorder %s130_s20, %s2050_s7  ;;  %p2056_p9 = scmp.lt.s32.totalorder %s2050_s7, %s2050_s7 }
  0x56   :  { %p2057_p10 = por %p2056_p9, %p2055_p8 }
  0x58   :  { %p2058_p11 = pnand %p2057_p10, %p2051_p7 }
  0x5a   :  { %2061 = shalt.err (!%p2058_p11)
}
  0x5b   :  { %135 = dma.hbm_to_vmem [thread:$0]  %s2886_s9, 256, %s130_s20, [#allocation18], %s2302_s1, %s2302_s1, %s2303_s30  }
  0x5c   :  { %s2062_s5 = scalar_lea.hbm %s2888_s11, 1024 }
  0x5d   :  { %p2063_p12 = scmp.ne.s32.totalorder %s2888_s11, %s2062_s5  ;;  %p2066_p13 = scmp.lt.u32.totalorder %s2062_s5, %s2888_s11 }
  0x5f   :  { %p2068_p0 = pnand %p2066_p13, %p2063_p12 }
  0x61   :  { %2071 = shalt.err (!%p2068_p0)
}
  0x62   :  { %s2072_s22 = scalar_lea.vmem %s2463_s16, 1024  ;;  %p2077_p2 = scmp.lt.s32.totalorder %s2463_s16, %s2463_s16 }
  0x63   :  { %p2073_p1 = scmp.ne.s32.totalorder %s2463_s16, %s2072_s22  ;;  %p2078_p3 = scmp.lt.s32.totalorder %s2072_s22, %s2072_s22 }
  0x65   :  { %p2079_p4 = por %p2078_p3, %p2077_p2 }
  0x67   :  { %p2080_p5 = pnand %p2079_p4, %p2073_p1 }
  0x69   :  { %2083 = shalt.err (!%p2080_p5)
}
  0x6a   :  { %157 = dma.hbm_to_vmem [thread:$0]  %s2888_s11, 1024, %s2463_s16, [#allocation21], %s2302_s1, %s2302_s1, %s2303_s30  }
  0x6b   :  { %s2308_s23 = smov [#allocation2]   ;;  %s2084_s29 = scalar_lea.hbm %s2877_s0, 256 }
  0x6c   :  { %s33_s24 = sshll.u32 %s2308_s23, 4  ;;  %p2085_p6 = scmp.ne.s32.totalorder %s2877_s0, %s2084_s29  ;;  %s34_s24 = int_to_ptr.vmem [resolvable:$true] %s33_s24 }
  0x6d   :  { %p2088_p7 = scmp.lt.u32.totalorder %s2084_s29, %s2877_s0 }
  0x6f   :  { %p2090_p8 = pnand %p2088_p7, %p2085_p6 }
  0x71   :  { %2093 = shalt.err (!%p2090_p8)
}
  0x72   :  { %s2094_s18 = scalar_lea.vmem %s34_s24, 256  ;;  %p2099_p10 = scmp.lt.s32.totalorder %s34_s24, %s34_s24 }
  0x73   :  { %p2095_p9 = scmp.ne.s32.totalorder %s34_s24, %s2094_s18  ;;  %p2100_p11 = scmp.lt.s32.totalorder %s2094_s18, %s2094_s18 }
  0x75   :  { %p2101_p12 = por %p2100_p11, %p2099_p10 }
  0x77   :  { %p2102_p13 = pnand %p2101_p12, %p2095_p9 }
  0x79   :  { %2105 = shalt.err (!%p2102_p13)
}
  0x7a   :  { %s2309_s11 = smov 128   ;;  %s2310_s30 = smov 8  }
  0x7b   :  { %39 = dma.hbm_to_vmem [thread:$0]  %s2877_s0, 256, %s34_s24, [#allocation3], %s2309_s11, %s2309_s11, %s2310_s30  }
  0x7c   :  { %s2311_s25 = smov [#allocation7]   ;;  %s2312_s3 = smov [#allocation10]  }
  0x7d   :  { %s56_s19 = sshll.u32 %s2311_s25, 4  ;;  %s78_s21 = sshll.u32 %s2312_s3, 4  ;;  %s57_s19 = int_to_ptr.vmem [resolvable:$true] %s56_s19  ;;  %s79_s21 = int_to_ptr.vmem [resolvable:$true] %s78_s21 }
  0x7e   :  { %s2106_s20 = scalar_lea.hbm %s2879_s2, 16 }
  0x7f   :  { %p2107_p0 = scmp.ne.s32.totalorder %s2879_s2, %s2106_s20  ;;  %p2110_p1 = scmp.lt.u32.totalorder %s2106_s20, %s2879_s2 }
  0x81   :  { %p2112_p2 = pnand %p2110_p1, %p2107_p0 }
  0x83   :  { %2115 = shalt.err (!%p2112_p2)
}
  0x84   :  { %s2116_s0 = scalar_lea.vmem %s57_s19, 16  ;;  %s2120_s24 = scalar_lea.vmem %s57_s19, 32 }
  0x85   :  { %p2117_p3 = scmp.ne.s32.totalorder %s57_s19, %s2116_s0  ;;  %p2121_p4 = scmp.lt.s32.totalorder %s57_s19, %s57_s19 }
  0x86   :  { %p2122_p5 = scmp.lt.s32.totalorder %s2120_s24, %s2116_s0 }
  0x88   :  { %p2123_p6 = por %p2122_p5, %p2121_p4 }
  0x8a   :  { %p2124_p7 = pnand %p2123_p6, %p2117_p3 }
  0x8c   :  { %2127 = shalt.err (!%p2124_p7)
}
  0x8d   :  { %59 = dma.hbm_to_vmem [thread:$0]  %s2879_s2, 16, %s57_s19, [#allocation6]  }
  0x8e   :  { %s2128_s18 = scalar_lea.hbm %s2881_s4, 16 }
  0x8f   :  { %p2129_p8 = scmp.ne.s32.totalorder %s2881_s4, %s2128_s18  ;;  %p2132_p9 = scmp.lt.u32.totalorder %s2128_s18, %s2881_s4 }
  0x91   :  { %p2134_p10 = pnand %p2132_p9, %p2129_p8 }
  0x93   :  { %2137 = shalt.err (!%p2134_p10)
}
  0x94   :  { %s2138_s22 = scalar_lea.vmem %s79_s21, 16  ;;  %s2142_s9 = scalar_lea.vmem %s79_s21, 32 }
  0x95   :  { %p2139_p11 = scmp.ne.s32.totalorder %s79_s21, %s2138_s22  ;;  %p2143_p12 = scmp.lt.s32.totalorder %s79_s21, %s79_s21 }
  0x96   :  { %p2144_p13 = scmp.lt.s32.totalorder %s2142_s9, %s2138_s22 }
  0x98   :  { %p2145_p0 = por %p2144_p13, %p2143_p12 }
  0x9a   :  { %p2146_p1 = pnand %p2145_p0, %p2139_p11 }
  0x9c   :  { %2149 = shalt.err (!%p2146_p1)
}
  0x9d   :  { %81 = dma.hbm_to_vmem [thread:$0]  %s2881_s4, 16, %s79_s21, [#allocation9]  }
  0x9e   :  { %s2313_s20 = smov [#allocation13]   ;;  %s2314_s26 = smov [#allocation16]  }
  0x9f   :  { %s100_s23 = sshll.u32 %s2313_s20, 4  ;;  %s120_s28 = sshll.u32 %s2314_s26, 4  ;;  %s101_s23 = int_to_ptr.vmem [resolvable:$true] %s100_s23  ;;  %s121_s28 = int_to_ptr.vmem [resolvable:$true] %s120_s28 }
  0xa0   :  { %s2150_s24 = scalar_lea.hbm %s2883_s6, 16 }
  0xa1   :  { %p2151_p2 = scmp.ne.s32.totalorder %s2883_s6, %s2150_s24  ;;  %p2154_p3 = scmp.lt.u32.totalorder %s2150_s24, %s2883_s6 }
  0xa3   :  { %p2156_p4 = pnand %p2154_p3, %p2151_p2 }
  0xa5   :  { %2159 = shalt.err (!%p2156_p4)
}
  0xa6   :  { %s2160_s4 = scalar_lea.vmem %s101_s23, 16  ;;  %s2164_s21 = scalar_lea.vmem %s101_s23, 32 }
  0xa7   :  { %p2161_p5 = scmp.ne.s32.totalorder %s101_s23, %s2160_s4  ;;  %p2165_p6 = scmp.lt.s32.totalorder %s101_s23, %s101_s23 }
  0xa8   :  { %p2166_p7 = scmp.lt.s32.totalorder %s2164_s21, %s2160_s4 }
  0xaa   :  { %p2167_p8 = por %p2166_p7, %p2165_p6 }
  0xac   :  { %p2168_p9 = pnand %p2167_p8, %p2161_p5 }
  0xae   :  { %2171 = shalt.err (!%p2168_p9)
}
  0xaf   :  { %103 = dma.hbm_to_vmem [thread:$0]  %s2883_s6, 16, %s101_s23, [#allocation12]  }
  0xb0   :  { %s2172_s3 = scalar_lea.hbm %s2885_s8, 16 }
  0xb1   :  { %p2173_p10 = scmp.ne.s32.totalorder %s2885_s8, %s2172_s3  ;;  %p2176_p11 = scmp.lt.u32.totalorder %s2172_s3, %s2885_s8 }
  0xb3   :  { %p2178_p12 = pnand %p2176_p11, %p2173_p10 }
  0xb5   :  { %2181 = shalt.err (!%p2178_p12)
}
  0xb6   :  { %s2182_s20 = scalar_lea.vmem %s121_s28, 16  ;;  %s2186_s26 = scalar_lea.vmem %s121_s28, 32 }
  0xb7   :  { %p2183_p13 = scmp.ne.s32.totalorder %s121_s28, %s2182_s20  ;;  %p2187_p0 = scmp.lt.s32.totalorder %s121_s28, %s121_s28 }
  0xb8   :  { %p2188_p1 = scmp.lt.s32.totalorder %s2186_s26, %s2182_s20 }
  0xba   :  { %p2189_p2 = por %p2188_p1, %p2187_p0 }
  0xbc   :  { %p2190_p3 = pnand %p2189_p2, %p2183_p13 }
  0xbe   :  { %2193 = shalt.err (!%p2190_p3)
}
  0xbf   :  { %123 = dma.hbm_to_vmem [thread:$0]  %s2885_s8, 16, %s121_s28, [#allocation15]  }
  0xc0   :  { %s2315_s29 = smov [#allocation19]   ;;  %s2316_s24 = smov [#allocation22]  }
  0xc1   :  { %s142_s0 = sshll.u32 %s2315_s29, 4  ;;  %s164_s7 = sshll.u32 %s2316_s24, 4  ;;  %s143_s0 = int_to_ptr.vmem [resolvable:$true] %s142_s0  ;;  %s165_s7 = int_to_ptr.vmem [resolvable:$true] %s164_s7 }
  0xc2   :  { %s2194_s17 = scalar_lea.hbm %s2887_s10, 16 }
  0xc3   :  { %p2195_p4 = scmp.ne.s32.totalorder %s2887_s10, %s2194_s17  ;;  %p2198_p5 = scmp.lt.u32.totalorder %s2194_s17, %s2887_s10 }
  0xc5   :  { %p2200_p6 = pnand %p2198_p5, %p2195_p4 }
  0xc7   :  { %2203 = shalt.err (!%p2200_p6)
}
  0xc8   :  { %s2204_s8 = scalar_lea.vmem %s143_s0, 16  ;;  %s2208_s28 = scalar_lea.vmem %s143_s0, 32 }
  0xc9   :  { %p2205_p7 = scmp.ne.s32.totalorder %s143_s0, %s2204_s8  ;;  %p2209_p8 = scmp.lt.s32.totalorder %s143_s0, %s143_s0 }
  0xca   :  { %p2210_p9 = scmp.lt.s32.totalorder %s2208_s28, %s2204_s8 }
  0xcc   :  { %p2211_p10 = por %p2210_p9, %p2209_p8 }
  0xce   :  { %p2212_p11 = pnand %p2211_p10, %p2205_p7 }
  0xd0   :  { %2215 = shalt.err (!%p2212_p11)
}
  0xd1   :  { %145 = dma.hbm_to_vmem [thread:$0]  %s2887_s10, 16, %s143_s0, [#allocation18]  }
  0xd2   :  { %s2216_s9 = scalar_lea.hbm %s2889_s12, 16 }
  0xd3   :  { %p2217_p12 = scmp.ne.s32.totalorder %s2889_s12, %s2216_s9  ;;  %p2220_p13 = scmp.lt.u32.totalorder %s2216_s9, %s2889_s12 }
  0xd5   :  { %p2222_p0 = pnand %p2220_p13, %p2217_p12 }
  0xd7   :  { %2225 = shalt.err (!%p2222_p0)
}
  0xd8   :  { %s2226_s6 = scalar_lea.vmem %s165_s7, 16  ;;  %s2230_s23 = scalar_lea.vmem %s165_s7, 32 }
  0xd9   :  { %p2227_p1 = scmp.ne.s32.totalorder %s165_s7, %s2226_s6  ;;  %p2231_p2 = scmp.lt.s32.totalorder %s165_s7, %s165_s7 }
  0xda   :  { %p2232_p3 = scmp.lt.s32.totalorder %s2230_s23, %s2226_s6 }
  0xdc   :  { %p2233_p4 = por %p2232_p3, %p2231_p2 }
  0xde   :  { %p2234_p5 = pnand %p2233_p4, %p2227_p1 }
  0xe0   :  { %2237 = shalt.err (!%p2234_p5)
}
  0xe1   :  { %167 = dma.hbm_to_vmem [thread:$0]  %s2889_s12, 16, %s165_s7, [#allocation21]  }
  0xe2   :  { %s2317_s0 = smov [#allocation23]   ;;  %s2238_s17 = scalar_lea.hbm %s2890_s13, 128 }
  0xe3   :  { %s174_s24 = sshll.u32 %s2317_s0, 4  ;;  %p2239_p6 = scmp.ne.s32.totalorder %s2890_s13, %s2238_s17  ;;  %s175_s24 = int_to_ptr.vmem [resolvable:$true] %s174_s24 }
  0xe4   :  { %p2242_p7 = scmp.lt.u32.totalorder %s2238_s17, %s2890_s13 }
  0xe6   :  { %p2244_p8 = pnand %p2242_p7, %p2239_p6 }
  0xe8   :  { %2247 = shalt.err (!%p2244_p8)
}
  0xe9   :  { %s2248_s8 = scalar_lea.vmem %s175_s24, 128  ;;  %p2253_p10 = scmp.lt.s32.totalorder %s175_s24, %s175_s24 }
  0xea   :  { %p2249_p9 = scmp.ne.s32.totalorder %s175_s24, %s2248_s8  ;;  %p2254_p11 = scmp.lt.s32.totalorder %s2248_s8, %s2248_s8 }
  0xec   :  { %p2255_p12 = por %p2254_p11, %p2253_p10 }
  0xee   :  { %p2256_p13 = pnand %p2255_p12, %p2249_p9 }
  0xf0   :  { %2259 = shalt.err (!%p2256_p13)
}
  0xf1   :  { %177 = dma.hbm_to_vmem [thread:$0]  %s2890_s13, 128, %s175_s24, [#allocation24]  }
  0xf2   :  { %2282 = dma.done.wait [#allocation3], 256  }
  0xf3   :  { %2283 = vsyncadd [#allocation3], 4294967040 }
  0xf4   :  { %2284 = dma.done.wait [#allocation6], 32  }
  0xf5   :  { %2285 = vsyncadd [#allocation6], 4294967264 }
  0xf6   :  { %2286 = dma.done.wait [#allocation9], 272  }
  0xf7   :  { %2287 = vsyncadd [#allocation9], 4294967024 }
  0xf8   :  { %2288 = dma.done.wait [#allocation12], 272  }
  0xf9   :  { %2289 = vsyncadd [#allocation12], 4294967024 }
  0xfa   :  { %2290 = dma.done.wait [#allocation15], 32  }
  0xfb   :  { %2291 = vsyncadd [#allocation15], 4294967264 }
  0xfc   :  { %2292 = dma.done.wait [#allocation18], 272  }
  0xfd   :  { %2293 = vsyncadd [#allocation18], 4294967024 }
  0xfe   :  { %2294 = dma.done.wait [#allocation21], 1040  }
  0xff   :  { %2295 = vsyncadd [#allocation21], 4294966256 }
 0x100   :  { %2296 = dma.done.wait [#allocation24], 128  }
 0x101   :  { %2297 = vsyncadd [#allocation24], 4294967168  ;;  %vm225_vm0 = vcmask 261120   ;;  %v2599_v0 = vld [vmem:[#allocation2] sm:$0xff]  ;;  %v2601_v1 = vld [vmem:[#allocation2 + $0x8] sm:$0xff]  ;;  %v2318_v15 = vmov 0.0  }
 0x102   :  { %v226_v2 = vsel %vm225_vm0, %v2599_v0, 0.0  ;;  %v229_v3 = vsel %vm225_vm0, %v2601_v1, 0.0  ;;  %v1890_v14 = vld [vmem:[#allocation8] sm:$0xff]   ;;  %1723 = vmatprep.subr.bf16.mxu0 %v2318_v15  ;;  %1743 = vmatprep.subr.bf16.mxu1 %v2318_v15  ;;  %v1891_v16 = vld [vmem:[#allocation8 + $0x8] sm:$0xff]   ;;  %vm2319_vm1 = vmmov 0   ;;  %s2320_s13 = smov 112  }
 0x103   :  { %227 = vadd.xlane.f32.xlu0 %v226_v2  ;;  %1724 = vmatpush3.bf16.msra.mxu0 %v1890_v14  ;;  %v1619_v25 = vld [vmem:[#allocation5] ss:$0 sm:$0xff]  ;;  %v1620_v29 = vld [vmem:[#allocation7] ss:$0 sm:$0xff]  ;;  %v1621_v34 = vld [vmem:[#allocation10] ss:$0 sm:$0xff] }
 0x104   :  { %1727 = vmatprep.mubr.msk.bf16.mxu0 %vm2319_vm1, %v2318_v15  ;;  %1725 = vmatprep.subr.bf16.mxu0 %v2318_v15  ;;  %s2321_s28 = smov 120   ;;  %s2322_s5 = smov 104   ;;  %vm358_vm2 = vcmask 64512   ;;  %vm854_vm3 = vcmask 1043456   ;;  %vm1266_vm4 = vcmask 130048   ;;  %vm1271_vm5 = vcmask 195584  }
 0x105   :  { %1745 = vmatprep.mubr.msk.bf16.mxu1 %vm2319_vm1, %v2318_v15  ;;  %s2323_s25 = smov 96   ;;  %s2325_s3 = smov 24  }
 0x106   :  { %s2326_s22 = smov [#allocation25]  }
 0x107   :  { %230 = vadd.xlane.f32.xlu0 %v229_v3  ;;  %1726 = vmatpush3.bf16.msra.mxu0 %v1891_v16  ;;  %s1600_s9 = sshll.u32 %s2326_s22, 4  ;;  %s1601_s9 = int_to_ptr.vmem [resolvable:$true] %s1600_s9 }
 0x108   :  { %1731 = vmatprep.subr.bf16.mxu0 %v2318_v15  ;;  %s2260_s2 = scalar_lea.vmem %s1601_s9, 256  ;;  %p2265_p1 = scmp.lt.s32.totalorder %s1601_s9, %s1601_s9 }
 0x109   :  { %p2261_p0 = scmp.ne.s32.totalorder %s1601_s9, %s2260_s2  ;;  %p2266_p2 = scmp.lt.s32.totalorder %s2260_s2, %s2260_s2 }
 0x10b   :  { %p2267_p3 = por %p2266_p2, %p2265_p1 }
 0x10d   :  { %p2268_p4 = pnand %p2267_p3, %p2261_p0 }
 0x190   :  { %v228_v4 = vpop.xlane.xlu0 %227 }
 0x191   :  { %v233_v5 = vmul.f32 0.03125, %v228_v4 }
 0x193   :  { %v235_v6 = vsub.f32 %v2599_v0, %v233_v5 }
 0x194   :  { %v231_v7 = vpop.xlane.xlu0 %230 }
 0x195   :  { %v234_v8 = vmul.f32 0.03125, %v231_v7  ;;  %v237_v9 = vmul.f32 %v235_v6, %v235_v6 }
 0x197   :  { %v236_v10 = vsub.f32 %v2601_v1, %v234_v8  ;;  %v239_v11 = vsel %vm225_vm0, %v237_v9, 0.0  ;;  %v355_v9 = vld [vmem:[#allocation23] sm:$0xff] }
 0x198   :  { %240 = vadd.xlane.f32.xlu1 %v239_v11 }
 0x199   :  { %v238_v12 = vmul.f32 %v236_v10, %v236_v10 }
 0x19b   :  { %v242_v13 = vsel %vm225_vm0, %v238_v12, 0.0 }
 0x19c   :  { %243 = vadd.xlane.f32.xlu1 %v242_v13 }
 0x225   :  { %v241_v17 = vpop.xlane.xlu1 %240 }
 0x226   :  { %v245_v18 = vmul.f32 0.03125, %v241_v17 }
 0x228   :  { %v247_v19 = vadd.f32 1e-05, %v245_v18 }
 0x229   :  { %v244_v20 = vpop.xlane.xlu1 %243 }
 0x22a   :  { %1904 = vrsqrt.f32 %v247_v19  ;;  %v246_v21 = vmul.f32 0.03125, %v244_v20 }
 0x22c   :  { %v248_v22 = vadd.f32 1e-05, %v246_v21 }
 0x22e   :  { %1906 = vrsqrt.f32 %v248_v22 }
 0x234   :  { %v1905_v23 = vpop.eup %1904 }
 0x235   :  { %v251_v24 = vmul.f32 %v1905_v23, %v235_v6 }
 0x237   :  { %v259_v28 = vmul.f32 %v1619_v25, %v251_v24 }
 0x238   :  { %v1907_v26 = vpop.eup %1906 }
 0x239   :  { %v252_v27 = vmul.f32 %v1907_v26, %v236_v10  ;;  %v267_v31 = vadd.f32 %v1620_v29, %v259_v28 }
 0x23b   :  { %v260_v30 = vmul.f32 %v1619_v25, %v252_v27 }
 0x23d   :  { %v268_v32 = vadd.f32 %v1620_v29, %v260_v30 }
 0x23f   :  { %v269_v33 = vpack.c.bf16 %v268_v32, %v267_v31 }
 0x241   :  { %1728 = vmatmul.mubr.msk.bf16.vlgmr.msra.gmra.mrb[0].mxu0 %vm225_vm0, %v269_v33 }
 0x242   :  { %1733 = vmatprep.mubr.msk.bf16.mxu0 %vm2319_vm1, %v2318_v15 }
 0x314   :  { %v330_v35 = vpop.f32.mrb[0].mxu0 }
 0x315   :  { %v331_v36 = vadd.f32 %v1621_v34, %v330_v35  ;;  %v1729_v37 = vpop.f32.mrb[1].mxu0 }
 0x316   :  { %v333_v38 = vpop.f32.mrb[2].mxu0 }
 0x317   :  { %v2622_v39 = vpack.c.bf16 %v331_v36, %v331_v36  ;;  %v334_v40 = vadd.f32 %v1621_v34, %v333_v38  ;;  %v1730_v41 = vpop.f32.mrb[3].mxu0 }
 0x319   :  { %347 = vrot.lane.b32.xlu1 %v2622_v39, %s2320_s13  ;;  %343 = vrot.lane.b32.xlu0 %v2622_v39, %s2321_s28  ;;  %v2626_v42 = vpack.c.bf16 %v334_v40, %v334_v40 }
 0x31d   :  { %351 = vrot.lane.b32.xlu1 %v2622_v39, %s2322_s5  ;;  %349 = vrot.lane.b32.xlu0 %v2626_v42, %s2320_s13 }
 0x321   :  { %356 = vrot.lane.b32.xlu0 %v2622_v39, %s2323_s25  ;;  %345 = vrot.lane.b32.xlu1 %v2626_v42, %s2321_s28 }
 0x325   :  { %353 = vrot.lane.b32.xlu1 %v2626_v42, %s2322_s5 }
 0x38b   :  { %v348_v43 = vpop.permute.xlu1 %347  ;;  %v344_v44 = vpop.permute.xlu0 %343 }
 0x38c   :  { %v2633_v45 = vcombine.low %v348_v43, %v348_v43  ;;  %v2635_v46 = vcombine.low %v344_v44, %v344_v44 }
 0x38e   :  { %457 = vrot.lane.b32.xlu0 %v2633_v45, %s2323_s25  ;;  %407 = vrot.lane.b32.xlu1 %v2635_v46, %s2323_s25 }
 0x38f   :  { %v352_v47 = vpop.permute.xlu1 %351  ;;  %v350_v48 = vpop.permute.xlu0 %349 }
 0x390   :  { %v2639_v49 = vcombine.low %v352_v47, %v352_v47  ;;  %v2643_v52 = vcombine.low %v350_v48, %v350_v48 }
 0x392   :  { %555 = vrot.lane.b32.xlu0 %v2626_v42, %s2323_s25  ;;  %507 = vrot.lane.b32.xlu1 %v2639_v49, %s2323_s25 }
 0x393   :  { %v357_v50 = vpop.permute.xlu0 %356  ;;  %v346_v51 = vpop.permute.xlu1 %345 }
 0x394   :  { %v363_v53 = vsel %vm358_vm2, %v357_v50, 0  ;;  %v2646_v54 = vcombine.low %v346_v51, %v346_v51 }
 0x395   :  { %1732 = vmatpush3.bf16.xpose.msra.mxu0 %v363_v53 }
 0x396   :  { %655 = vrot.lane.b32.xlu0 %v2643_v52, %s2323_s25  ;;  %605 = vrot.lane.b32.xlu1 %v2646_v54, %s2323_s25 }
 0x397   :  { %v354_v55 = vpop.permute.xlu1 %353  ;;  %1737 = vmatprep.subr.bf16.mxu0 %v2318_v15 }
 0x398   :  { %v2651_v56 = vcombine.low %v354_v55, %v354_v55 }
 0x39a   :  { %705 = vrot.lane.b32.xlu1 %v2651_v56, %s2323_s25 }
 0x39c   :  { %1734 = vmatmul.mubr.msk.bf16.vlgmr.msra.gmra.mrb[4].mxu0 %vm358_vm2, %v2622_v39 }
 0x39d   :  { %1739 = vmatprep.mubr.msk.bf16.mxu0 %vm2319_vm1, %v2318_v15 }
 0x400   :  { %v458_v57 = vpop.permute.xlu0 %457  ;;  %v408_v58 = vpop.permute.xlu1 %407 }
 0x401   :  { %v413_v59 = vsel %vm358_vm2, %v408_v58, 0  ;;  %v463_v60 = vsel %vm358_vm2, %v458_v57, 0 }
 0x402   :  { %1738 = vmatpush3.bf16.xpose.msra.mxu0 %v413_v59  ;;  %1744 = vmatpush3.bf16.xpose.msra.mxu1 %v463_v60 }
 0x403   :  { %1749 = vmatprep.subr.bf16.mxu0 %v2318_v15  ;;  %1755 = vmatprep.subr.bf16.mxu1 %v2318_v15 }
 0x404   :  { %v556_v61 = vpop.permute.xlu0 %555  ;;  %v508_v62 = vpop.permute.xlu1 %507 }
 0x405   :  { %v561_v63 = vsel %vm358_vm2, %v556_v61, 0  ;;  %v513_v2 = vsel %vm358_vm2, %v508_v62, 0 }
 0x408   :  { %v656_v3 = vpop.permute.xlu0 %655  ;;  %v606_v4 = vpop.permute.xlu1 %605 }
 0x409   :  { %1740 = vmatmul.mubr.msk.bf16.vlgmr.msra.gmra.mrb[8].mxu0 %vm358_vm2, %v344_v44  ;;  %1746 = vmatmul.mubr.msk.bf16.vlgmr.msra.gmra.mrb[0].mxu1 %vm358_vm2, %v348_v43  ;;  %v661_v5 = vsel %vm358_vm2, %v656_v3, 0  ;;  %v611_v6 = vsel %vm358_vm2, %v606_v4, 0 }
 0x40a   :  { %1750 = vmatpush3.bf16.xpose.msra.mxu0 %v513_v2  ;;  %1756 = vmatpush3.bf16.xpose.msra.mxu1 %v561_v63 }
 0x40b   :  { %1751 = vmatprep.mubr.msk.bf16.mxu0 %vm2319_vm1, %v2318_v15  ;;  %1757 = vmatprep.mubr.msk.bf16.mxu1 %vm2319_vm1, %v2318_v15 }
 0x40c   :  { %1761 = vmatprep.subr.bf16.mxu0 %v2318_v15  ;;  %1767 = vmatprep.subr.bf16.mxu1 %v2318_v15  ;;  %v706_v7 = vpop.permute.xlu1 %705 }
 0x40d   :  { %v711_v8 = vsel %vm358_vm2, %v706_v7, 0 }
 0x411   :  { %1752 = vmatmul.mubr.msk.bf16.vlgmr.msra.gmra.mrb[12].mxu0 %vm358_vm2, %v352_v47  ;;  %1758 = vmatmul.mubr.msk.bf16.vlgmr.msra.gmra.mrb[4].mxu1 %vm358_vm2, %v2626_v42 }
 0x412   :  { %1762 = vmatpush3.bf16.xpose.msra.mxu0 %v611_v6  ;;  %1768 = vmatpush3.bf16.xpose.msra.mxu1 %v661_v5 }
 0x413   :  { %1763 = vmatprep.mubr.msk.bf16.mxu0 %vm2319_vm1, %v2318_v15  ;;  %1769 = vmatprep.mubr.msk.bf16.mxu1 %vm2319_vm1, %v2318_v15 }
 0x414   :  { %1773 = vmatprep.subr.bf16.mxu0 %v2318_v15  ;;  %1779 = vmatprep.subr.bf16.mxu1 %v2318_v15 }
 0x419   :  { %1764 = vmatmul.mubr.msk.bf16.vlgmr.msra.gmra.mrb[16].mxu0 %vm358_vm2, %v346_v51  ;;  %1770 = vmatmul.mubr.msk.bf16.vlgmr.msra.gmra.mrb[8].mxu1 %vm358_vm2, %v350_v48 }
 0x41a   :  { %1774 = vmatpush3.bf16.xpose.msra.mxu0 %v711_v8  ;;  %1775 = vmatprep.mubr.msk.bf16.mxu0 %vm2319_vm1, %v2318_v15 }
 0x41b   :  { %1785 = vmatprep.subr.bf16.mxu0 %v2318_v15  ;;  %1781 = vmatprep.mubr.msk.bf16.mxu1 %vm2319_vm1, %v2318_v15 }
 0x421   :  { %1776 = vmatmul.mubr.msk.bf16.vlgmr.msra.gmra.mrb[20].mxu0 %vm358_vm2, %v354_v55 }
 0x422   :  { %1787 = vmatprep.mubr.msk.bf16.mxu0 %vm2319_vm1, %v2318_v15 }
 0x46f   :  { %v399_v10 = vpop.f32.mrb[4].mxu0 }
 0x470   :  { %v400_v11 = vadd.f32 %v399_v10, %v355_v9  ;;  %v1735_v12 = vpop.f32.mrb[5].mxu0 }
 0x471   :  { %v402_v13 = vpop.f32.mrb[6].mxu0 }
 0x472   :  { %v1736_v14 = vpop.f32.mrb[7].mxu0  ;;  %v753_v16 = vsel %vm358_vm2, %v400_v11, -inf }
 0x473   :  { %754 = vmax.xlane.f32.xlu0 %v753_v16 }
 0x4dc   :  { %v449_v17 = vpop.f32.mrb[8].mxu0  ;;  %v499_v18 = vpop.f32.mrb[0].mxu1 }
 0x4dd   :  { %v2695_v19 = vadd.f32 %v449_v17, %v355_v9  ;;  %v500_v20 = vadd.f32 %v499_v18, %v355_v9  ;;  %v1741_v21 = vpop.f32.mrb[9].mxu0  ;;  %v1747_v22 = vpop.f32.mrb[1].mxu1 }
 0x4de   :  { %v452_v23 = vpop.f32.mrb[10].mxu0  ;;  %v502_v24 = vpop.f32.mrb[2].mxu1 }
 0x4df   :  { %v1742_v25 = vpop.f32.mrb[11].mxu0  ;;  %v1748_v26 = vpop.f32.mrb[3].mxu1  ;;  %v759_v27 = vsel %vm358_vm2, %v500_v20, -inf  ;;  %v756_v28 = vsel %vm358_vm2, %v2695_v19, -inf }
 0x4e0   :  { %760 = vmax.xlane.f32.xlu0 %v759_v27  ;;  %757 = vmax.xlane.f32.xlu1 %v756_v28 }
 0x4e4   :  { %v549_v29 = vpop.f32.mrb[12].mxu0  ;;  %v597_v30 = vpop.f32.mrb[4].mxu1 }
 0x4e5   :  { %v2700_v31 = vadd.f32 %v549_v29, %v355_v9  ;;  %v1753_v32 = vpop.f32.mrb[13].mxu0  ;;  %v1759_v33 = vpop.f32.mrb[5].mxu1  ;;  %v2702_v36 = vadd.f32 %v597_v30, %v355_v9 }
 0x4e6   :  { %v552_v34 = vpop.f32.mrb[14].mxu0  ;;  %v600_v35 = vpop.f32.mrb[6].mxu1 }
 0x4e7   :  { %v1754_v37 = vpop.f32.mrb[15].mxu0  ;;  %v1760_v38 = vpop.f32.mrb[7].mxu1  ;;  %v762_v40 = vsel %vm358_vm2, %v2700_v31, -inf  ;;  %v765_v41 = vsel %vm358_vm2, %v2702_v36, -inf }
 0x4e8   :  { %763 = vmax.xlane.f32.xlu0 %v762_v40 }
 0x4ec   :  { %v697_v43 = vpop.f32.mrb[8].mxu1  ;;  %766 = vmax.xlane.f32.xlu0 %v765_v41  ;;  %v647_v44 = vpop.f32.mrb[16].mxu0 }
 0x4ed   :  { %v2708_v47 = vadd.f32 %v697_v43, %v355_v9  ;;  %v2710_v48 = vadd.f32 %v647_v44, %v355_v9  ;;  %v1765_v50 = vpop.f32.mrb[17].mxu0  ;;  %v1771_v51 = vpop.f32.mrb[9].mxu1 }
 0x4ee   :  { %v650_v53 = vpop.f32.mrb[18].mxu0  ;;  %v700_v55 = vpop.f32.mrb[10].mxu1 }
 0x4ef   :  { %v1766_v57 = vpop.f32.mrb[19].mxu0  ;;  %v1772_v58 = vpop.f32.mrb[11].mxu1  ;;  %v771_v59 = vsel %vm358_vm2, %v2708_v47, -inf  ;;  %v768_v60 = vsel %vm358_vm2, %v2710_v48, -inf }
 0x4f0   :  { %772 = vmax.xlane.f32.xlu0 %v771_v59  ;;  %769 = vmax.xlane.f32.xlu1 %v768_v60 }
 0x4f4   :  { %v747_v61 = vpop.f32.mrb[20].mxu0 }
 0x4f5   :  { %v1777_v62 = vpop.f32.mrb[21].mxu0  ;;  %v2724_v7 = vadd.f32 %v747_v61, %v355_v9 }
 0x4f6   :  { %v750_v63 = vpop.f32.mrb[22].mxu0 }
 0x4f7   :  { %v1778_v2 = vpop.f32.mrb[23].mxu0 }
 0x500   :  { %v755_v3 = vpop.xlane.xlu0 %754 }
 0x501   :  { %898 = vrot.lane.b32.xlu1 %v2635_v46, %s2302_s1  ;;  %v777_v4 = vsub.f32 %v400_v11, %v755_v3  ;;  %v774_v46 = vsel %vm358_vm2, %v2724_v7, -inf }
 0x503   :  { %v785_v5 = vmul.f32 1.442695, %v777_v4 }
 0x505   :  { %946 = vrot.lane.b32.xlu1 %v2633_v45, %s2302_s1  ;;  %1908 = vpow2.f32 %v785_v5 }
 0x506   :  { %849 = vrot.lane.b32.xlu0 %v2622_v39, %s2302_s1 }
 0x50f   :  { %v2722_v6 = vpop.eup %1908 }
 0x510   :  { %v801_v8 = vsel %vm358_vm2, %v2722_v6, 0.0 }
 0x525   :  { %802 = vadd.xlane.f32.xlu0 %v801_v8 }
 0x529   :  { %775 = vmax.xlane.f32.xlu1 %v774_v46 }
 0x53a   :  { %994 = vrot.lane.b32.xlu1 %v2639_v49, %s2302_s1 }
 0x56d   :  { %v761_v39 = vpop.xlane.xlu0 %760  ;;  %v758_v45 = vpop.xlane.xlu1 %757 }
 0x56e   :  { %v779_v10 = vsub.f32 %v500_v20, %v761_v39  ;;  %v778_v11 = vsub.f32 %v2695_v19, %v758_v45 }
 0x570   :  { %v789_v12 = vmul.f32 1.442695, %v779_v10  ;;  %v787_v13 = vmul.f32 1.442695, %v778_v11 }
 0x572   :  { %1910 = vpow2.f32 %v789_v12 }
 0x573   :  { %1912 = vpow2.f32 %v787_v13 }
 0x575   :  { %v764_v9 = vpop.xlane.xlu0 %763 }
 0x576   :  { %v780_v26 = vsub.f32 %v2700_v31, %v764_v9 }
 0x578   :  { %v791_v29 = vmul.f32 1.442695, %v780_v26 }
 0x579   :  { %v767_v14 = vpop.xlane.xlu0 %766 }
 0x57a   :  { %v781_v25 = vsub.f32 %v2702_v36, %v767_v14 }
 0x57c   :  { %v2733_v16 = vpop.eup %1910  ;;  %v793_v27 = vmul.f32 1.442695, %v781_v25 }
 0x57d   :  { %v2735_v17 = vpop.eup %1912  ;;  %v773_v18 = vpop.xlane.xlu0 %772  ;;  %v807_v49 = vsel %vm358_vm2, %v2733_v16, 0.0 }
 0x57e   :  { %v770_v21 = vpop.xlane.xlu1 %769  ;;  %808 = vadd.xlane.f32.xlu0 %v807_v49  ;;  %v804_v20 = vsel %vm358_vm2, %v2735_v17, 0.0  ;;  %v783_v28 = vsub.f32 %v2708_v47, %v773_v18  ;;  %1914 = vpow2.f32 %v793_v27 }
 0x57f   :  { %805 = vadd.xlane.f32.xlu1 %v804_v20  ;;  %v782_v30 = vsub.f32 %v2710_v48, %v770_v21  ;;  %1916 = vpow2.f32 %v791_v29 }
 0x580   :  { %v797_v32 = vmul.f32 1.442695, %v783_v28 }
 0x581   :  { %v850_v19 = vpop.permute.xlu0 %849  ;;  %v795_v33 = vmul.f32 1.442695, %v782_v30 }
 0x582   :  { %v899_v22 = vpop.permute.xlu1 %898  ;;  %v856_v23 = vsel %vm854_vm3, %v850_v19, 0  ;;  %1918 = vpow2.f32 %v797_v32 }
 0x583   :  { %v904_v24 = vsel %vm854_vm3, %v899_v22, 0  ;;  %1780 = vmatpush3.bf16.msra.mxu1 %v856_v23  ;;  %1920 = vpow2.f32 %v795_v33 }
 0x584   :  { %1786 = vmatpush3.bf16.msra.mxu0 %v904_v24  ;;  %1791 = vmatprep.subr.bf16.mxu1 %v2318_v15 }
 0x585   :  { %1797 = vmatprep.subr.bf16.mxu0 %v2318_v15 }
 0x590   :  { %1090 = vrot.lane.b32.xlu1 %v2646_v54, %s2302_s1  ;;  %v2753_v54 = vpop.eup %1914 }
 0x591   :  { %v2755_v34 = vpop.eup %1916  ;;  %v813_v31 = vsel %vm358_vm2, %v2753_v54, 0.0 }
 0x592   :  { %v2759_v36 = vpop.eup %1918  ;;  %v810_v37 = vsel %vm358_vm2, %v2755_v34, 0.0 }
 0x593   :  { %v2763_v38 = vpop.eup %1920  ;;  %v819_v41 = vsel %vm358_vm2, %v2759_v36, 0.0 }
 0x594   :  { %1042 = vrot.lane.b32.xlu0 %v2626_v42, %s2302_s1  ;;  %v947_v42 = vpop.permute.xlu1 %946  ;;  %v816_v44 = vsel %vm358_vm2, %v2763_v38, 0.0 }
 0x595   :  { %v952_v53 = vsel %vm854_vm3, %v947_v42, 0 }
 0x5b2   :  { %v803_v35 = vpop.xlane.xlu0 %802 }
 0x5b3   :  { %1922 = vrcp.f32 %v803_v35  ;;  %814 = vadd.xlane.f32.xlu0 %v813_v31 }
 0x5b4   :  { %811 = vadd.xlane.f32.xlu1 %v810_v37 }
 0x5b6   :  { %v776_v40 = vpop.xlane.xlu1 %775 }
 0x5b7   :  { %v784_v43 = vsub.f32 %v2724_v7, %v776_v40  ;;  %820 = vadd.xlane.f32.xlu0 %v819_v41 }
 0x5b8   :  { %817 = vadd.xlane.f32.xlu1 %v816_v44 }
 0x5b9   :  { %v799_v47 = vmul.f32 1.442695, %v784_v43 }
 0x5ba   :  { %v995_v58 = vpop.permute.xlu1 %994 }
 0x5bb   :  { %1924 = vpow2.f32 %v799_v47 }
 0x5bd   :  { %v1923_v48 = vpop.eup %1922 }
 0x5be   :  { %v833_v50 = vmul.f32 %v1923_v48, %v2722_v6 }
 0x5c0   :  { %v841_v51 = vpack.c.bf16 %v833_v50, %v833_v50 }
 0x5c2   :  { %1782 = vmatmul.mubr.msk.bf16.vlgmr.msra.gmra.mrb[12].mxu1 %vm358_vm2, %v841_v51 }
 0x5c3   :  { %1792 = vmatpush3.bf16.msra.mxu1 %v952_v53  ;;  %1793 = vmatprep.mubr.msk.bf16.mxu1 %vm2319_vm1, %v2318_v15 }
 0x5c4   :  { %1803 = vmatprep.subr.bf16.mxu1 %v2318_v15 }
 0x5c5   :  { %v2776_v55 = vpop.eup %1924 }
 0x5c6   :  { %v822_v57 = vsel %vm358_vm2, %v2776_v55, 0.0 }
 0x5c7   :  { %823 = vadd.xlane.f32.xlu1 %v822_v57  ;;  %v1892_v57 = vld [vmem:[#allocation11] sm:$0xff]  }
 0x5cd   :  { %1138 = vrot.lane.b32.xlu0 %v2643_v52, %s2302_s1  ;;  %v1000_v52 = vsel %vm854_vm3, %v995_v58, 0 }
 0x5d8   :  { %1186 = vrot.lane.b32.xlu1 %v2651_v56, %s2302_s1  ;;  %s2324_s1 = smov 16  }
 0x60b   :  { %v809_v59 = vpop.xlane.xlu0 %808 }
 0x60c   :  { %1926 = vrcp.f32 %v809_v59  ;;  %v806_v60 = vpop.xlane.xlu1 %805 }
 0x60d   :  { %1928 = vrcp.f32 %v806_v60 }
 0x60f   :  { %v1043_v3 = vpop.permute.xlu0 %1042 }
 0x610   :  { %v1048_v6 = vsel %vm854_vm3, %v1043_v3, 0  ;;  %v1091_v56 = vpop.permute.xlu1 %1090  ;;  %v1893_v3 = vld [vmem:[#allocation11 + $0x8] sm:$0xff]  }
 0x611   :  { %v1096_v21 = vsel %vm854_vm3, %v1091_v56, 0 }
 0x616   :  { %v1927_v61 = vpop.eup %1926 }
 0x617   :  { %v1929_v62 = vpop.eup %1928  ;;  %v835_v63 = vmul.f32 %v1927_v61, %v2733_v16 }
 0x618   :  { %v834_v2 = vmul.f32 %v1929_v62, %v2735_v17 }
 0x619   :  { %v843_v4 = vpack.c.bf16 %v835_v63, %v835_v63 }
 0x61a   :  { %v842_v5 = vpack.c.bf16 %v834_v2, %v834_v2 }
 0x61b   :  { %1794 = vmatmul.mubr.msk.bf16.vlgmr.msra.gmra.mrb[16].mxu1 %vm358_vm2, %v843_v4 }
 0x61c   :  { %1788 = vmatmul.mubr.msk.bf16.vlgmr.msra.gmra.mrb[24].mxu0 %vm358_vm2, %v842_v5  ;;  %1804 = vmatpush3.bf16.msra.mxu1 %v1048_v6 }
 0x61d   :  { %1798 = vmatpush3.bf16.msra.mxu0 %v1000_v52  ;;  %1799 = vmatprep.mubr.msk.bf16.mxu0 %vm2319_vm1, %v2318_v15 }
 0x61e   :  { %1805 = vmatprep.mubr.msk.bf16.mxu1 %vm2319_vm1, %v2318_v15  ;;  %1809 = vmatprep.subr.bf16.mxu0 %v2318_v15 }
 0x61f   :  { %1815 = vmatprep.subr.bf16.mxu1 %v2318_v15 }
 0x640   :  { %v815_v7 = vpop.xlane.xlu0 %814 }
 0x641   :  { %1930 = vrcp.f32 %v815_v7  ;;  %v812_v8 = vpop.xlane.xlu1 %811 }
 0x642   :  { %1932 = vrcp.f32 %v812_v8 }
 0x644   :  { %v821_v46 = vpop.xlane.xlu0 %820 }
 0x645   :  { %1934 = vrcp.f32 %v821_v46  ;;  %v818_v39 = vpop.xlane.xlu1 %817 }
 0x646   :  { %1936 = vrcp.f32 %v818_v39 }
 0x648   :  { %v1139_v13 = vpop.permute.xlu0 %1138 }
 0x649   :  { %v1144_v18 = vsel %vm854_vm3, %v1139_v13, 0 }
 0x64b   :  { %v1931_v45 = vpop.eup %1930 }
 0x64c   :  { %v1933_v10 = vpop.eup %1932  ;;  %v837_v11 = vmul.f32 %v1931_v45, %v2753_v54 }
 0x64d   :  { %v836_v12 = vmul.f32 %v1933_v10, %v2755_v34 }
 0x64e   :  { %v845_v9 = vpack.c.bf16 %v837_v11, %v837_v11 }
 0x64f   :  { %v1935_v14 = vpop.eup %1934  ;;  %v844_v16 = vpack.c.bf16 %v836_v12, %v836_v12 }
 0x650   :  { %v1937_v17 = vpop.eup %1936  ;;  %1806 = vmatmul.mubr.msk.bf16.vlgmr.msra.gmra.mrb[20].mxu1 %vm358_vm2, %v845_v9  ;;  %v839_v49 = vmul.f32 %v1935_v14, %v2759_v36 }
 0x651   :  { %1800 = vmatmul.mubr.msk.bf16.vlgmr.msra.gmra.mrb[28].mxu0 %vm358_vm2, %v844_v16  ;;  %1816 = vmatpush3.bf16.msra.mxu1 %v1144_v18  ;;  %v838_v20 = vmul.f32 %v1937_v17, %v2763_v38 }
 0x652   :  { %1810 = vmatpush3.bf16.msra.mxu0 %v1096_v21  ;;  %1811 = vmatprep.mubr.msk.bf16.mxu0 %vm2319_vm1, %v2318_v15  ;;  %v847_v22 = vpack.c.bf16 %v839_v49, %v839_v49 }
 0x653   :  { %1817 = vmatprep.mubr.msk.bf16.mxu1 %vm2319_vm1, %v2318_v15  ;;  %1821 = vmatprep.subr.bf16.mxu0 %v2318_v15  ;;  %v846_v23 = vpack.c.bf16 %v838_v20, %v838_v20 }
 0x654   :  { %v824_v19 = vpop.xlane.xlu1 %823  ;;  %1827 = vmatprep.subr.bf16.mxu1 %v2318_v15 }
 0x655   :  { %1938 = vrcp.f32 %v824_v19 }
 0x658   :  { %1818 = vmatmul.mubr.msk.bf16.vlgmr.msra.gmra.mrb[24].mxu1 %vm358_vm2, %v847_v22  ;;  %v1187_v24 = vpop.permute.xlu1 %1186 }
 0x659   :  { %1812 = vmatmul.mubr.msk.bf16.vlgmr.msra.gmra.mrb[32].mxu0 %vm358_vm2, %v846_v23  ;;  %v1192_v25 = vsel %vm854_vm3, %v1187_v24, 0  ;;  %1831 = vmatprep.mubr.msk.bf16.mxu1 %vm2319_vm1, %v2318_v15  ;;  %v1649_v23 = vld [vmem:[#allocation13] ss:$0 sm:$0xff] }
 0x65a   :  { %1822 = vmatpush3.bf16.msra.mxu0 %v1192_v25  ;;  %1823 = vmatprep.mubr.msk.bf16.mxu0 %vm2319_vm1, %v2318_v15 }
 0x65b   :  { %1835 = vmatprep.subr.bf16.mxu0 %v2318_v15  ;;  %1828 = vmatpush3.bf16.msra.mxu1 %v1892_v57 }
 0x65c   :  { %1829 = vmatprep.subr.bf16.mxu1 %v2318_v15 }
 0x65f   :  { %v1939_v26 = vpop.eup %1938  ;;  %1830 = vmatpush3.bf16.msra.mxu1 %v1893_v3 }
 0x660   :  { %v840_v27 = vmul.f32 %v1939_v26, %v2776_v55  ;;  %1843 = vmatprep.subr.bf16.mxu1 %v2318_v15 }
 0x662   :  { %v848_v28 = vpack.c.bf16 %v840_v27, %v840_v27 }
 0x664   :  { %1824 = vmatmul.mubr.msk.bf16.vlgmr.msra.gmra.mrb[36].mxu0 %vm358_vm2, %v848_v28 }
 0x665   :  { %1839 = vmatprep.mubr.msk.bf16.mxu0 %vm2319_vm1, %v2318_v15 }
 0x695   :  { %v2822_v29 = vpop.f32.mrb[12].mxu1 }
 0x696   :  { %v1783_v30 = vpop.f32.mrb[13].mxu1  ;;  %v1234_v13 = vpack.c.bf16 %v2822_v29, %v2822_v29 }
 0x697   :  { %v895_v32 = vpop.f32.mrb[14].mxu1 }
 0x698   :  { %v1784_v33 = vpop.f32.mrb[15].mxu1 }
 0x6ee   :  { %v988_v54 = vpop.f32.mrb[16].mxu1 }
 0x6ef   :  { %v940_v34 = vpop.f32.mrb[24].mxu0  ;;  %v1795_v42 = vpop.f32.mrb[17].mxu1  ;;  %v1236_v41 = vpack.c.bf16 %v988_v54, %v988_v54 }
 0x6f0   :  { %v1235_v35 = vpack.c.bf16 %v940_v34, %v940_v34  ;;  %v1789_v31 = vpop.f32.mrb[25].mxu0  ;;  %v991_v36 = vpop.f32.mrb[18].mxu1 }
 0x6f1   :  { %v943_v37 = vpop.f32.mrb[26].mxu0  ;;  %v1796_v38 = vpop.f32.mrb[19].mxu1 }
 0x6f2   :  { %1244 = vrot.lane.b32.xlu0 %v1235_v35, %s2310_s30  ;;  %v1790_v40 = vpop.f32.mrb[27].mxu0 }
 0x6f6   :  { %1250 = vrot.lane.b32.xlu0 %v1236_v41, %s2324_s1  ;;  %v1894_v41 = vld [vmem:[#allocation17] sm:$0xff]  }
 0x6f7   :  { %1836 = vmatpush3.bf16.msra.mxu0 %v1894_v41 }
 0x6f8   :  { %1837 = vmatprep.subr.bf16.mxu0 %v2318_v15 }
 0x723   :  { %v1084_v43 = vpop.f32.mrb[20].mxu1 }
 0x724   :  { %v1036_v44 = vpop.f32.mrb[28].mxu0  ;;  %v1807_v47 = vpop.f32.mrb[21].mxu1  ;;  %v1238_v9 = vpack.c.bf16 %v1084_v43, %v1084_v43  ;;  %v1895_v43 = vld [vmem:[#allocation17 + $0x8] sm:$0xff]  }
 0x725   :  { %v1237_v48 = vpack.c.bf16 %v1036_v44, %v1036_v44  ;;  %v1801_v50 = vpop.f32.mrb[29].mxu0  ;;  %v1087_v51 = vpop.f32.mrb[22].mxu1  ;;  %1838 = vmatpush3.bf16.msra.mxu0 %v1895_v43 }
 0x726   :  { %v1039_v53 = vpop.f32.mrb[30].mxu0  ;;  %v1808_v55 = vpop.f32.mrb[23].mxu1 }
 0x727   :  { %1256 = vrot.lane.b32.xlu0 %v1237_v48, %s2325_s3  ;;  %v1802_v58 = vpop.f32.mrb[31].mxu0 }
 0x728   :  { %v1654_v58 = vld [vmem:[#allocation14] ss:$0 sm:$0xff] }
 0x72b   :  { %v1180_v59 = vpop.f32.mrb[24].mxu1 }
 0x72c   :  { %v1132_v60 = vpop.f32.mrb[32].mxu0  ;;  %v1819_v61 = vpop.f32.mrb[25].mxu1  ;;  %v1240_v52 = vpack.c.bf16 %v1180_v59, %v1180_v59 }
 0x72d   :  { %v1239_v62 = vpack.c.bf16 %v1132_v60, %v1132_v60  ;;  %v1813_v63 = vpop.f32.mrb[33].mxu0  ;;  %v1183_v2 = vpop.f32.mrb[26].mxu1 }
 0x72e   :  { %v1135_v4 = vpop.f32.mrb[34].mxu0  ;;  %v1820_v5 = vpop.f32.mrb[27].mxu1 }
 0x72f   :  { %1246 = vrot.lane.b32.xlu1 %v1239_v62, %s2310_s30  ;;  %v1814_v6 = vpop.f32.mrb[35].mxu0  ;;  %v1655_v62 = vld [vmem:[#allocation16] ss:$0 sm:$0xff]  ;;  %v1896_v5 = vld [vmem:[#allocation20] sm:$0xff]  }
 0x730   :  { %v1897_v6 = vld [vmem:[#allocation20 + $0x8] sm:$0xff]  }
 0x733   :  { %1252 = vrot.lane.b32.xlu1 %v1240_v52, %s2324_s1  ;;  %v1898_v52 = vld [vmem:[#allocation20 + $0x10] sm:$0xff]  }
 0x737   :  { %v1228_v56 = vpop.f32.mrb[36].mxu0 }
 0x738   :  { %v1241_v7 = vpack.c.bf16 %v1228_v56, %v1228_v56  ;;  %v1825_v8 = vpop.f32.mrb[37].mxu0  ;;  %v1899_v56 = vld [vmem:[#allocation20 + $0x18] sm:$0xff]  }
 0x739   :  { %v1231_v46 = vpop.f32.mrb[38].mxu0  ;;  %v1901_v8 = vld [vmem:[#allocation20 + $0x28] sm:$0xff]  }
 0x73a   :  { %1258 = vrot.lane.b32.xlu1 %v1241_v7, %s2325_s3  ;;  %v1826_v39 = vpop.f32.mrb[39].mxu0  ;;  %v1900_v7 = vld [vmem:[#allocation20 + $0x20] sm:$0xff]   ;;  %v1902_v46 = vld [vmem:[#allocation20 + $0x30] sm:$0xff]  }
 0x73b   :  { %v1903_v39 = vld [vmem:[#allocation20 + $0x38] sm:$0xff]  }
 0x764   :  { %v1245_v45 = vpop.permute.xlu0 %1244 }
 0x765   :  { %v1262_v16 = vsel %vm358_vm2, %v1234_v13, %v1245_v45  ;;  %v1656_v45 = vld [vmem:[#allocation19] ss:$0 sm:$0xff] }
 0x768   :  { %v1251_v11 = vpop.permute.xlu0 %1250 }
 0x769   :  { %v1268_v18 = vsel %vm1266_vm4, %v1262_v16, %v1251_v11 }
 0x799   :  { %v1257_v14 = vpop.permute.xlu0 %1256 }
 0x79a   :  { %v1273_v20 = vsel %vm1271_vm5, %v1268_v18, %v1257_v14 }
 0x7a1   :  { %v1247_v10 = vpop.permute.xlu1 %1246 }
 0x7a2   :  { %v1265_v17 = vsel %vm358_vm2, %v1238_v9, %v1247_v10 }
 0x7a5   :  { %v1253_v12 = vpop.permute.xlu1 %1252 }
 0x7a6   :  { %v1270_v21 = vsel %vm1266_vm4, %v1265_v17, %v1253_v12 }
 0x7ac   :  { %v1259_v49 = vpop.permute.xlu1 %1258 }
 0x7ad   :  { %v1275_v19 = vsel %vm1271_vm5, %v1270_v21, %v1259_v49 }
 0x7ae   :  { %v1650_v22 = vcombine.low %v1273_v20, %v1275_v19 }
 0x7b0   :  { %1832 = vmatmul.mubr.msk.bf16.vlgmr.msra.gmra.mrb[28].mxu1 %vm225_vm0, %v1650_v22 }
 0x7b1   :  { %1859 = vmatprep.mubr.msk.bf16.mxu1 %vm2319_vm1, %v2318_v15  ;;  %1844 = vmatpush3.bf16.msra.mxu1 %v1896_v5 }
 0x7b2   :  { %1845 = vmatprep.subr.bf16.mxu1 %v2318_v15 }
 0x7b5   :  { %1846 = vmatpush3.bf16.msra.mxu1 %v1897_v6 }
 0x7b6   :  { %1847 = vmatprep.subr.bf16.mxu1 %v2318_v15 }
 0x7b9   :  { %1848 = vmatpush3.bf16.msra.mxu1 %v1898_v52 }
 0x7ba   :  { %1849 = vmatprep.subr.bf16.mxu1 %v2318_v15 }
 0x7bd   :  { %1850 = vmatpush3.bf16.msra.mxu1 %v1899_v56 }
 0x7be   :  { %1851 = vmatprep.subr.bf16.mxu1 %v2318_v15 }
 0x7c1   :  { %1852 = vmatpush3.bf16.msra.mxu1 %v1900_v7 }
 0x7c2   :  { %1853 = vmatprep.subr.bf16.mxu1 %v2318_v15 }
 0x7c5   :  { %1854 = vmatpush3.bf16.msra.mxu1 %v1901_v8 }
 0x7c6   :  { %1855 = vmatprep.subr.bf16.mxu1 %v2318_v15 }
 0x7c9   :  { %1856 = vmatpush3.bf16.msra.mxu1 %v1902_v46 }
 0x7ca   :  { %1857 = vmatprep.subr.bf16.mxu1 %v2318_v15 }
 0x7cd   :  { %1858 = vmatpush3.bf16.msra.mxu1 %v1903_v39 }
 0x883   :  { %v1341_v24 = vpop.f32.mrb[28].mxu1 }
 0x884   :  { %v1342_v25 = vadd.f32 %v1649_v23, %v1341_v24  ;;  %v1833_v26 = vpop.f32.mrb[29].mxu1 }
 0x885   :  { %v1344_v27 = vpop.f32.mrb[30].mxu1 }
 0x886   :  { %v2836_v28 = vadd.f32 %v1342_v25, %v2599_v0  ;;  %v1345_v29 = vadd.f32 %v1649_v23, %v1344_v27  ;;  %v1834_v30 = vpop.f32.mrb[31].mxu1  ;;  %v1662_v27 = vld [vmem:[#allocation22] ss:$0 sm:$0xff] }
 0x888   :  { %v2839_v32 = vadd.f32 %v1345_v29, %v2601_v1  ;;  %v1352_v33 = vsel %vm225_vm0, %v2836_v28, 0.0 }
 0x889   :  { %1353 = vadd.xlane.f32.xlu0 %v1352_v33 }
 0x88a   :  { %v1355_v54 = vsel %vm225_vm0, %v2839_v32, 0.0 }
 0x88b   :  { %1356 = vadd.xlane.f32.xlu1 %v1355_v54 }
 0x916   :  { %v1354_v34 = vpop.xlane.xlu0 %1353 }
 0x917   :  { %v1358_v42 = vmul.f32 0.03125, %v1354_v34 }
 0x918   :  { %v1357_v35 = vpop.xlane.xlu1 %1356 }
 0x919   :  { %v1360_v31 = vsub.f32 %v2836_v28, %v1358_v42  ;;  %v1359_v0 = vmul.f32 0.03125, %v1357_v35 }
 0x91b   :  { %v1361_v36 = vsub.f32 %v2839_v32, %v1359_v0  ;;  %v1362_v37 = vmul.f32 %v1360_v31, %v1360_v31 }
 0x91d   :  { %v1364_v1 = vsel %vm225_vm0, %v1362_v37, 0.0  ;;  %v1363_v38 = vmul.f32 %v1361_v36, %v1361_v36 }
 0x91e   :  { %1365 = vadd.xlane.f32.xlu0 %v1364_v1 }
 0x91f   :  { %v1367_v40 = vsel %vm225_vm0, %v1363_v38, 0.0 }
 0x922   :  { %1368 = vadd.xlane.f32.xlu0 %v1367_v40 }
 0x9ab   :  { %v1366_v44 = vpop.xlane.xlu0 %1365 }
 0x9ac   :  { %v1370_v47 = vmul.f32 0.03125, %v1366_v44 }
 0x9ae   :  { %v1372_v48 = vadd.f32 1e-05, %v1370_v47 }
 0x9af   :  { %v1369_v50 = vpop.xlane.xlu0 %1368 }
 0x9b0   :  { %1940 = vrsqrt.f32 %v1372_v48  ;;  %v1371_v51 = vmul.f32 0.03125, %v1369_v50 }
 0x9b2   :  { %v1373_v53 = vadd.f32 1e-05, %v1371_v51 }
 0x9b4   :  { %1942 = vrsqrt.f32 %v1373_v53 }
 0x9ba   :  { %v1941_v55 = vpop.eup %1940 }
 0x9bb   :  { %v1376_v57 = vmul.f32 %v1941_v55, %v1360_v31 }
 0x9bd   :  { %v1384_v60 = vmul.f32 %v1654_v58, %v1376_v57 }
 0x9be   :  { %v1943_v59 = vpop.eup %1942 }
 0x9bf   :  { %v1377_v61 = vmul.f32 %v1943_v59, %v1361_v36  ;;  %v1392_v2 = vadd.f32 %v1655_v62, %v1384_v60 }
 0x9c1   :  { %v1385_v63 = vmul.f32 %v1654_v58, %v1377_v61 }
 0x9c3   :  { %v1393_v3 = vadd.f32 %v1655_v62, %v1385_v63 }
 0x9c5   :  { %v1394_v4 = vpack.c.bf16 %v1393_v3, %v1392_v2 }
 0x9c7   :  { %1840 = vmatmul.mubr.msk.bf16.vlgmr.msra.gmra.mrb[40].mxu0 %vm225_vm0, %v1394_v4 }
 0xa9a   :  { %v1455_v10 = vpop.f32.mrb[40].mxu0 }
 0xa9b   :  { %v1456_v11 = vadd.f32 %v1656_v45, %v1455_v10  ;;  %v1841_v12 = vpop.f32.mrb[41].mxu0 }
 0xa9c   :  { %v1458_v13 = vpop.f32.mrb[42].mxu0 }
 0xa9d   :  { %v1660_v9 = vmul.f32 -1.702, %v1456_v11  ;;  %v1459_v14 = vadd.f32 %v1656_v45, %v1458_v13  ;;  %v1842_v16 = vpop.f32.mrb[43].mxu0 }
 0xa9f   :  { %v1466_v17 = vmul.f32 1.442695, %v1660_v9  ;;  %v1661_v18 = vmul.f32 -1.702, %v1459_v14 }
 0xaa1   :  { %1944 = vpow2.f32 %v1466_v17  ;;  %v1468_v21 = vmul.f32 1.442695, %v1661_v18 }
 0xaa3   :  { %1946 = vpow2.f32 %v1468_v21 }
 0xaab   :  { %v1945_v49 = vpop.eup %1944 }
 0xaac   :  { %v1470_v20 = vadd.f32 1.0, %v1945_v49 }
 0xaad   :  { %v1947_v19 = vpop.eup %1946 }
 0xaae   :  { %1948 = vrcp.f32 %v1470_v20  ;;  %v1471_v15 = vadd.f32 1.0, %v1947_v19 }
 0xab0   :  { %1950 = vrcp.f32 %v1471_v15 }
 0xab8   :  { %v1949_v22 = vpop.eup %1948 }
 0xab9   :  { %v1476_v24 = vmul.f32 %v1949_v22, %v1456_v11 }
 0xaba   :  { %v1951_v23 = vpop.eup %1950 }
 0xabb   :  { %v1477_v25 = vmul.f32 %v1951_v23, %v1459_v14 }
 0xabd   :  { %v1478_v26 = vpack.c.bf16 %v1477_v25, %v1476_v24 }
 0xabf   :  { %1860 = vmatmul.mubr.bf16.vlgmr.msra.gmra.mrb[32].mxu1 %v1478_v26 }
 0xb92   :  { %v1584_v29 = vpop.f32.mrb[32].mxu1 }
 0xb93   :  { %v1585_v30 = vadd.f32 %v1662_v27, %v1584_v29  ;;  %v1861_v33 = vpop.f32.mrb[33].mxu1 }
 0xb94   :  { %v1587_v54 = vpop.f32.mrb[34].mxu1 }
 0xb95   :  { %v1591_v34 = vadd.f32 %v1585_v30, %v2836_v28  ;;  %v1588_v42 = vadd.f32 %v1662_v27, %v1587_v54  ;;  %v1862_v35 = vpop.f32.mrb[35].mxu1 }
 0xb97   :  { %1593 = vst.msk [vmem:[#allocation25] sm:$0xff] %vm225_vm0, %v1591_v34  ;;  %v1592_v31 = vadd.f32 %v1588_v42, %v2839_v32 }
 0xb99   :  { %1594 = vst.msk [vmem:[#allocation25 + $0x8] sm:$0xff] %vm225_vm0, %v1592_v31 }
 0xb9a   :  { %2271 = shalt.err (!%p2268_p4)
}
 0xb9b   :  { %s2272_s26 = scalar_lea.hbm %s2891_s14, 256 }
 0xb9c   :  { %p2273_p5 = scmp.ne.s32.totalorder %s2891_s14, %s2272_s26  ;;  %p2276_p6 = scmp.lt.u32.totalorder %s2272_s26, %s2891_s14 }
 0xb9e   :  { %p2278_p7 = pnand %p2276_p6, %p2273_p5 }
 0xba0   :  { %2281 = shalt.err (!%p2278_p7)
}
 0xba1   :  { %1606 = dma.vmem_to_hbm [thread:$0]  %s1601_s9, 256, %s2891_s14, [#allocation4], %s2309_s11, %s2309_s11, %s2310_s30  }
 0xba2   :  { %2298 = dma.done.wait [#allocation4], 256  }
 0xba3   :  { %2299 = vsyncadd [#allocation4], 4294967040 }
 0xba4   :  { %1610 = vsyncpa [#allocation3], 1 }
 0xba5   :  { %1611 = vsyncpa [#allocation6], 1 }
 0xba6   :  { %1612 = vsyncpa [#allocation9], 1 }
 0xba7   :  { %1613 = vsyncpa [#allocation12], 1 }
 0xba8   :  { %1614 = vsyncpa [#allocation15], 1 }
 0xba9   :  { %1615 = vsyncpa [#allocation18], 1 }
 0xbaa   :  { %1616 = vsyncpa [#allocation21], 1 }
 0xbab   :  { %1617 = vsyncpa [#allocation24], 1 }
 0xbac   :  { %1618 = vsyncpa [#allocation4], 1 }

</bundles_post_ra>
